<compile_context>
chip_gen: v7x
topology: tpu7x:2x2x1
jax: 0.10.0
libtpu: 0.0.40
codegen_flags: <defaults>
</compile_context>

<pallas_src>
import functools

import jax
import jax.numpy as jnp
from jax.experimental import pallas as pl
from jax.experimental.pallas import tpu as pltpu

F_PAD = 128          # lane-pad every feature dim to one full vreg lane width
EPS = 1e-12          # min-max normalization epsilon


# ----------------------------------------------------------------------------
# Kernel 1: xw = (optionally min-max normalized) x @ W   -> lane-dense bf16
# ----------------------------------------------------------------------------
def _xw_plain_kernel(x_ref, w_ref, xw_ref):
    xw = jnp.dot(x_ref[...].astype(jnp.bfloat16), w_ref[...],
                 preferred_element_type=jnp.float32)
    xw_ref[...] = xw.astype(xw_ref.dtype)


def _xw_norm_kernel(x_ref, cmin_ref, cmax_ref, w_ref, xw_ref):
    # Fused GPU_data_normal_2d of the *previous* layer's output (f32 math).
    cmin = cmin_ref[...]
    inv = pl.reciprocal(cmax_ref[...] - cmin + EPS, approx=True)   # EUP slot
    xn = (x_ref[...] - cmin) * inv
    xw = jnp.dot(xn.astype(jnp.bfloat16), w_ref[...],
                 preferred_element_type=jnp.float32)
    xw_ref[...] = xw.astype(xw_ref.dtype)


# ----------------------------------------------------------------------------
# Kernel 2: h = act(adj_tile @ xw); per-tile column min/max side outputs
# ----------------------------------------------------------------------------
def _prop_kernel(adj_ref, xw_ref, h_ref, cmin_ref, cmax_ref, *, activation):
    h = jnp.dot(adj_ref[...], xw_ref[...], preferred_element_type=jnp.float32)
    if activation == "leaky_relu":          # F.leaky_relu, default slope 0.01
        h = jnp.where(h >= 0, h, 0.01 * h)
    else:                                   # torch.sigmoid
        h = jax.nn.sigmoid(h)
    h_ref[...] = h.astype(h_ref.dtype)
    # Per-tile column min/max (XLU reductions, otherwise-idle slot); broadcast
    # to a full (8, 128) sublane tile so the output block obeys TPU tiling.
    cmin_ref[...] = jnp.broadcast_to(jnp.min(h, axis=0, keepdims=True), (8, F_PAD))
    cmax_ref[...] = jnp.broadcast_to(jnp.max(h, axis=0, keepdims=True), (8, F_PAD))


# ----------------------------------------------------------------------------
# One GCN layer: phase A (x@W, fused input normalization) + phase B (adj prop)
# ----------------------------------------------------------------------------
def gcn_layer(adj_bf16, x, w_bf16, col_min, col_max, *, activation, tm):
    n = adj_bf16.shape[0]
    grid_m = n // tm
    parallel = pltpu.CompilerParams(dimension_semantics=("parallel",))

    # ---- phase A: xw = normalize?(x) @ W  (tiny, lane-dense, bf16 out) -----
    x_spec = pl.BlockSpec((tm, F_PAD), lambda i: (i, 0))
    w_spec = pl.BlockSpec((F_PAD, F_PAD), lambda i: (0, 0))
    vec_spec = pl.BlockSpec((1, F_PAD), lambda i: (0, 0))
    if col_min is None:
        xw_kernel, in_specs, args = _xw_plain_kernel, [x_spec, w_spec], (x, w_bf16)
    else:
        xw_kernel = _xw_norm_kernel
        in_specs = [x_spec, vec_spec, vec_spec, w_spec]
        args = (x, col_min, col_max, w_bf16)
    xw = pl.pallas_call(
        xw_kernel,
        out_shape=jax.ShapeDtypeStruct((n, F_PAD), jnp.bfloat16),
        grid=(grid_m,),
        in_specs=in_specs,
        out_specs=pl.BlockSpec((tm, F_PAD), lambda i: (i, 0)),
        compiler_params=parallel,
        cost_estimate=pl.CostEstimate(
            flops=2 * n * F_PAD * F_PAD, transcendentals=0,
            bytes_accessed=n * F_PAD * 4 + F_PAD * F_PAD * 2 + n * F_PAD * 2),
    )(*args)

    # ---- phase B: h = act(adj @ xw), streamed over adj row tiles -----------
    trans = n * F_PAD if activation == "sigmoid" else 0
    h, mins, maxs = pl.pallas_call(
        functools.partial(_prop_kernel, activation=activation),
        out_shape=(
            jax.ShapeDtypeStruct((n, F_PAD), jnp.float32),
            jax.ShapeDtypeStruct((grid_m * 8, F_PAD), jnp.float32),
            jax.ShapeDtypeStruct((grid_m * 8, F_PAD), jnp.float32),
        ),
        grid=(grid_m,),
        in_specs=[
            pl.BlockSpec((tm, n), lambda i: (i, 0)),      # adj row tile (bf16)
            pl.BlockSpec((n, F_PAD), lambda i: (0, 0)),   # xw resident (bf16)
        ],
        out_specs=(
            pl.BlockSpec((tm, F_PAD), lambda i: (i, 0)),
            pl.BlockSpec((8, F_PAD), lambda i: (i, 0)),
            pl.BlockSpec((8, F_PAD), lambda i: (i, 0)),
        ),
        compiler_params=parallel,
        cost_estimate=pl.CostEstimate(
            flops=2 * n * n * F_PAD, transcendentals=trans,
            bytes_accessed=n * n * 2 + n * F_PAD * 2 + n * F_PAD * 4
                           + 2 * grid_m * 8 * F_PAD * 4),
    )(adj_bf16, xw)

    # Global column min/max: tiny XLA reduce over (grid_m*8, 128); applied
    # fused inside the NEXT layer's x@W kernel.
    return (h,
            jnp.min(mins, axis=0, keepdims=True),
            jnp.max(maxs, axis=0, keepdims=True))


# ----------------------------------------------------------------------------
# GAE model: parameter init + forward (encode -> decode)
# ----------------------------------------------------------------------------
def glorot_init(key, in_dim, out_dim):
    r = jnp.sqrt(6.0 / (in_dim + out_dim))
    return jax.random.uniform(key, (in_dim, out_dim), jnp.float32, -r, r)


def init_gae_params(key, input_dim, hidden1_dim, hidden2_dim, extend2_dim, num):
    k1, k2, k3, k4 = jax.random.split(key, 4)
    return {
        "base_gcn": glorot_init(k1, input_dim, hidden1_dim),
        "gcn_mean": glorot_init(k2, hidden1_dim, hidden2_dim),
        "gcn_out1": glorot_init(k3, hidden2_dim, extend2_dim),
        "gcn_out": glorot_init(k4, extend2_dim, num),
    }


def _pad2(a, rows, cols):
    return jnp.pad(a, ((0, rows - a.shape[0]), (0, cols - a.shape[1])))


def gae_forward(params, adj, x, *, num):
    n = adj.shape[0]
    tm = 256 if n % 256 == 0 else (128 if n % 128 == 0 else n)
    assert n % tm == 0, "node count must tile evenly (pad adj/x if not)"

    adj_bf16 = adj.astype(jnp.bfloat16)          # cast once, streamed 4x
    x_pad = _pad2(x, n, F_PAD)                   # lane-pad features to 128
    w = [_pad2(params[k], F_PAD, F_PAD).astype(jnp.bfloat16)
         for k in ("base_gcn", "gcn_mean", "gcn_out1", "gcn_out")]

    # encode
    h, mn, mx = gcn_layer(adj_bf16, x_pad, w[0], None, None,
                          activation="leaky_relu", tm=tm)
    h, mn, mx = gcn_layer(adj_bf16, h, w[1], mn, mx,
                          activation="leaky_relu", tm=tm)
    # decode
    h, mn, mx = gcn_layer(adj_bf16, h, w[2], mn, mx,
                          activation="leaky_relu", tm=tm)
    a_pred, _, _ = gcn_layer(adj_bf16, h, w[3], mn, mx,
                             activation="sigmoid", tm=tm)
    return a_pred[:, :num]


# ----------------------------------------------------------------------------
# Pure-JAX f32 reference (for a loose sanity check; kernels use bf16 MXU in)
# ----------------------------------------------------------------------------
def _ref_forward(params, adj, x):
    def layer(h, key, act):
        y = adj @ (h @ params[key])
        return jnp.where(y >= 0, y, 0.01 * y) if act == "leaky_relu" \
            else jax.nn.sigmoid(y)

    def norm(h):
        mn = jnp.min(h, axis=0, keepdims=True)
        mx = jnp.max(h, axis=0, keepdims=True)
        return (h - mn) / (mx - mn + EPS)

    h = norm(layer(x, "base_gcn", "leaky_relu"))
    z = norm(layer(h, "gcn_mean", "leaky_relu"))
    h1 = norm(layer(z, "gcn_out1", "leaky_relu"))
    return layer(h1, "gcn_out", "sigmoid")


# ----------------------------------------------------------------------------
# Demo
# ----------------------------------------------------------------------------
if __name__ == "__main__":
    N = 512                     # number of graph nodes (2 row tiles of 256)
    INPUT_DIM = 32
    HIDDEN1_DIM = 32
    HIDDEN2_DIM = 16
    EXTEND2_DIM = 16
    NUM = 16

    key = jax.random.PRNGKey(0)
    k_adj, k_x, k_par = jax.random.split(key, 3)

    # deterministic symmetric normalized adjacency: D^-1/2 (A + I) D^-1/2
    a = (jax.random.uniform(k_adj, (N, N)) > 0.9).astype(jnp.float32)
    a = jnp.maximum(a, a.T) + jnp.eye(N, dtype=jnp.float32)
    d_inv_sqrt = 1.0 / jnp.sqrt(jnp.sum(a, axis=1))
    adj = a * d_inv_sqrt[:, None] * d_inv_sqrt[None, :]

    x = jax.random.normal(k_x, (N, INPUT_DIM), dtype=jnp.float32)
    params = init_gae_params(k_par, INPUT_DIM, HIDDEN1_DIM, HIDDEN2_DIM,
                             EXTEND2_DIM, NUM)

    fwd = jax.jit(functools.partial(gae_forward, num=NUM))
    a_pred = fwd(params, adj, x)
    jax.block_until_ready(a_pred)

    a_ref = _ref_forward(params, adj, x)
    assert a_pred.shape == (N, NUM)
    assert bool(jnp.all(jnp.isfinite(a_pred)))
    assert bool(jnp.all((a_pred >= 0.0) & (a_pred <= 1.0)))   # sigmoid range
    err = float(jnp.max(jnp.abs(a_pred - a_ref)))
    assert err < 0.15, f"kernel/reference mismatch: max abs err = {err}"
    print("KERNEL_OK")
</pallas_src>

<mosaic_0001>
module attributes {stable_mosaic.version = 11 : i64} {
  func.func @_xw_plain_kernel(%arg0: i32, %arg1: memref<256x128xf32, #tpu.memory_space<vmem>>, %arg2: memref<128x128xbf16, #tpu.memory_space<vmem>>, %arg3: memref<256x128xbf16, #tpu.memory_space<vmem>>) attributes {dimension_semantics = [#tpu.dimension_semantics<parallel>], iteration_bounds = array<i64: 2>, scalar_prefetch = 0 : i64, scratch_operands = 0 : i64, tpu.core_type = #tpu.core_type<tc>, window_params = [{transform_indices = @transform_0, window_bounds = array<i64: 256, 128>}, {pipeline_mode = #tpu.pipeline_mode<synchronous>, transform_indices = @transform_1, window_bounds = array<i64: 128, 128>}, {transform_indices = @transform_2, window_bounds = array<i64: 256, 128>}]} {
    %c0 = arith.constant 0 : index
    %c0_0 = arith.constant 0 : index
    %0 = vector.load %arg1[%c0, %c0_0] : memref<256x128xf32, #tpu.memory_space<vmem>>, vector<256x128xf32>
    %1 = arith.truncf %0 : vector<256x128xf32> to vector<256x128xbf16>
    %c0_1 = arith.constant 0 : index
    %c0_2 = arith.constant 0 : index
    %2 = vector.load %arg2[%c0_1, %c0_2] : memref<128x128xbf16, #tpu.memory_space<vmem>>, vector<128x128xbf16>
    %cst = arith.constant dense<0.000000e+00> : vector<256x128xf32>
    %3 = tpu.matmul %1, %2, %cst {dimension_numbers = #tpu.dot_dimension_numbers<[1], [0], [0], [1], [0, 0, 1, 1], [], []>} : vector<256x128xbf16>, vector<128x128xbf16>, vector<256x128xf32> -> vector<256x128xf32>
    %4 = arith.truncf %3 : vector<256x128xf32> to vector<256x128xbf16>
    %c0_3 = arith.constant 0 : index
    %c0_4 = arith.constant 0 : index
    %5 = vector.load %arg3[%c0_3, %c0_4] : memref<256x128xbf16, #tpu.memory_space<vmem>>, vector<256x128xbf16>
    tpu.vector_store %arg3[%c0_3, %c0_4], %4 {strides = array<i32>} : memref<256x128xbf16, #tpu.memory_space<vmem>>, vector<256x128xbf16>,
    return
  }
  func.func @transform_0(%arg0: i32) -> (i32, i32) {
    %c0_i32 = arith.constant 0 : i32
    %c0_i32_0 = arith.constant 0 : i32
    return %arg0, %c0_i32 : i32, i32
  }
  func.func @transform_1(%arg0: i32) -> (i32, i32) {
    %c0_i32 = arith.constant 0 : i32
    %c0_i32_0 = arith.constant 0 : i32
    %c0_i32_1 = arith.constant 0 : i32
    return %c0_i32, %c0_i32_0 : i32, i32
  }
  func.func @transform_2(%arg0: i32) -> (i32, i32) {
    %c0_i32 = arith.constant 0 : i32
    %c0_i32_0 = arith.constant 0 : i32
    return %arg0, %c0_i32 : i32, i32
  }
}

module attributes {stable_mosaic.version = 11 : i64} {
  func.func @_prop_kernel(%arg0: i32, %arg1: memref<256x512xbf16, #tpu.memory_space<vmem>>, %arg2: memref<512x128xbf16, #tpu.memory_space<vmem>>, %arg3: memref<256x128xf32, #tpu.memory_space<vmem>>, %arg4: memref<8x128xf32, #tpu.memory_space<vmem>>, %arg5: memref<8x128xf32, #tpu.memory_space<vmem>>) attributes {dimension_semantics = [#tpu.dimension_semantics<parallel>], iteration_bounds = array<i64: 2>, scalar_prefetch = 0 : i64, scratch_operands = 0 : i64, tpu.core_type = #tpu.core_type<tc>, window_params = [{transform_indices = @transform_0, window_bounds = array<i64: 256, 512>}, {pipeline_mode = #tpu.pipeline_mode<synchronous>, transform_indices = @transform_1, window_bounds = array<i64: 512, 128>}, {transform_indices = @transform_2, window_bounds = array<i64: 256, 128>}, {transform_indices = @transform_3, window_bounds = array<i64: 8, 128>}, {transform_indices = @transform_4, window_bounds = array<i64: 8, 128>}]} {
    %c0 = arith.constant 0 : index
    %c0_0 = arith.constant 0 : index
    %0 = vector.load %arg1[%c0, %c0_0] : memref<256x512xbf16, #tpu.memory_space<vmem>>, vector<256x512xbf16>
    %c0_1 = arith.constant 0 : index
    %c0_2 = arith.constant 0 : index
    %1 = vector.load %arg2[%c0_1, %c0_2] : memref<512x128xbf16, #tpu.memory_space<vmem>>, vector<512x128xbf16>
    %cst = arith.constant dense<0.000000e+00> : vector<256x128xf32>
    %2 = tpu.matmul %0, %1, %cst {dimension_numbers = #tpu.dot_dimension_numbers<[1], [0], [0], [1], [0, 0, 1, 1], [], []>} : vector<256x512xbf16>, vector<512x128xbf16>, vector<256x128xf32> -> vector<256x128xf32>
    %cst_3 = arith.constant 0.000000e+00 : f32
    %3 = vector.broadcast %cst_3 : f32 to vector<256x128xf32>
    %4 = arith.cmpf oge, %2, %3 : vector<256x128xf32>
    %cst_4 = arith.constant 0.00999999977 : f32
    %5 = vector.broadcast %cst_4 : f32 to vector<256x128xf32>
    %6 = arith.mulf %5, %2 : vector<256x128xf32>
    %7 = arith.select %4, %2, %6 : vector<256x128xi1>, vector<256x128xf32>
    %c0_5 = arith.constant 0 : index
    %c0_6 = arith.constant 0 : index
    %8 = vector.load %arg3[%c0_5, %c0_6] : memref<256x128xf32, #tpu.memory_space<vmem>>, vector<256x128xf32>
    tpu.vector_store %arg3[%c0_5, %c0_6], %7 {strides = array<i32>} : memref<256x128xf32, #tpu.memory_space<vmem>>, vector<256x128xf32>,
    %cst_7 = arith.constant dense<0x7F800000> : vector<128xf32>
    %9 = vector.multi_reduction <minimumf>, %7, %cst_7 [0] : vector<256x128xf32> to vector<128xf32>
    %10 = vector.shape_cast %9 : vector<128xf32> to vector<1x128xf32>
    %11 = vector.shape_cast %10 : vector<1x128xf32> to vector<1x128xf32>
    %12 = vector.broadcast %11 : vector<1x128xf32> to vector<8x128xf32>
    %c0_8 = arith.constant 0 : index
    %c0_9 = arith.constant 0 : index
    %13 = vector.load %arg4[%c0_8, %c0_9] : memref<8x128xf32, #tpu.memory_space<vmem>>, vector<8x128xf32>
    tpu.vector_store %arg4[%c0_8, %c0_9], %12 {strides = array<i32>} : memref<8x128xf32, #tpu.memory_space<vmem>>, vector<8x128xf32>,
    %cst_10 = arith.constant dense<0xFF800000> : vector<128xf32>
    %14 = vector.multi_reduction <maximumf>, %7, %cst_10 [0] : vector<256x128xf32> to vector<128xf32>
    %15 = vector.shape_cast %14 : vector<128xf32> to vector<1x128xf32>
    %16 = vector.shape_cast %15 : vector<1x128xf32> to vector<1x128xf32>
    %17 = vector.broadcast %16 : vector<1x128xf32> to vector<8x128xf32>
    %c0_11 = arith.constant 0 : index
    %c0_12 = arith.constant 0 : index
    %18 = vector.load %arg5[%c0_11, %c0_12] : memref<8x128xf32, #tpu.memory_space<vmem>>, vector<8x128xf32>
    tpu.vector_store %arg5[%c0_11, %c0_12], %17 {strides = array<i32>} : memref<8x128xf32, #tpu.memory_space<vmem>>, vector<8x128xf32>,
    return
  }
  func.func @transform_0(%arg0: i32) -> (i32, i32) {
    %c0_i32 = arith.constant 0 : i32
    %c0_i32_0 = arith.constant 0 : i32
    return %arg0, %c0_i32 : i32, i32
  }
  func.func @transform_1(%arg0: i32) -> (i32, i32) {
    %c0_i32 = arith.constant 0 : i32
    %c0_i32_0 = arith.constant 0 : i32
    %c0_i32_1 = arith.constant 0 : i32
    return %c0_i32, %c0_i32_0 : i32, i32
  }
  func.func @transform_2(%arg0: i32) -> (i32, i32) {
    %c0_i32 = arith.constant 0 : i32
    %c0_i32_0 = arith.constant 0 : i32
    return %arg0, %c0_i32 : i32, i32
  }
  func.func @transform_3(%arg0: i32) -> (i32, i32) {
    %c0_i32 = arith.constant 0 : i32
    %c0_i32_0 = arith.constant 0 : i32
    return %arg0, %c0_i32 : i32, i32
  }
  func.func @transform_4(%arg0: i32) -> (i32, i32) {
    %c0_i32 = arith.constant 0 : i32
    %c0_i32_0 = arith.constant 0 : i32
    return %arg0, %c0_i32 : i32, i32
  }
}

module attributes {stable_mosaic.version = 11 : i64} {
  func.func @_xw_norm_kernel(%arg0: i32, %arg1: memref<256x128xf32, #tpu.memory_space<vmem>>, %arg2: memref<1x128xf32, #tpu.memory_space<vmem>>, %arg3: memref<1x128xf32, #tpu.memory_space<vmem>>, %arg4: memref<128x128xbf16, #tpu.memory_space<vmem>>, %arg5: memref<256x128xbf16, #tpu.memory_space<vmem>>) attributes {dimension_semantics = [#tpu.dimension_semantics<parallel>], iteration_bounds = array<i64: 2>, scalar_prefetch = 0 : i64, scratch_operands = 0 : i64, tpu.core_type = #tpu.core_type<tc>, window_params = [{transform_indices = @transform_0, window_bounds = array<i64: 256, 128>}, {pipeline_mode = #tpu.pipeline_mode<synchronous>, transform_indices = @transform_1, window_bounds = array<i64: 1, 128>}, {pipeline_mode = #tpu.pipeline_mode<synchronous>, transform_indices = @transform_2, window_bounds = array<i64: 1, 128>}, {pipeline_mode = #tpu.pipeline_mode<synchronous>, transform_indices = @transform_3, window_bounds = array<i64: 128, 128>}, {transform_indices = @transform_4, window_bounds = array<i64: 256, 128>}]} {
    %c0 = arith.constant 0 : index
    %c0_0 = arith.constant 0 : index
    %0 = vector.load %arg2[%c0, %c0_0] : memref<1x128xf32, #tpu.memory_space<vmem>>, vector<1x128xf32>
    %c0_1 = arith.constant 0 : index
    %c0_2 = arith.constant 0 : index
    %1 = vector.load %arg3[%c0_1, %c0_2] : memref<1x128xf32, #tpu.memory_space<vmem>>, vector<1x128xf32>
    %2 = arith.subf %1, %0 : vector<1x128xf32>
    %cst = arith.constant 9.99999996E-13 : f32
    %3 = vector.broadcast %cst : f32 to vector<1x128xf32>
    %4 = arith.addf %2, %3 : vector<1x128xf32>
    %5 = tpu.reciprocal %4 {approx = true} : vector<1x128xf32> -> vector<1x128xf32>
    %c0_3 = arith.constant 0 : index
    %c0_4 = arith.constant 0 : index
    %6 = vector.load %arg1[%c0_3, %c0_4] : memref<256x128xf32, #tpu.memory_space<vmem>>, vector<256x128xf32>
    %7 = vector.broadcast %0 : vector<1x128xf32> to vector<256x128xf32>
    %8 = arith.subf %6, %7 : vector<256x128xf32>
    %9 = vector.broadcast %5 : vector<1x128xf32> to vector<256x128xf32>
    %10 = arith.mulf %8, %9 : vector<256x128xf32>
    %11 = arith.truncf %10 : vector<256x128xf32> to vector<256x128xbf16>
    %c0_5 = arith.constant 0 : index
    %c0_6 = arith.constant 0 : index
    %12 = vector.load %arg4[%c0_5, %c0_6] : memref<128x128xbf16, #tpu.memory_space<vmem>>, vector<128x128xbf16>
    %cst_7 = arith.constant dense<0.000000e+00> : vector<256x128xf32>
    %13 = tpu.matmul %11, %12, %cst_7 {dimension_numbers = #tpu.dot_dimension_numbers<[1], [0], [0], [1], [0, 0, 1, 1], [], []>} : vector<256x128xbf16>, vector<128x128xbf16>, vector<256x128xf32> -> vector<256x128xf32>
    %14 = arith.truncf %13 : vector<256x128xf32> to vector<256x128xbf16>
    %c0_8 = arith.constant 0 : index
    %c0_9 = arith.constant 0 : index
    %15 = vector.load %arg5[%c0_8, %c0_9] : memref<256x128xbf16, #tpu.memory_space<vmem>>, vector<256x128xbf16>
    tpu.vector_store %arg5[%c0_8, %c0_9], %14 {strides = array<i32>} : memref<256x128xbf16, #tpu.memory_space<vmem>>, vector<256x128xbf16>,
    return
  }
  func.func @transform_0(%arg0: i32) -> (i32, i32) {
    %c0_i32 = arith.constant 0 : i32
    %c0_i32_0 = arith.constant 0 : i32
    return %arg0, %c0_i32 : i32, i32
  }
  func.func @transform_1(%arg0: i32) -> (i32, i32) {
    %c0_i32 = arith.constant 0 : i32
    %c0_i32_0 = arith.constant 0 : i32
    %c0_i32_1 = arith.constant 0 : i32
    return %c0_i32, %c0_i32_0 : i32, i32
  }
  func.func @transform_2(%arg0: i32) -> (i32, i32) {
    %c0_i32 = arith.constant 0 : i32
    %c0_i32_0 = arith.constant 0 : i32
    %c0_i32_1 = arith.constant 0 : i32
    return %c0_i32, %c0_i32_0 : i32, i32
  }
  func.func @transform_3(%arg0: i32) -> (i32, i32) {
    %c0_i32 = arith.constant 0 : i32
    %c0_i32_0 = arith.constant 0 : i32
    %c0_i32_1 = arith.constant 0 : i32
    return %c0_i32, %c0_i32_0 : i32, i32
  }
  func.func @transform_4(%arg0: i32) -> (i32, i32) {
    %c0_i32 = arith.constant 0 : i32
    %c0_i32_0 = arith.constant 0 : i32
    return %arg0, %c0_i32 : i32, i32
  }
}

module attributes {stable_mosaic.version = 11 : i64} {
  func.func @_prop_kernel(%arg0: i32, %arg1: memref<256x512xbf16, #tpu.memory_space<vmem>>, %arg2: memref<512x128xbf16, #tpu.memory_space<vmem>>, %arg3: memref<256x128xf32, #tpu.memory_space<vmem>>, %arg4: memref<8x128xf32, #tpu.memory_space<vmem>>, %arg5: memref<8x128xf32, #tpu.memory_space<vmem>>) attributes {dimension_semantics = [#tpu.dimension_semantics<parallel>], iteration_bounds = array<i64: 2>, scalar_prefetch = 0 : i64, scratch_operands = 0 : i64, tpu.core_type = #tpu.core_type<tc>, window_params = [{transform_indices = @transform_0, window_bounds = array<i64: 256, 512>}, {pipeline_mode = #tpu.pipeline_mode<synchronous>, transform_indices = @transform_1, window_bounds = array<i64: 512, 128>}, {transform_indices = @transform_2, window_bounds = array<i64: 256, 128>}, {transform_indices = @transform_3, window_bounds = array<i64: 8, 128>}, {transform_indices = @transform_4, window_bounds = array<i64: 8, 128>}]} {
    %c0 = arith.constant 0 : index
    %c0_0 = arith.constant 0 : index
    %0 = vector.load %arg1[%c0, %c0_0] : memref<256x512xbf16, #tpu.memory_space<vmem>>, vector<256x512xbf16>
    %c0_1 = arith.constant 0 : index
    %c0_2 = arith.constant 0 : index
    %1 = vector.load %arg2[%c0_1, %c0_2] : memref<512x128xbf16, #tpu.memory_space<vmem>>, vector<512x128xbf16>
    %cst = arith.constant dense<0.000000e+00> : vector<256x128xf32>
    %2 = tpu.matmul %0, %1, %cst {dimension_numbers = #tpu.dot_dimension_numbers<[1], [0], [0], [1], [0, 0, 1, 1], [], []>} : vector<256x512xbf16>, vector<512x128xbf16>, vector<256x128xf32> -> vector<256x128xf32>
    %3 = arith.negf %2 : vector<256x128xf32>
    %4 = math.exp %3 : vector<256x128xf32>
    %cst_3 = arith.constant 1.000000e+00 : f32
    %5 = vector.broadcast %cst_3 : f32 to vector<256x128xf32>
    %6 = arith.addf %5, %4 : vector<256x128xf32>
    %7 = arith.divf %5, %6 : vector<256x128xf32>
    %c0_4 = arith.constant 0 : index
    %c0_5 = arith.constant 0 : index
    %8 = vector.load %arg3[%c0_4, %c0_5] : memref<256x128xf32, #tpu.memory_space<vmem>>, vector<256x128xf32>
    tpu.vector_store %arg3[%c0_4, %c0_5], %7 {strides = array<i32>} : memref<256x128xf32, #tpu.memory_space<vmem>>, vector<256x128xf32>,
    %cst_6 = arith.constant dense<0x7F800000> : vector<128xf32>
    %9 = vector.multi_reduction <minimumf>, %7, %cst_6 [0] : vector<256x128xf32> to vector<128xf32>
    %10 = vector.shape_cast %9 : vector<128xf32> to vector<1x128xf32>
    %11 = vector.shape_cast %10 : vector<1x128xf32> to vector<1x128xf32>
    %12 = vector.broadcast %11 : vector<1x128xf32> to vector<8x128xf32>
    %c0_7 = arith.constant 0 : index
    %c0_8 = arith.constant 0 : index
    %13 = vector.load %arg4[%c0_7, %c0_8] : memref<8x128xf32, #tpu.memory_space<vmem>>, vector<8x128xf32>
    tpu.vector_store %arg4[%c0_7, %c0_8], %12 {strides = array<i32>} : memref<8x128xf32, #tpu.memory_space<vmem>>, vector<8x128xf32>,
    %cst_9 = arith.constant dense<0xFF800000> : vector<128xf32>
    %14 = vector.multi_reduction <maximumf>, %7, %cst_9 [0] : vector<256x128xf32> to vector<128xf32>
    %15 = vector.shape_cast %14 : vector<128xf32> to vector<1x128xf32>
    %16 = vector.shape_cast %15 : vector<1x128xf32> to vector<1x128xf32>
    %17 = vector.broadcast %16 : vector<1x128xf32> to vector<8x128xf32>
    %c0_10 = arith.constant 0 : index
    %c0_11 = arith.constant 0 : index
    %18 = vector.load %arg5[%c0_10, %c0_11] : memref<8x128xf32, #tpu.memory_space<vmem>>, vector<8x128xf32>
    tpu.vector_store %arg5[%c0_10, %c0_11], %17 {strides = array<i32>} : memref<8x128xf32, #tpu.memory_space<vmem>>, vector<8x128xf32>,
    return
  }
  func.func @transform_0(%arg0: i32) -> (i32, i32) {
    %c0_i32 = arith.constant 0 : i32
    %c0_i32_0 = arith.constant 0 : i32
    return %arg0, %c0_i32 : i32, i32
  }
  func.func @transform_1(%arg0: i32) -> (i32, i32) {
    %c0_i32 = arith.constant 0 : i32
    %c0_i32_0 = arith.constant 0 : i32
    %c0_i32_1 = arith.constant 0 : i32
    return %c0_i32, %c0_i32_0 : i32, i32
  }
  func.func @transform_2(%arg0: i32) -> (i32, i32) {
    %c0_i32 = arith.constant 0 : i32
    %c0_i32_0 = arith.constant 0 : i32
    return %arg0, %c0_i32 : i32, i32
  }
  func.func @transform_3(%arg0: i32) -> (i32, i32) {
    %c0_i32 = arith.constant 0 : i32
    %c0_i32_0 = arith.constant 0 : i32
    return %arg0, %c0_i32 : i32, i32
  }
  func.func @transform_4(%arg0: i32) -> (i32, i32) {
    %c0_i32 = arith.constant 0 : i32
    %c0_i32_0 = arith.constant 0 : i32
    return %arg0, %c0_i32 : i32, i32
  }
}

</mosaic_0001>

<bundles_post_ra>
// kernel: gae_forward.10
= control target key start
LH: loop header
LB: loop body
LE: loop exit
PB: predicated region body
PF: predicated region fallthrough
CT: control target
= control target key end

     0   :  { %s1089_s15 = smov 0   ;;  %s1260_s0 = inlined_call_operand.vmem [shape: f32[512,128], index: 0, kind: input, shape index: {}]   ;;  %s1261_s1 = inlined_call_operand.vmem [shape: f32[1,128], index: 1, kind: input, shape index: {}]   ;;  %s1262_s2 = inlined_call_operand.vmem [shape: f32[1,128], index: 2, kind: input, shape index: {}]   ;;  %s1263_s3 = inlined_call_operand.vmem [shape: bf16[128,128], index: 3, kind: input, shape index: {}]   ;;  %s1264_s4 = inlined_call_operand.vmem [shape: bf16[512,128], index: 4, kind: output, shape index: {}]  }
   0x1 LB: > { %s772_s16 = sadd.s32 4294967295, %s1062_s15   ;;  %p776_p0 = scmp.ge.s32.totalorder %s1062_s15, 1  ;;  %s1062_s15 = sphi %s1089_s15, %s14_s15  }
   0x2   : > { %p163_p1 = scmp.lt.s32.totalorder %s1062_s15, 3 }
   0x4   : > { %p164_p2 = pnand %p776_p0, %p163_p1 }
   0x5   : > { %v1046_v0 = vld [vmem:[%s1263_s3] sm:$0xff] (!%p164_p2)   ;;  %s777_s19 = sshll.u32 (!%p164_p2), %s772_s16, 5  ;;  %v1047_v1 = vld [vmem:[%s1263_s3 + $0x8] sm:$0xff] (!%p164_p2)   ;;  %v1048_v2 = vld [vmem:[%s1263_s3 + $0x10] sm:$0xff] (!%p164_p2)   ;;  %v240_v3 = vlaneseq (!%p164_p2) }
   0x6   : > { %167 = sbr.rel (%p164_p2) target bundleno = 280 (0x118), region = 36  ;;  %974 = vmatprep.subr.bf16.mxu0 (!%p164_p2), %v1046_v0  ;;  %1022 = vmatprep.subr.bf16.mxu1 (!%p164_p2), %v1046_v0  ;;  %p190_p3 = scmp.lt.s32.totalorder (!%p164_p2), %s777_s19, 63  ;;  %v1049_v4 = vld [vmem:[%s1263_s3 + $0x18] sm:$0xff] (!%p164_p2)   ;;  %v202_v5 = vld [vmem:[%s1261_s1] sm:$0x1] (!%p164_p2)  ;;  %v1051_v12 = vld [vmem:[%s1263_s3 + $0x28] sm:$0xff] (!%p164_p2)  }
   0x7   : > { %975 = vmatpush3.bf16.msra.mxu0 (!%p164_p2), %v1046_v0  ;;  %1030 = vmatpush3.bf16.msra.mxu1 (!%p164_p2), %v1046_v0  ;;  %v203_v6 = vld [vmem:[%s1262_s2] sm:$0x1] (!%p164_p2)  ;;  %v241_v8 = vshrl.u32 (!%p164_p2), %v240_v3, 7  ;;  %v1052_v16 = vld [vmem:[%s1263_s3 + $0x30] sm:$0xff] (!%p164_p2)   ;;  %v1053_v44 = vld [vmem:[%s1263_s3 + $0x38] sm:$0xff] (!%p164_p2)  }
   0x8   : > { %976 = vmatprep.subr.bf16.mxu0 (!%p164_p2), %v1047_v1  ;;  %1023 = vmatprep.subr.bf16.mxu1 (!%p164_p2), %v1047_v1  ;;  %v204_v7 = vsub.f32 (!%p164_p2), %v203_v6, %v202_v5  ;;  %v1050_v10 = vld [vmem:[%s1263_s3 + $0x20] sm:$0xff] (!%p164_p2)  }
   0x9   : > { %v242_v11 = vsub.s32 (!%p164_p2), 0, %v241_v8 }
   0xa   : > { %v205_v9 = vadd.f32 (!%p164_p2), 1e-12, %v204_v7 }
   0xb   : > { %977 = vmatpush3.bf16.msra.mxu0 (!%p164_p2), %v1047_v1  ;;  %1031 = vmatpush3.bf16.msra.mxu1 (!%p164_p2), %v1047_v1  ;;  %v1131_v15 = vrot.slane (!%p164_p2), %v202_v5, %v242_v11 }
   0xc   : > { %978 = vmatprep.subr.bf16.mxu0 (!%p164_p2), %v1048_v2  ;;  %1024 = vmatprep.subr.bf16.mxu1 (!%p164_p2), %v1048_v2  ;;  %1054 = vrcp.f32 (!%p164_p2), %v205_v9 }
   0xd   : > { %s1266_s19 = smov (!%p190_p3, %s777_s19), 63 }
   0xe   : > { %s778_s30 = sshll.u32 %s1266_s19, 3  ;;  %s780_s17 = sshll.u32 %s1266_s19, 2 }
   0xf   : > { %979 = vmatpush3.bf16.msra.mxu0 %v1048_v2  ;;  %1032 = vmatpush3.bf16.msra.mxu1 %v1048_v2  ;;  %s1124_s9 = scalar_lea.vmem %s1260_s0, %s778_s30  ;;  %s1239_s21 = scalar_lea.vmem %s1264_s4, %s780_s17 }
  0x10   : > { %980 = vmatprep.subr.bf16.mxu0 %v1049_v4  ;;  %1025 = vmatprep.subr.bf16.mxu1 %v1049_v4  ;;  %v207_v13 = vld [vmem:[%s1124_s9] sm:$0xff]  ;;  %v208_v14 = vld [vmem:[%s1124_s9 + $0x8] sm:$0xff]  ;;  %v209_v19 = vld [vmem:[%s1124_s9 + $0x10] sm:$0xff] }
  0x11   : > { %v223_v17 = vld [vmem:[%s1124_s9 + $0x80] sm:$0xff]  ;;  %v224_v18 = vld [vmem:[%s1124_s9 + $0x88] sm:$0xff]  ;;  %v210_v20 = vld [vmem:[%s1124_s9 + $0x18] sm:$0xff]  ;;  %v245_v26 = vsub.f32 %v207_v13, %v1131_v15  ;;  %v246_v27 = vsub.f32 %v208_v14, %v1131_v15  ;;  %v247_v33 = vsub.f32 %v209_v19, %v1131_v15 }
  0x12   : > { %v225_v21 = vld [vmem:[%s1124_s9 + $0x90] sm:$0xff]  ;;  %v226_v22 = vld [vmem:[%s1124_s9 + $0x98] sm:$0xff]  ;;  %v211_v23 = vld [vmem:[%s1124_s9 + $0x20] sm:$0xff]  ;;  %v261_v28 = vsub.f32 %v223_v17, %v1131_v15  ;;  %v262_v29 = vsub.f32 %v224_v18, %v1131_v15  ;;  %v248_v34 = vsub.f32 %v210_v20, %v1131_v15 }
  0x13   : > { %981 = vmatpush3.bf16.msra.mxu0 %v1049_v4  ;;  %1033 = vmatpush3.bf16.msra.mxu1 %v1049_v4  ;;  %v212_v24 = vld [vmem:[%s1124_s9 + $0x28] sm:$0xff]  ;;  %v227_v25 = vld [vmem:[%s1124_s9 + $0xa0] sm:$0xff]  ;;  %v213_v31 = vld [vmem:[%s1124_s9 + $0x30] sm:$0xff]  ;;  %v263_v35 = vsub.f32 %v225_v21, %v1131_v15  ;;  %v264_v36 = vsub.f32 %v226_v22, %v1131_v15  ;;  %v249_v41 = vsub.f32 %v211_v23, %v1131_v15 }
  0x14   : > { %982 = vmatprep.subr.bf16.mxu0 %v1050_v10  ;;  %1026 = vmatprep.subr.bf16.mxu1 %v1050_v10  ;;  %v228_v30 = vld [vmem:[%s1124_s9 + $0xa8] sm:$0xff]  ;;  %v214_v32 = vld [vmem:[%s1124_s9 + $0x38] sm:$0xff]  ;;  %v229_v37 = vld [vmem:[%s1124_s9 + $0xb0] sm:$0xff]  ;;  %v250_v42 = vsub.f32 %v212_v24, %v1131_v15  ;;  %v265_v43 = vsub.f32 %v227_v25, %v1131_v15  ;;  %v251_v47 = vsub.f32 %v213_v31, %v1131_v15 }
  0x15   : > { %v230_v38 = vld [vmem:[%s1124_s9 + $0xb8] sm:$0xff]  ;;  %v215_v39 = vld [vmem:[%s1124_s9 + $0x40] sm:$0xff]  ;;  %v266_v46 = vsub.f32 %v228_v30, %v1131_v15  ;;  %v252_v48 = vsub.f32 %v214_v32, %v1131_v15  ;;  %v267_v49 = vsub.f32 %v229_v37, %v1131_v15  ;;  %v216_v56 = vld [vmem:[%s1124_s9 + $0x48] sm:$0xff] }
  0x16   : > { %v1055_v40 = vpop.eup %1054  ;;  %v268_v50 = vsub.f32 %v230_v38, %v1131_v15  ;;  %v253_v51 = vsub.f32 %v215_v39, %v1131_v15  ;;  %v231_v63 = vld [vmem:[%s1124_s9 + $0xc0] sm:$0xff]  ;;  %v232_v0 = vld [vmem:[%s1124_s9 + $0xc8] sm:$0xff]  ;;  %v254_v4 = vsub.f32 %v216_v56, %v1131_v15  ;;  %v217_v14 = vld [vmem:[%s1124_s9 + $0x50] sm:$0xff] }
  0x17   : > { %983 = vmatpush3.bf16.msra.mxu0 %v1050_v10  ;;  %1034 = vmatpush3.bf16.msra.mxu1 %v1050_v10  ;;  %v1165_v45 = vrot.slane %v1055_v40, %v242_v11  ;;  %v269_v9 = vsub.f32 %v231_v63, %v1131_v15  ;;  %v270_v10 = vsub.f32 %v232_v0, %v1131_v15  ;;  %v218_v19 = vld [vmem:[%s1124_s9 + $0x58] sm:$0xff]  ;;  %v233_v20 = vld [vmem:[%s1124_s9 + $0xd0] sm:$0xff]  ;;  %v219_v25 = vld [vmem:[%s1124_s9 + $0x60] sm:$0xff] }
  0x18   : > { %984 = vmatprep.subr.bf16.mxu0 %v1051_v12  ;;  %1027 = vmatprep.subr.bf16.mxu1 %v1051_v12  ;;  %v234_v21 = vld [vmem:[%s1124_s9 + $0xd8] sm:$0xff]  ;;  %v256_v30 = vsub.f32 %v218_v19, %v1131_v15  ;;  %v271_v31 = vsub.f32 %v233_v20, %v1131_v15 }
  0x19   : > { %v283_v52 = vmul.f32 %v1165_v45, %v245_v26  ;;  %v284_v53 = vmul.f32 %v1165_v45, %v246_v27  ;;  %v299_v54 = vmul.f32 %v1165_v45, %v261_v28  ;;  %v300_v55 = vmul.f32 %v1165_v45, %v262_v29  ;;  %v220_v26 = vld [vmem:[%s1124_s9 + $0x68] sm:$0xff]  ;;  %v235_v27 = vld [vmem:[%s1124_s9 + $0xe0] sm:$0xff] }
  0x1a   : > { %v285_v57 = vmul.f32 %v1165_v45, %v247_v33  ;;  %v286_v58 = vmul.f32 %v1165_v45, %v248_v34  ;;  %v301_v59 = vmul.f32 %v1165_v45, %v263_v35  ;;  %v302_v62 = vmul.f32 %v1165_v45, %v264_v36  ;;  %v236_v28 = vld [vmem:[%s1124_s9 + $0xe8] sm:$0xff] }
  0x1b   : > { %985 = vmatpush3.bf16.msra.mxu0 %v1051_v12  ;;  %1035 = vmatpush3.bf16.msra.mxu1 %v1051_v12  ;;  %v315_v60 = vpack.c.bf16 %v284_v53, %v283_v52  ;;  %v323_v61 = vpack.c.bf16 %v300_v55, %v299_v54  ;;  %v287_v1 = vmul.f32 %v1165_v45, %v249_v41  ;;  %v237_v52 = vld [vmem:[%s1124_s9 + $0xf0] sm:$0xff]  ;;  %v238_v53 = vld [vmem:[%s1124_s9 + $0xf8] sm:$0xff] }
  0x1c   : > { %986 = vmatprep.subr.bf16.mxu0 %v1052_v16  ;;  %1028 = vmatprep.subr.bf16.mxu1 %v1052_v16  ;;  %v288_v2 = vmul.f32 %v1165_v45, %v250_v42  ;;  %v303_v3 = vmul.f32 %v1165_v45, %v265_v43  ;;  %v316_v5 = vpack.c.bf16 %v286_v58, %v285_v57 }
  0x1d   : > { %990 = vmatprep.mubr.bf16.mxu0 %v315_v60  ;;  %1006 = vmatprep.mubr.bf16.mxu1 %v323_v61  ;;  %v324_v6 = vpack.c.bf16 %v302_v62, %v301_v59  ;;  %v304_v7 = vmul.f32 %v1165_v45, %v266_v46  ;;  %v289_v12 = vmul.f32 %v1165_v45, %v251_v47  ;;  %v221_v47 = vld [vmem:[%s1124_s9 + $0x70] sm:$0xff] }
  0x1e   : > { %v317_v8 = vpack.c.bf16 %v288_v2, %v287_v1  ;;  %v290_v13 = vmul.f32 %v1165_v45, %v252_v48  ;;  %v306_v17 = vmul.f32 %v1165_v45, %v268_v50  ;;  %v291_v18 = vmul.f32 %v1165_v45, %v253_v51  ;;  %v222_v48 = vld [vmem:[%s1124_s9 + $0x78] sm:$0xff] }
  0x1f   : > { %987 = vmatpush3.bf16.msra.mxu0 %v1052_v16  ;;  %1036 = vmatpush3.bf16.msra.mxu1 %v1052_v16  ;;  %v325_v11 = vpack.c.bf16 %v304_v7, %v303_v3  ;;  %v305_v16 = vmul.f32 %v1165_v45, %v267_v49  ;;  %v292_v22 = vmul.f32 %v1165_v45, %v254_v4 }
  0x20   : > { %988 = vmatprep.subr.bf16.mxu0 %v1053_v44  ;;  %1029 = vmatprep.subr.bf16.mxu1 %v1053_v44  ;;  %v307_v23 = vmul.f32 %v1165_v45, %v269_v9  ;;  %v308_v24 = vmul.f32 %v1165_v45, %v270_v10  ;;  %v255_v29 = vsub.f32 %v217_v14, %v1131_v15 }
  0x21   : > { %v272_v32 = vsub.f32 %v234_v21, %v1131_v15  ;;  %v318_v33 = vpack.c.bf16 %v290_v13, %v289_v12  ;;  %v326_v34 = vpack.c.bf16 %v306_v17, %v305_v16  ;;  %v257_v35 = vsub.f32 %v219_v25, %v1131_v15 }
  0x22   : > { %v258_v36 = vsub.f32 %v220_v26, %v1131_v15  ;;  %v319_v37 = vpack.c.bf16 %v292_v22, %v291_v18  ;;  %v327_v38 = vpack.c.bf16 %v308_v24, %v307_v23  ;;  %v273_v39 = vsub.f32 %v235_v27, %v1131_v15 }
  0x23   : > { %989 = vmatpush3.bf16.msra.mxu0 %v1053_v44  ;;  %1037 = vmatpush3.bf16.msra.mxu1 %v1053_v44  ;;  %v274_v40 = vsub.f32 %v236_v28, %v1131_v15  ;;  %v293_v41 = vmul.f32 %v1165_v45, %v255_v29  ;;  %v294_v42 = vmul.f32 %v1165_v45, %v256_v30 }
  0x24   : > { %v309_v43 = vmul.f32 %v1165_v45, %v271_v31  ;;  %v310_v44 = vmul.f32 %v1165_v45, %v272_v32  ;;  %v295_v46 = vmul.f32 %v1165_v45, %v257_v35  ;;  %v296_v49 = vmul.f32 %v1165_v45, %v258_v36 }
  0x25   : > { %v311_v50 = vmul.f32 %v1165_v45, %v273_v39  ;;  %v312_v51 = vmul.f32 %v1165_v45, %v274_v40  ;;  %v259_v54 = vsub.f32 %v221_v47, %v1131_v15  ;;  %v260_v55 = vsub.f32 %v222_v48, %v1131_v15 }
  0x26   : > { %991 = vmatmul.mubr.bf16.vlgmr.msra.gmra.mrb[0].mxu0 %v316_v5  ;;  %1007 = vmatmul.mubr.bf16.vlgmr.msra.gmra.mrb[0].mxu1 %v324_v6  ;;  %v320_v56 = vpack.c.bf16 %v294_v42, %v293_v41  ;;  %v328_v57 = vpack.c.bf16 %v310_v44, %v309_v43  ;;  %v275_v58 = vsub.f32 %v237_v52, %v1131_v15 }
  0x27   : > { %994 = vmatprep.mubr.bf16.mxu0 %v317_v8  ;;  %1010 = vmatprep.mubr.bf16.mxu1 %v325_v11  ;;  %v276_v59 = vsub.f32 %v238_v53, %v1131_v15  ;;  %v321_v60 = vpack.c.bf16 %v296_v49, %v295_v46  ;;  %v329_v61 = vpack.c.bf16 %v312_v51, %v311_v50 }
  0x28   : > { %v297_v62 = vmul.f32 %v1165_v45, %v259_v54  ;;  %v298_v63 = vmul.f32 %v1165_v45, %v260_v55  ;;  %v313_v0 = vmul.f32 %v1165_v45, %v275_v58 }
  0x29   : > { %v314_v1 = vmul.f32 %v1165_v45, %v276_v59 }
  0x2a   : > { %v322_v2 = vpack.c.bf16 %v298_v63, %v297_v62 }
  0x2b   : > { %v330_v3 = vpack.c.bf16 %v314_v1, %v313_v0 }
  0x2e   : > { %995 = vmatmul.mubr.bf16.gmra.mrb[4].mxu0 %v318_v33  ;;  %1011 = vmatmul.mubr.bf16.gmra.mrb[4].mxu1 %v326_v34 }
  0x2f   : > { %998 = vmatprep.mubr.bf16.mxu0 %v319_v37  ;;  %1014 = vmatprep.mubr.bf16.mxu1 %v327_v38 }
  0x36   : > { %999 = vmatmul.mubr.bf16.gmra.mrb[8].mxu0 %v320_v56  ;;  %1015 = vmatmul.mubr.bf16.gmra.mrb[8].mxu1 %v328_v57 }
  0x37   : > { %1002 = vmatprep.mubr.bf16.mxu0 %v321_v60  ;;  %1018 = vmatprep.mubr.bf16.mxu1 %v329_v61 }
  0x3e   : > { %1003 = vmatmul.mubr.bf16.gmra.mrb[12].mxu0 %v322_v2  ;;  %1019 = vmatmul.mubr.bf16.gmra.mrb[12].mxu1 %v330_v3 }
  0xf9   : > { %v992_v15 = vpop.f32.mrb[0].mxu0  ;;  %v1008_v4 = vpop.f32.mrb[0].mxu1 }
  0xfa   : > { %v429_v5 = vpop.f32.mrb[1].mxu0  ;;  %v493_v6 = vpop.f32.mrb[1].mxu1 }
  0xfb   : > { %v993_v45 = vpop.f32.mrb[2].mxu0  ;;  %v1009_v7 = vpop.f32.mrb[2].mxu1 }
  0xfc   : > { %v863_v8 = vpack.c.bf16 %v993_v45, %v992_v15  ;;  %v903_v9 = vpack.c.bf16 %v1009_v7, %v1008_v4  ;;  %v432_v10 = vpop.f32.mrb[3].mxu0  ;;  %v496_v11 = vpop.f32.mrb[3].mxu1 }
  0xfd   : > { %v858_v12 = vpack.c.bf16 %v432_v10, %v429_v5  ;;  %v898_v13 = vpack.c.bf16 %v496_v11, %v493_v6 }
  0xfe   : > { %935 = vst [vmem:[%s1239_s21 + $0x8] sm:$0xff] %v863_v8   ;;  %943 = vst [vmem:[%s1239_s21 + $0x48] sm:$0xff] %v903_v9  }
  0xff   : > { %859 = vst [vmem:[%s1239_s21] sm:$0xff] %v858_v12   ;;  %942 = vst [vmem:[%s1239_s21 + $0x40] sm:$0xff] %v898_v13  }
 0x101   : > { %v996_v14 = vpop.f32.mrb[4].mxu0  ;;  %v1012_v16 = vpop.f32.mrb[4].mxu1 }
 0x102   : > { %v445_v17 = vpop.f32.mrb[5].mxu0  ;;  %v509_v18 = vpop.f32.mrb[5].mxu1 }
 0x103   : > { %v997_v19 = vpop.f32.mrb[6].mxu0  ;;  %v1013_v20 = vpop.f32.mrb[6].mxu1 }
 0x104   : > { %v873_v21 = vpack.c.bf16 %v997_v19, %v996_v14  ;;  %v913_v22 = vpack.c.bf16 %v1013_v20, %v1012_v16  ;;  %v448_v23 = vpop.f32.mrb[7].mxu0  ;;  %v512_v24 = vpop.f32.mrb[7].mxu1 }
 0x105   : > { %v868_v25 = vpack.c.bf16 %v448_v23, %v445_v17  ;;  %v908_v26 = vpack.c.bf16 %v512_v24, %v509_v18 }
 0x106   : > { %937 = vst [vmem:[%s1239_s21 + $0x18] sm:$0xff] %v873_v21   ;;  %945 = vst [vmem:[%s1239_s21 + $0x58] sm:$0xff] %v913_v22  }
 0x107   : > { %936 = vst [vmem:[%s1239_s21 + $0x10] sm:$0xff] %v868_v25   ;;  %944 = vst [vmem:[%s1239_s21 + $0x50] sm:$0xff] %v908_v26  }
 0x109   : > { %v1000_v27 = vpop.f32.mrb[8].mxu0  ;;  %v1016_v28 = vpop.f32.mrb[8].mxu1 }
 0x10a   : > { %v461_v29 = vpop.f32.mrb[9].mxu0  ;;  %v525_v30 = vpop.f32.mrb[9].mxu1 }
 0x10b   : > { %v1001_v31 = vpop.f32.mrb[10].mxu0  ;;  %v1017_v32 = vpop.f32.mrb[10].mxu1 }
 0x10c   : > { %v883_v33 = vpack.c.bf16 %v1001_v31, %v1000_v27  ;;  %v923_v34 = vpack.c.bf16 %v1017_v32, %v1016_v28  ;;  %v464_v35 = vpop.f32.mrb[11].mxu0  ;;  %v528_v36 = vpop.f32.mrb[11].mxu1 }
 0x10d   : > { %v878_v37 = vpack.c.bf16 %v464_v35, %v461_v29  ;;  %v918_v38 = vpack.c.bf16 %v528_v36, %v525_v30 }
 0x10e   : > { %939 = vst [vmem:[%s1239_s21 + $0x28] sm:$0xff] %v883_v33   ;;  %947 = vst [vmem:[%s1239_s21 + $0x68] sm:$0xff] %v923_v34  }
 0x10f   : > { %938 = vst [vmem:[%s1239_s21 + $0x20] sm:$0xff] %v878_v37   ;;  %946 = vst [vmem:[%s1239_s21 + $0x60] sm:$0xff] %v918_v38  }
 0x111   : > { %v1004_v39 = vpop.f32.mrb[12].mxu0  ;;  %v1020_v40 = vpop.f32.mrb[12].mxu1 }
 0x112   : > { %v477_v41 = vpop.f32.mrb[13].mxu0  ;;  %v541_v42 = vpop.f32.mrb[13].mxu1 }
 0x113   : > { %v1005_v43 = vpop.f32.mrb[14].mxu0  ;;  %v1021_v44 = vpop.f32.mrb[14].mxu1 }
 0x114   : > { %v893_v46 = vpack.c.bf16 %v1005_v43, %v1004_v39  ;;  %v933_v47 = vpack.c.bf16 %v1021_v44, %v1020_v40  ;;  %v480_v48 = vpop.f32.mrb[15].mxu0  ;;  %v544_v49 = vpop.f32.mrb[15].mxu1 }
 0x115   : > { %v888_v50 = vpack.c.bf16 %v480_v48, %v477_v41  ;;  %v928_v51 = vpack.c.bf16 %v544_v49, %v541_v42 }
 0x116   : > { %941 = vst [vmem:[%s1239_s21 + $0x38] sm:$0xff] %v893_v46   ;;  %949 = vst [vmem:[%s1239_s21 + $0x78] sm:$0xff] %v933_v47  }
 0x117   : > { %940 = vst [vmem:[%s1239_s21 + $0x30] sm:$0xff] %v888_v50   ;;  %948 = vst [vmem:[%s1239_s21 + $0x70] sm:$0xff] %v928_v51  }
 0x118 PF: > { %s14_s15 = sadd.s32 1, %s1062_s15  }
 0x119   : > { %p11_p4 = scmp.ge.s32.totalorder %s14_s15, 4  }
 0x11b   :  { %13 = sbr.rel (!%p11_p4) target bundleno = 1 (0x1), region = 66 }

// kernel: gae_forward.8
= control target key start
LH: loop header
LB: loop body
LE: loop exit
PB: predicated region body
PF: predicated region fallthrough
CT: control target
= control target key end

     0   :  { %s942_s9 = smov 0   ;;  %s1039_s0 = inlined_call_operand.vmem [shape: f32[512,128], index: 0, kind: input, shape index: {}]   ;;  %s1040_s1 = inlined_call_operand.vmem [shape: bf16[128,128], index: 1, kind: input, shape index: {}]   ;;  %s1041_s2 = inlined_call_operand.vmem [shape: bf16[512,128], index: 2, kind: output, shape index: {}]  }
   0x1 LB: > { %s637_s10 = sadd.s32 4294967295, %s925_s9   ;;  %p641_p0 = scmp.ge.s32.totalorder %s925_s9, 1  ;;  %s925_s9 = sphi %s942_s9, %s12_s9  }
   0x2   : > { %p113_p1 = scmp.lt.s32.totalorder %s925_s9, 3 }
   0x4   : > { %p114_p2 = pnand %p641_p0, %p113_p1 }
   0x5   : > { %v911_v0 = vld [vmem:[%s1040_s1] sm:$0xff] (!%p114_p2)   ;;  %s642_s13 = sshll.u32 (!%p114_p2), %s637_s10, 5  ;;  %v912_v1 = vld [vmem:[%s1040_s1 + $0x8] sm:$0xff] (!%p114_p2)   ;;  %v913_v2 = vld [vmem:[%s1040_s1 + $0x10] sm:$0xff] (!%p114_p2)  }
   0x6   : > { %117 = sbr.rel (%p114_p2) target bundleno = 281 (0x119), region = 28  ;;  %p136_p3 = scmp.lt.s32.totalorder (!%p114_p2), %s642_s13, 63  ;;  %839 = vmatprep.subr.bf16.mxu0 (!%p114_p2), %v911_v0  ;;  %887 = vmatprep.subr.bf16.mxu1 (!%p114_p2), %v911_v0  ;;  %v914_v3 = vld [vmem:[%s1040_s1 + $0x18] sm:$0xff] (!%p114_p2)   ;;  %v915_v10 = vld [vmem:[%s1040_s1 + $0x20] sm:$0xff] (!%p114_p2)   ;;  %v916_v11 = vld [vmem:[%s1040_s1 + $0x28] sm:$0xff] (!%p114_p2)  }
   0x7   : > { %840 = vmatpush3.bf16.msra.mxu0 (!%p114_p2), %v911_v0  ;;  %895 = vmatpush3.bf16.msra.mxu1 (!%p114_p2), %v911_v0  ;;  %v917_v12 = vld [vmem:[%s1040_s1 + $0x30] sm:$0xff] (!%p114_p2)   ;;  %v918_v13 = vld [vmem:[%s1040_s1 + $0x38] sm:$0xff] (!%p114_p2)  }
   0x8   : > { %841 = vmatprep.subr.bf16.mxu0 (!%p114_p2), %v912_v1  ;;  %888 = vmatprep.subr.bf16.mxu1 (!%p114_p2), %v912_v1 }
   0xb   : > { %842 = vmatpush3.bf16.msra.mxu0 (!%p114_p2), %v912_v1  ;;  %896 = vmatpush3.bf16.msra.mxu1 (!%p114_p2), %v912_v1 }
   0xc   : > { %843 = vmatprep.subr.bf16.mxu0 (!%p114_p2), %v913_v2  ;;  %889 = vmatprep.subr.bf16.mxu1 (!%p114_p2), %v913_v2 }
   0xd   : > { %s1043_s13 = smov (!%p136_p3, %s642_s13), 63 }
   0xe   : > { %s643_s18 = sshll.u32 %s1043_s13, 3  ;;  %s645_s4 = sshll.u32 %s1043_s13, 2 }
   0xf   : > { %s965_s21 = scalar_lea.vmem %s1039_s0, %s643_s18  ;;  %844 = vmatpush3.bf16.msra.mxu0 %v913_v2  ;;  %897 = vmatpush3.bf16.msra.mxu1 %v913_v2  ;;  %s1018_s7 = scalar_lea.vmem %s1041_s2, %s645_s4 }
  0x10   : > { %v148_v4 = vld [vmem:[%s965_s21] sm:$0xff]  ;;  %v149_v5 = vld [vmem:[%s965_s21 + $0x8] sm:$0xff]  ;;  %845 = vmatprep.subr.bf16.mxu0 %v914_v3  ;;  %890 = vmatprep.subr.bf16.mxu1 %v914_v3  ;;  %v150_v14 = vld [vmem:[%s965_s21 + $0x10] sm:$0xff] }
  0x11   : > { %v164_v6 = vld [vmem:[%s965_s21 + $0x80] sm:$0xff]  ;;  %v180_v7 = vpack.c.bf16 %v149_v5, %v148_v4  ;;  %v165_v8 = vld [vmem:[%s965_s21 + $0x88] sm:$0xff]  ;;  %v151_v15 = vld [vmem:[%s965_s21 + $0x18] sm:$0xff] }
  0x12   : > { %v188_v9 = vpack.c.bf16 %v165_v8, %v164_v6  ;;  %v166_v16 = vld [vmem:[%s965_s21 + $0x90] sm:$0xff]  ;;  %v167_v17 = vld [vmem:[%s965_s21 + $0x98] sm:$0xff]  ;;  %v152_v18 = vld [vmem:[%s965_s21 + $0x20] sm:$0xff]  ;;  %v181_v22 = vpack.c.bf16 %v151_v15, %v150_v14 }
  0x13   : > { %855 = vmatprep.mubr.bf16.mxu0 %v180_v7  ;;  %846 = vmatpush3.bf16.msra.mxu0 %v914_v3  ;;  %v153_v19 = vld [vmem:[%s965_s21 + $0x28] sm:$0xff]  ;;  %v168_v20 = vld [vmem:[%s965_s21 + $0xa0] sm:$0xff]  ;;  %v189_v23 = vpack.c.bf16 %v167_v17, %v166_v16  ;;  %v154_v26 = vld [vmem:[%s965_s21 + $0x30] sm:$0xff] }
  0x14   : > { %871 = vmatprep.mubr.bf16.mxu1 %v188_v9  ;;  %898 = vmatpush3.bf16.msra.mxu1 %v914_v3  ;;  %v169_v21 = vld [vmem:[%s965_s21 + $0xa8] sm:$0xff]  ;;  %v182_v24 = vpack.c.bf16 %v153_v19, %v152_v18  ;;  %v155_v27 = vld [vmem:[%s965_s21 + $0x38] sm:$0xff]  ;;  %v170_v28 = vld [vmem:[%s965_s21 + $0xb0] sm:$0xff] }
  0x15   : > { %847 = vmatprep.subr.bf16.mxu0 %v915_v10  ;;  %891 = vmatprep.subr.bf16.mxu1 %v915_v10  ;;  %v190_v25 = vpack.c.bf16 %v169_v21, %v168_v20  ;;  %v171_v29 = vld [vmem:[%s965_s21 + $0xb8] sm:$0xff]  ;;  %v156_v30 = vld [vmem:[%s965_s21 + $0x40] sm:$0xff]  ;;  %v157_v31 = vld [vmem:[%s965_s21 + $0x48] sm:$0xff]  ;;  %v183_v34 = vpack.c.bf16 %v155_v27, %v154_v26 }
  0x16   : > { %v172_v32 = vld [vmem:[%s965_s21 + $0xc0] sm:$0xff]  ;;  %v173_v33 = vld [vmem:[%s965_s21 + $0xc8] sm:$0xff]  ;;  %v191_v35 = vpack.c.bf16 %v171_v29, %v170_v28  ;;  %v184_v36 = vpack.c.bf16 %v157_v31, %v156_v30  ;;  %v158_v38 = vld [vmem:[%s965_s21 + $0x50] sm:$0xff] }
  0x17   : > { %848 = vmatpush3.bf16.msra.mxu0 %v915_v10  ;;  %v192_v37 = vpack.c.bf16 %v173_v33, %v172_v32  ;;  %v159_v39 = vld [vmem:[%s965_s21 + $0x58] sm:$0xff]  ;;  %v174_v40 = vld [vmem:[%s965_s21 + $0xd0] sm:$0xff]  ;;  %v160_v42 = vld [vmem:[%s965_s21 + $0x60] sm:$0xff] }
  0x18   : > { %899 = vmatpush3.bf16.msra.mxu1 %v915_v10  ;;  %849 = vmatprep.subr.bf16.mxu0 %v916_v11  ;;  %v175_v41 = vld [vmem:[%s965_s21 + $0xd8] sm:$0xff]  ;;  %v161_v43 = vld [vmem:[%s965_s21 + $0x68] sm:$0xff]  ;;  %v176_v44 = vld [vmem:[%s965_s21 + $0xe0] sm:$0xff]  ;;  %v185_v46 = vpack.c.bf16 %v159_v39, %v158_v38 }
  0x19   : > { %892 = vmatprep.subr.bf16.mxu1 %v916_v11  ;;  %v177_v45 = vld [vmem:[%s965_s21 + $0xe8] sm:$0xff]  ;;  %v193_v47 = vpack.c.bf16 %v175_v41, %v174_v40  ;;  %v186_v48 = vpack.c.bf16 %v161_v43, %v160_v42  ;;  %v162_v50 = vld [vmem:[%s965_s21 + $0x70] sm:$0xff]  ;;  %v163_v51 = vld [vmem:[%s965_s21 + $0x78] sm:$0xff] }
  0x1a   : > { %v194_v49 = vpack.c.bf16 %v177_v45, %v176_v44  ;;  %v178_v52 = vld [vmem:[%s965_s21 + $0xf0] sm:$0xff]  ;;  %v179_v53 = vld [vmem:[%s965_s21 + $0xf8] sm:$0xff]  ;;  %v187_v54 = vpack.c.bf16 %v163_v51, %v162_v50 }
  0x1b   : > { %850 = vmatpush3.bf16.msra.mxu0 %v916_v11  ;;  %v195_v55 = vpack.c.bf16 %v179_v53, %v178_v52 }
  0x1c   : > { %900 = vmatpush3.bf16.msra.mxu1 %v916_v11  ;;  %851 = vmatprep.subr.bf16.mxu0 %v917_v12 }
  0x1d   : > { %893 = vmatprep.subr.bf16.mxu1 %v917_v12 }
  0x1f   : > { %852 = vmatpush3.bf16.msra.mxu0 %v917_v12 }
  0x20   : > { %901 = vmatpush3.bf16.msra.mxu1 %v917_v12  ;;  %853 = vmatprep.subr.bf16.mxu0 %v918_v13 }
  0x21   : > { %894 = vmatprep.subr.bf16.mxu1 %v918_v13 }
  0x23   : > { %854 = vmatpush3.bf16.msra.mxu0 %v918_v13 }
  0x24   : > { %902 = vmatpush3.bf16.msra.mxu1 %v918_v13 }
  0x26   : > { %856 = vmatmul.mubr.bf16.vlgmr.msra.gmra.mrb[0].mxu0 %v181_v22 }
  0x27   : > { %872 = vmatmul.mubr.bf16.vlgmr.msra.gmra.mrb[0].mxu1 %v189_v23  ;;  %859 = vmatprep.mubr.bf16.mxu0 %v182_v24 }
  0x28   : > { %875 = vmatprep.mubr.bf16.mxu1 %v190_v25 }
  0x2e   : > { %860 = vmatmul.mubr.bf16.gmra.mrb[4].mxu0 %v183_v34 }
  0x2f   : > { %876 = vmatmul.mubr.bf16.gmra.mrb[4].mxu1 %v191_v35  ;;  %863 = vmatprep.mubr.bf16.mxu0 %v184_v36 }
  0x30   : > { %879 = vmatprep.mubr.bf16.mxu1 %v192_v37 }
  0x36   : > { %864 = vmatmul.mubr.bf16.gmra.mrb[8].mxu0 %v185_v46 }
  0x37   : > { %880 = vmatmul.mubr.bf16.gmra.mrb[8].mxu1 %v193_v47  ;;  %867 = vmatprep.mubr.bf16.mxu0 %v186_v48 }
  0x38   : > { %883 = vmatprep.mubr.bf16.mxu1 %v194_v49 }
  0x3e   : > { %868 = vmatmul.mubr.bf16.gmra.mrb[12].mxu0 %v187_v54 }
  0x3f   : > { %884 = vmatmul.mubr.bf16.gmra.mrb[12].mxu1 %v195_v55 }
  0xf9   : > { %v857_v56 = vpop.f32.mrb[0].mxu0 }
  0xfa   : > { %v873_v57 = vpop.f32.mrb[0].mxu1  ;;  %v294_v58 = vpop.f32.mrb[1].mxu0 }
  0xfb   : > { %v358_v59 = vpop.f32.mrb[1].mxu1  ;;  %v858_v60 = vpop.f32.mrb[2].mxu0 }
  0xfc   : > { %v874_v61 = vpop.f32.mrb[2].mxu1  ;;  %v728_v62 = vpack.c.bf16 %v858_v60, %v857_v56  ;;  %v297_v0 = vpop.f32.mrb[3].mxu0 }
  0xfd   : > { %v768_v63 = vpack.c.bf16 %v874_v61, %v873_v57  ;;  %v361_v1 = vpop.f32.mrb[3].mxu1  ;;  %v723_v2 = vpack.c.bf16 %v297_v0, %v294_v58 }
  0xfe   : > { %v763_v3 = vpack.c.bf16 %v361_v1, %v358_v59  ;;  %800 = vst [vmem:[%s1018_s7 + $0x8] sm:$0xff] %v728_v62  }
  0xff   : > { %808 = vst [vmem:[%s1018_s7 + $0x48] sm:$0xff] %v768_v63   ;;  %724 = vst [vmem:[%s1018_s7] sm:$0xff] %v723_v2  }
 0x100   : > { %807 = vst [vmem:[%s1018_s7 + $0x40] sm:$0xff] %v763_v3  }
 0x101   : > { %v861_v4 = vpop.f32.mrb[4].mxu0 }
 0x102   : > { %v877_v5 = vpop.f32.mrb[4].mxu1  ;;  %v310_v6 = vpop.f32.mrb[5].mxu0 }
 0x103   : > { %v374_v7 = vpop.f32.mrb[5].mxu1  ;;  %v862_v8 = vpop.f32.mrb[6].mxu0 }
 0x104   : > { %v878_v9 = vpop.f32.mrb[6].mxu1  ;;  %v738_v10 = vpack.c.bf16 %v862_v8, %v861_v4  ;;  %v313_v12 = vpop.f32.mrb[7].mxu0 }
 0x105   : > { %v778_v11 = vpack.c.bf16 %v878_v9, %v877_v5  ;;  %v377_v13 = vpop.f32.mrb[7].mxu1  ;;  %v733_v14 = vpack.c.bf16 %v313_v12, %v310_v6 }
 0x106   : > { %v773_v15 = vpack.c.bf16 %v377_v13, %v374_v7  ;;  %802 = vst [vmem:[%s1018_s7 + $0x18] sm:$0xff] %v738_v10  }
 0x107   : > { %810 = vst [vmem:[%s1018_s7 + $0x58] sm:$0xff] %v778_v11   ;;  %801 = vst [vmem:[%s1018_s7 + $0x10] sm:$0xff] %v733_v14  }
 0x108   : > { %809 = vst [vmem:[%s1018_s7 + $0x50] sm:$0xff] %v773_v15  }
 0x109   : > { %v865_v16 = vpop.f32.mrb[8].mxu0 }
 0x10a   : > { %v881_v17 = vpop.f32.mrb[8].mxu1  ;;  %v326_v18 = vpop.f32.mrb[9].mxu0 }
 0x10b   : > { %v390_v19 = vpop.f32.mrb[9].mxu1  ;;  %v866_v20 = vpop.f32.mrb[10].mxu0 }
 0x10c   : > { %v882_v21 = vpop.f32.mrb[10].mxu1  ;;  %v748_v22 = vpack.c.bf16 %v866_v20, %v865_v16  ;;  %v329_v24 = vpop.f32.mrb[11].mxu0 }
 0x10d   : > { %v788_v23 = vpack.c.bf16 %v882_v21, %v881_v17  ;;  %v393_v25 = vpop.f32.mrb[11].mxu1  ;;  %v743_v26 = vpack.c.bf16 %v329_v24, %v326_v18 }
 0x10e   : > { %v783_v27 = vpack.c.bf16 %v393_v25, %v390_v19  ;;  %804 = vst [vmem:[%s1018_s7 + $0x28] sm:$0xff] %v748_v22  }
 0x10f   : > { %812 = vst [vmem:[%s1018_s7 + $0x68] sm:$0xff] %v788_v23   ;;  %803 = vst [vmem:[%s1018_s7 + $0x20] sm:$0xff] %v743_v26  }
 0x110   : > { %811 = vst [vmem:[%s1018_s7 + $0x60] sm:$0xff] %v783_v27  }
 0x111   : > { %v869_v28 = vpop.f32.mrb[12].mxu0 }
 0x112   : > { %v885_v29 = vpop.f32.mrb[12].mxu1  ;;  %v342_v30 = vpop.f32.mrb[13].mxu0 }
 0x113   : > { %v406_v31 = vpop.f32.mrb[13].mxu1  ;;  %v870_v32 = vpop.f32.mrb[14].mxu0 }
 0x114   : > { %v886_v33 = vpop.f32.mrb[14].mxu1  ;;  %v758_v34 = vpack.c.bf16 %v870_v32, %v869_v28  ;;  %v345_v36 = vpop.f32.mrb[15].mxu0 }
 0x115   : > { %v798_v35 = vpack.c.bf16 %v886_v33, %v885_v29  ;;  %v409_v37 = vpop.f32.mrb[15].mxu1  ;;  %v753_v38 = vpack.c.bf16 %v345_v36, %v342_v30 }
 0x116   : > { %v793_v39 = vpack.c.bf16 %v409_v37, %v406_v31  ;;  %806 = vst [vmem:[%s1018_s7 + $0x38] sm:$0xff] %v758_v34  }
 0x117   : > { %814 = vst [vmem:[%s1018_s7 + $0x78] sm:$0xff] %v798_v35   ;;  %805 = vst [vmem:[%s1018_s7 + $0x30] sm:$0xff] %v753_v38  }
 0x118   : > { %813 = vst [vmem:[%s1018_s7 + $0x70] sm:$0xff] %v793_v39  }
 0x119 PF: > { %s12_s9 = sadd.s32 1, %s925_s9  }
 0x11a   : > { %p9_p4 = scmp.ge.s32.totalorder %s12_s9, 4  }
 0x11c   :  { %11 = sbr.rel (!%p9_p4) target bundleno = 1 (0x1), region = 58 }

// kernel: gae_forward.9
= control target key start
LH: loop header
LB: loop body
LE: loop exit
PB: predicated region body
PF: predicated region fallthrough
CT: control target
= control target key end

     0   :  { %s2014_s15 = smov 0   ;;  %s2316_s0 = inlined_call_operand.vmem [shape: bf16[512,512], index: 0, kind: input, shape index: {}]   ;;  %s2317_s1 = inlined_call_operand.vmem [shape: bf16[512,128], index: 1, kind: input, shape index: {}]   ;;  %s2318_s2 = inlined_call_operand.vmem [shape: f32[512,128], index: 2, kind: output, shape index: {0}]   ;;  %s2319_s3 = inlined_call_operand.vmem [shape: f32[16,128], index: 3, kind: output, shape index: {1}]   ;;  %s2320_s4 = inlined_call_operand.vmem [shape: f32[16,128], index: 4, kind: output, shape index: {2}]  }
   0x1 LB: > { %s2020_s16 = sadd.s32 4294967295, %s1987_s15   ;;  %p1514_p0 = scmp.ge.s32.totalorder %s1987_s15, 1  ;;  %s1987_s15 = sphi %s2014_s15, %s15_s15  }
   0x2   : > { %p169_p1 = scmp.lt.s32.totalorder %s1987_s15, 3 }
   0x4   : > { %p170_p2 = pnand %p1514_p0, %p169_p1 }
   0x5   : > { %v1853_v0 = vld [vmem:[%s2317_s1 + $0x40] sm:$0xff] (!%p170_p2)   ;;  %v1857_v4 = vld [vmem:[%s2317_s1 + $0x48] sm:$0xff] (!%p170_p2)   ;;  %v1861_v8 = vld [vmem:[%s2317_s1 + $0x50] sm:$0xff] (!%p170_p2)   ;;  %s1515_s25 = sshll.u32 (!%p170_p2), %s2020_s16, 5  ;;  %p217_p4 = scmp.lt.s32.totalorder (!%p170_p2), %s2020_s16, 1 }
   0x6   : > { %173 = sbr.rel (%p170_p2) target bundleno = 401 (0x191), region = 28  ;;  %v1854_v1 = vld [vmem:[%s2317_s1 + $0xc0] sm:$0xff] (!%p170_p2)   ;;  %1621 = vmatprep.subr.bf16.mxu0 (!%p170_p2), %v1853_v0  ;;  %v1858_v5 = vld [vmem:[%s2317_s1 + $0xc8] sm:$0xff] (!%p170_p2)   ;;  %v1862_v9 = vld [vmem:[%s2317_s1 + $0xd0] sm:$0xff] (!%p170_p2)   ;;  %p205_p3 = scmp.lt.s32.totalorder (!%p170_p2), %s1515_s25, 63 }
   0x7   : > { %v1855_v2 = vld [vmem:[%s2317_s1] sm:$0xff] (!%p170_p2)   ;;  %1733 = vmatprep.subr.bf16.mxu1 (!%p170_p2), %v1854_v1  ;;  %v1859_v6 = vld [vmem:[%s2317_s1 + $0x8] sm:$0xff] (!%p170_p2)   ;;  %v1863_v10 = vld [vmem:[%s2317_s1 + $0x10] sm:$0xff] (!%p170_p2)  }
   0x8   : > { %v1856_v3 = vld [vmem:[%s2317_s1 + $0x80] sm:$0xff] (!%p170_p2)   ;;  %1622 = vmatpush3.bf16.msra.mxu0 (!%p170_p2), %v1855_v2  ;;  %v1860_v7 = vld [vmem:[%s2317_s1 + $0x88] sm:$0xff] (!%p170_p2)   ;;  %v1864_v11 = vld [vmem:[%s2317_s1 + $0x90] sm:$0xff] (!%p170_p2)  }
   0x9   : > { %1734 = vmatpush3.bf16.msra.mxu1 (!%p170_p2), %v1856_v3  ;;  %1623 = vmatprep.subr.bf16.mxu0 (!%p170_p2), %v1857_v4  ;;  %v1865_v12 = vld [vmem:[%s2317_s1 + $0x58] sm:$0xff] (!%p170_p2)   ;;  %v1869_v16 = vld [vmem:[%s2317_s1 + $0x60] sm:$0xff] (!%p170_p2)   ;;  %v1873_v20 = vld [vmem:[%s2317_s1 + $0x68] sm:$0xff] (!%p170_p2)  }
   0xa   : > { %1735 = vmatprep.subr.bf16.mxu1 (!%p170_p2), %v1858_v5  ;;  %v1866_v13 = vld [vmem:[%s2317_s1 + $0xd8] sm:$0xff] (!%p170_p2)   ;;  %v1870_v17 = vld [vmem:[%s2317_s1 + $0xe0] sm:$0xff] (!%p170_p2)   ;;  %v1874_v21 = vld [vmem:[%s2317_s1 + $0xe8] sm:$0xff] (!%p170_p2)  }
   0xb   : > { %v1867_v14 = vld [vmem:[%s2317_s1 + $0x18] sm:$0xff] (!%p170_p2)   ;;  %v1871_v18 = vld [vmem:[%s2317_s1 + $0x20] sm:$0xff] (!%p170_p2)   ;;  %v1875_v22 = vld [vmem:[%s2317_s1 + $0x28] sm:$0xff] (!%p170_p2)  }
   0xc   : > { %1624 = vmatpush3.bf16.msra.mxu0 (!%p170_p2), %v1859_v6  ;;  %v1868_v15 = vld [vmem:[%s2317_s1 + $0x98] sm:$0xff] (!%p170_p2)   ;;  %v1872_v19 = vld [vmem:[%s2317_s1 + $0xa0] sm:$0xff] (!%p170_p2)   ;;  %v1876_v23 = vld [vmem:[%s2317_s1 + $0xa8] sm:$0xff] (!%p170_p2)  }
   0xd   : > { %1736 = vmatpush3.bf16.msra.mxu1 %v1860_v7  ;;  %1625 = vmatprep.subr.bf16.mxu0 %v1861_v8  ;;  %s2322_s25 = smov (!%p205_p3, %s1515_s25), 63  ;;  %v1877_v24 = vld [vmem:[%s2317_s1 + $0x70] sm:$0xff]   ;;  %v1881_v28 = vld [vmem:[%s2317_s1 + $0x78] sm:$0xff]   ;;  %s2324_s16 = smov (!%p217_p4, %s2020_s16), 1 }
   0xe   : > { %1737 = vmatprep.subr.bf16.mxu1 %v1862_v9  ;;  %v1878_v25 = vld [vmem:[%s2317_s1 + $0xf0] sm:$0xff]   ;;  %s1620_s24 = sshll.u32 %s2322_s25, 4  ;;  %v1882_v29 = vld [vmem:[%s2317_s1 + $0xf8] sm:$0xff]   ;;  %s1519_s13 = sshll.u32 %s2322_s25, 3 }
   0xf   : > { %v1879_v26 = vld [vmem:[%s2317_s1 + $0x30] sm:$0xff]   ;;  %s2121_s8 = scalar_lea.vmem %s2316_s0, %s1620_s24  ;;  %v1883_v30 = vld [vmem:[%s2317_s1 + $0x38] sm:$0xff]   ;;  %s2197_s18 = scalar_lea.vmem %s2318_s2, %s1519_s13 }
  0x10   : > { %1626 = vmatpush3.bf16.msra.mxu0 %v1863_v10  ;;  %v1880_v27 = vld [vmem:[%s2317_s1 + $0xb0] sm:$0xff]   ;;  %v1884_v31 = vld [vmem:[%s2317_s1 + $0xb8] sm:$0xff]   ;;  %s1520_s25 = sshll.u32 %s2324_s16, 3 }
  0x11   : > { %1738 = vmatpush3.bf16.msra.mxu1 %v1864_v11  ;;  %1627 = vmatprep.subr.bf16.mxu0 %v1865_v12  ;;  %v1885_v32 = vld [vmem:[%s2121_s8] ss:$16 sps:$4 sm:$0xff]   ;;  %v1887_v33 = vld [vmem:[%s2121_s8 + $0x4] ss:$16 sps:$4 sm:$0xff]   ;;  %v1888_v34 = vld [vmem:[%s2121_s8 + $0x8] ss:$16 sps:$4 sm:$0xff]   ;;  %s220_s21 = scalar_lea.vmem %s2319_s3, %s1520_s25  ;;  %s224_s24 = scalar_lea.vmem %s2320_s4, %s1520_s25 }
  0x12   : > { %1739 = vmatprep.subr.bf16.mxu1 %v1866_v13  ;;  %v1890_v35 = vld [vmem:[%s2121_s8 + $0xc] ss:$16 sps:$4 sm:$0xff]   ;;  %898 = vmatprep.mubr.bf16.mxu0 %v1887_v33  ;;  %v1891_v36 = vld [vmem:[%s2121_s8 + $0x24] ss:$16 sps:$4 sm:$0xff]   ;;  %v1895_v38 = vld [vmem:[%s2121_s8 + $0x20] ss:$16 sps:$4 sm:$0xff]  }
  0x13   : > { %1059 = vmatprep.mubr.bf16.mxu1 %v1890_v35  ;;  %v1893_v37 = vld [vmem:[%s2121_s8 + $0x2c] ss:$16 sps:$4 sm:$0xff]   ;;  %v1896_v39 = vld [vmem:[%s2121_s8 + $0x28] ss:$16 sps:$4 sm:$0xff]   ;;  %v1897_v40 = vld [vmem:[%s2121_s8 + $0x44] ss:$16 sps:$4 sm:$0xff]  }
  0x14   : > { %1628 = vmatpush3.bf16.msra.mxu0 %v1867_v14  ;;  %v1899_v41 = vld [vmem:[%s2121_s8 + $0x4c] ss:$16 sps:$4 sm:$0xff]   ;;  %v1901_v42 = vld [vmem:[%s2121_s8 + $0x40] ss:$16 sps:$4 sm:$0xff]   ;;  %v1902_v43 = vld [vmem:[%s2121_s8 + $0x48] ss:$16 sps:$4 sm:$0xff]  }
  0x15   : > { %1740 = vmatpush3.bf16.msra.mxu1 %v1868_v15  ;;  %1629 = vmatprep.subr.bf16.mxu0 %v1869_v16  ;;  %v1903_v44 = vld [vmem:[%s2121_s8 + $0x64] ss:$16 sps:$4 sm:$0xff]   ;;  %v1905_v45 = vld [vmem:[%s2121_s8 + $0x6c] ss:$16 sps:$4 sm:$0xff]   ;;  %v1907_v46 = vld [vmem:[%s2121_s8 + $0x60] ss:$16 sps:$4 sm:$0xff]  }
  0x16   : > { %1741 = vmatprep.subr.bf16.mxu1 %v1870_v17  ;;  %v1908_v47 = vld [vmem:[%s2121_s8 + $0x68] ss:$16 sps:$4 sm:$0xff]   ;;  %v1909_v48 = vld [vmem:[%s2121_s8 + $0x84] ss:$16 sps:$4 sm:$0xff]   ;;  %v1911_v49 = vld [vmem:[%s2121_s8 + $0x8c] ss:$16 sps:$4 sm:$0xff]  }
  0x17   : > { %v1913_v50 = vld [vmem:[%s2121_s8 + $0x80] ss:$16 sps:$4 sm:$0xff]   ;;  %v1914_v51 = vld [vmem:[%s2121_s8 + $0x88] ss:$16 sps:$4 sm:$0xff]   ;;  %v1915_v52 = vld [vmem:[%s2121_s8 + $0xa4] ss:$16 sps:$4 sm:$0xff]  }
  0x18   : > { %1630 = vmatpush3.bf16.msra.mxu0 %v1871_v18  ;;  %v1917_v53 = vld [vmem:[%s2121_s8 + $0xac] ss:$16 sps:$4 sm:$0xff]   ;;  %v1919_v54 = vld [vmem:[%s2121_s8 + $0xa0] ss:$16 sps:$4 sm:$0xff]   ;;  %v1920_v55 = vld [vmem:[%s2121_s8 + $0xa8] ss:$16 sps:$4 sm:$0xff]  }
  0x19   : > { %1742 = vmatpush3.bf16.msra.mxu1 %v1872_v19  ;;  %1631 = vmatprep.subr.bf16.mxu0 %v1873_v20  ;;  %v1921_v56 = vld [vmem:[%s2121_s8 + $0xc4] ss:$16 sps:$4 sm:$0xff]   ;;  %v1923_v57 = vld [vmem:[%s2121_s8 + $0xcc] ss:$16 sps:$4 sm:$0xff]   ;;  %v1925_v58 = vld [vmem:[%s2121_s8 + $0xc0] ss:$16 sps:$4 sm:$0xff]  }
  0x1a   : > { %1743 = vmatprep.subr.bf16.mxu1 %v1874_v21  ;;  %v1926_v59 = vld [vmem:[%s2121_s8 + $0xc8] ss:$16 sps:$4 sm:$0xff]   ;;  %v1927_v60 = vld [vmem:[%s2121_s8 + $0xe4] ss:$16 sps:$4 sm:$0xff]   ;;  %v1929_v61 = vld [vmem:[%s2121_s8 + $0xec] ss:$16 sps:$4 sm:$0xff]  }
  0x1b   : > { %v1931_v62 = vld [vmem:[%s2121_s8 + $0xe0] ss:$16 sps:$4 sm:$0xff]   ;;  %v1932_v63 = vld [vmem:[%s2121_s8 + $0xe8] ss:$16 sps:$4 sm:$0xff]   ;;  %v1933_v0 = vld [vmem:[%s2121_s8 + $0x104] ss:$16 sps:$4 sm:$0xff]  }
  0x1c   : > { %1632 = vmatpush3.bf16.msra.mxu0 %v1875_v22  ;;  %v1935_v1 = vld [vmem:[%s2121_s8 + $0x10c] ss:$16 sps:$4 sm:$0xff]   ;;  %v1937_v2 = vld [vmem:[%s2121_s8 + $0x100] ss:$16 sps:$4 sm:$0xff]   ;;  %v1938_v3 = vld [vmem:[%s2121_s8 + $0x108] ss:$16 sps:$4 sm:$0xff]  }
  0x1d   : > { %1744 = vmatpush3.bf16.msra.mxu1 %v1876_v23  ;;  %1633 = vmatprep.subr.bf16.mxu0 %v1877_v24  ;;  %v1939_v4 = vld [vmem:[%s2121_s8 + $0x124] ss:$16 sps:$4 sm:$0xff]   ;;  %v1941_v5 = vld [vmem:[%s2121_s8 + $0x12c] ss:$16 sps:$4 sm:$0xff]   ;;  %v1943_v6 = vld [vmem:[%s2121_s8 + $0x120] ss:$16 sps:$4 sm:$0xff]  }
  0x1e   : > { %1745 = vmatprep.subr.bf16.mxu1 %v1878_v25  ;;  %v1944_v7 = vld [vmem:[%s2121_s8 + $0x128] ss:$16 sps:$4 sm:$0xff]   ;;  %v1945_v8 = vld [vmem:[%s2121_s8 + $0x144] ss:$16 sps:$4 sm:$0xff]   ;;  %v1947_v9 = vld [vmem:[%s2121_s8 + $0x14c] ss:$16 sps:$4 sm:$0xff]  }
  0x1f   : > { %v1949_v10 = vld [vmem:[%s2121_s8 + $0x140] ss:$16 sps:$4 sm:$0xff]   ;;  %v1950_v11 = vld [vmem:[%s2121_s8 + $0x148] ss:$16 sps:$4 sm:$0xff]   ;;  %v1951_v12 = vld [vmem:[%s2121_s8 + $0x164] ss:$16 sps:$4 sm:$0xff]  }
  0x20   : > { %1634 = vmatpush3.bf16.msra.mxu0 %v1879_v26  ;;  %v1953_v13 = vld [vmem:[%s2121_s8 + $0x16c] ss:$16 sps:$4 sm:$0xff]   ;;  %v1955_v14 = vld [vmem:[%s2121_s8 + $0x160] ss:$16 sps:$4 sm:$0xff]   ;;  %v1956_v15 = vld [vmem:[%s2121_s8 + $0x168] ss:$16 sps:$4 sm:$0xff]  }
  0x21   : > { %1746 = vmatpush3.bf16.msra.mxu1 %v1880_v27  ;;  %1635 = vmatprep.subr.bf16.mxu0 %v1881_v28  ;;  %v1957_v16 = vld [vmem:[%s2121_s8 + $0x184] ss:$16 sps:$4 sm:$0xff]   ;;  %v1959_v17 = vld [vmem:[%s2121_s8 + $0x18c] ss:$16 sps:$4 sm:$0xff]   ;;  %v1961_v18 = vld [vmem:[%s2121_s8 + $0x180] ss:$16 sps:$4 sm:$0xff]  }
  0x22   : > { %1747 = vmatprep.subr.bf16.mxu1 %v1882_v29  ;;  %v1962_v19 = vld [vmem:[%s2121_s8 + $0x188] ss:$16 sps:$4 sm:$0xff]   ;;  %v1963_v20 = vld [vmem:[%s2121_s8 + $0x1a4] ss:$16 sps:$4 sm:$0xff]   ;;  %v1965_v21 = vld [vmem:[%s2121_s8 + $0x1ac] ss:$16 sps:$4 sm:$0xff]  }
  0x23   : > { %v1967_v22 = vld [vmem:[%s2121_s8 + $0x1a0] ss:$16 sps:$4 sm:$0xff]   ;;  %v1968_v23 = vld [vmem:[%s2121_s8 + $0x1a8] ss:$16 sps:$4 sm:$0xff]   ;;  %v1969_v24 = vld [vmem:[%s2121_s8 + $0x1c4] ss:$16 sps:$4 sm:$0xff]  }
  0x24   : > { %1636 = vmatpush3.bf16.msra.mxu0 %v1883_v30  ;;  %v1971_v25 = vld [vmem:[%s2121_s8 + $0x1cc] ss:$16 sps:$4 sm:$0xff]   ;;  %v1973_v26 = vld [vmem:[%s2121_s8 + $0x1c0] ss:$16 sps:$4 sm:$0xff]   ;;  %v1974_v27 = vld [vmem:[%s2121_s8 + $0x1c8] ss:$16 sps:$4 sm:$0xff]  }
  0x25   : > { %1748 = vmatpush3.bf16.msra.mxu1 %v1884_v31  ;;  %v1975_v28 = vld [vmem:[%s2121_s8 + $0x1e4] ss:$16 sps:$4 sm:$0xff]   ;;  %v1977_v29 = vld [vmem:[%s2121_s8 + $0x1ec] ss:$16 sps:$4 sm:$0xff]   ;;  %v1979_v30 = vld [vmem:[%s2121_s8 + $0x1e0] ss:$16 sps:$4 sm:$0xff]  }
  0x26   : > { %v1980_v31 = vld [vmem:[%s2121_s8 + $0x1e8] ss:$16 sps:$4 sm:$0xff]  }
  0x27   : > { %899 = vmatmul.mubr.bf16.vlgmr.msra.gmra.mrb[0].mxu0 %v1885_v32 }
  0x28   : > { %1060 = vmatmul.mubr.bf16.vlgmr.msra.gmra.mrb[0].mxu1 %v1888_v34  ;;  %906 = vmatprep.mubr.bf16.mxu0 %v1891_v36 }
  0x29   : > { %1067 = vmatprep.mubr.bf16.mxu1 %v1893_v37 }
  0x2f   : > { %907 = vmatmul.mubr.bf16.gmra.mrb[4].mxu0 %v1895_v38 }
  0x30   : > { %1068 = vmatmul.mubr.bf16.gmra.mrb[4].mxu1 %v1896_v39  ;;  %914 = vmatprep.mubr.bf16.mxu0 %v1897_v40 }
  0x31   : > { %1075 = vmatprep.mubr.bf16.mxu1 %v1899_v41 }
  0x37   : > { %915 = vmatmul.mubr.bf16.gmra.mrb[8].mxu0 %v1901_v42 }
  0x38   : > { %1076 = vmatmul.mubr.bf16.gmra.mrb[8].mxu1 %v1902_v43  ;;  %922 = vmatprep.mubr.bf16.mxu0 %v1903_v44 }
  0x39   : > { %1083 = vmatprep.mubr.bf16.mxu1 %v1905_v45 }
  0x3f   : > { %923 = vmatmul.mubr.bf16.gmra.mrb[12].mxu0 %v1907_v46 }
  0x40   : > { %1084 = vmatmul.mubr.bf16.gmra.mrb[12].mxu1 %v1908_v47  ;;  %930 = vmatprep.mubr.bf16.mxu0 %v1909_v48 }
  0x41   : > { %1091 = vmatprep.mubr.bf16.mxu1 %v1911_v49 }
  0x47   : > { %931 = vmatmul.mubr.bf16.gmra.mrb[16].mxu0 %v1913_v50 }
  0x48   : > { %1092 = vmatmul.mubr.bf16.gmra.mrb[16].mxu1 %v1914_v51  ;;  %938 = vmatprep.mubr.bf16.mxu0 %v1915_v52 }
  0x49   : > { %1099 = vmatprep.mubr.bf16.mxu1 %v1917_v53 }
  0x4f   : > { %939 = vmatmul.mubr.bf16.gmra.mrb[20].mxu0 %v1919_v54 }
  0x50   : > { %1100 = vmatmul.mubr.bf16.gmra.mrb[20].mxu1 %v1920_v55  ;;  %946 = vmatprep.mubr.bf16.mxu0 %v1921_v56 }
  0x51   : > { %1107 = vmatprep.mubr.bf16.mxu1 %v1923_v57 }
  0x57   : > { %947 = vmatmul.mubr.bf16.gmra.mrb[24].mxu0 %v1925_v58 }
  0x58   : > { %1108 = vmatmul.mubr.bf16.gmra.mrb[24].mxu1 %v1926_v59  ;;  %954 = vmatprep.mubr.bf16.mxu0 %v1927_v60 }
  0x59   : > { %1115 = vmatprep.mubr.bf16.mxu1 %v1929_v61 }
  0x5f   : > { %955 = vmatmul.mubr.bf16.gmra.mrb[28].mxu0 %v1931_v62 }
  0x60   : > { %1116 = vmatmul.mubr.bf16.gmra.mrb[28].mxu1 %v1932_v63  ;;  %962 = vmatprep.mubr.bf16.mxu0 %v1933_v0 }
  0x61   : > { %1123 = vmatprep.mubr.bf16.mxu1 %v1935_v1 }
  0x67   : > { %963 = vmatmul.mubr.bf16.gmra.mrb[32].mxu0 %v1937_v2 }
  0x68   : > { %1124 = vmatmul.mubr.bf16.gmra.mrb[32].mxu1 %v1938_v3  ;;  %970 = vmatprep.mubr.bf16.mxu0 %v1939_v4 }
  0x69   : > { %1131 = vmatprep.mubr.bf16.mxu1 %v1941_v5 }
  0x6f   : > { %971 = vmatmul.mubr.bf16.gmra.mrb[36].mxu0 %v1943_v6 }
  0x70   : > { %1132 = vmatmul.mubr.bf16.gmra.mrb[36].mxu1 %v1944_v7  ;;  %978 = vmatprep.mubr.bf16.mxu0 %v1945_v8 }
  0x71   : > { %1139 = vmatprep.mubr.bf16.mxu1 %v1947_v9 }
  0x77   : > { %979 = vmatmul.mubr.bf16.gmra.mrb[40].mxu0 %v1949_v10 }
  0x78   : > { %1140 = vmatmul.mubr.bf16.gmra.mrb[40].mxu1 %v1950_v11  ;;  %986 = vmatprep.mubr.bf16.mxu0 %v1951_v12 }
  0x79   : > { %1147 = vmatprep.mubr.bf16.mxu1 %v1953_v13 }
  0x7f   : > { %987 = vmatmul.mubr.bf16.gmra.mrb[44].mxu0 %v1955_v14 }
  0x80   : > { %1148 = vmatmul.mubr.bf16.gmra.mrb[44].mxu1 %v1956_v15  ;;  %994 = vmatprep.mubr.bf16.mxu0 %v1957_v16 }
  0x81   : > { %1155 = vmatprep.mubr.bf16.mxu1 %v1959_v17 }
  0x87   : > { %995 = vmatmul.mubr.bf16.gmra.mrb[48].mxu0 %v1961_v18 }
  0x88   : > { %1156 = vmatmul.mubr.bf16.gmra.mrb[48].mxu1 %v1962_v19  ;;  %1002 = vmatprep.mubr.bf16.mxu0 %v1963_v20 }
  0x89   : > { %1163 = vmatprep.mubr.bf16.mxu1 %v1965_v21 }
  0x8f   : > { %1003 = vmatmul.mubr.bf16.gmra.mrb[52].mxu0 %v1967_v22 }
  0x90   : > { %1164 = vmatmul.mubr.bf16.gmra.mrb[52].mxu1 %v1968_v23  ;;  %1010 = vmatprep.mubr.bf16.mxu0 %v1969_v24 }
  0x91   : > { %1171 = vmatprep.mubr.bf16.mxu1 %v1971_v25 }
  0x97   : > { %1011 = vmatmul.mubr.bf16.gmra.mrb[56].mxu0 %v1973_v26 }
  0x98   : > { %1172 = vmatmul.mubr.bf16.gmra.mrb[56].mxu1 %v1974_v27  ;;  %1018 = vmatprep.mubr.bf16.mxu0 %v1975_v28 }
  0x99   : > { %1179 = vmatprep.mubr.bf16.mxu1 %v1977_v29 }
  0x9f   : > { %1019 = vmatmul.mubr.bf16.gmra.mrb[60].mxu0 %v1979_v30 }
  0xa0   : > { %1180 = vmatmul.mubr.bf16.gmra.mrb[60].mxu1 %v1980_v31 }
  0xfa   : > { %v1637_v32 = vpop.f32.mrb[0].mxu0 }
  0xfb   : > { %v1749_v33 = vpop.f32.mrb[0].mxu1  ;;  %v1638_v34 = vpop.f32.mrb[1].mxu0 }
  0xfc   : > { %v1639_v35 = vadd.f32 %v1638_v34, %v1637_v32  ;;  %v1750_v36 = vpop.f32.mrb[1].mxu1  ;;  %v1640_v37 = vpop.f32.mrb[2].mxu0 }
  0xfd   : > { %v1751_v38 = vadd.f32 %v1750_v36, %v1749_v33  ;;  %v1752_v39 = vpop.f32.mrb[2].mxu1  ;;  %v1641_v40 = vpop.f32.mrb[3].mxu0 }
  0xfe   : > { %v1642_v41 = vadd.f32 %v1641_v40, %v1640_v37  ;;  %v1753_v42 = vpop.f32.mrb[3].mxu1 }
  0xff   : > { %v1062_v43 = vadd.f32 %v1751_v38, %v1639_v35  ;;  %v1754_v44 = vadd.f32 %v1753_v42, %v1752_v39 }
 0x101   : > { %vm1188_vm0 = vcmp.ge.f32.partialorder %v1062_v43, 0.0  ;;  %v1220_v45 = vmul.f32 0.01, %v1062_v43  ;;  %v1065_v46 = vadd.f32 %v1754_v44, %v1642_v41 }
 0x102   : > { %v1643_v47 = vpop.f32.mrb[4].mxu0 }
 0x103   : > { %v2199_v48 = vsel %vm1188_vm0, %v1062_v43, %v1220_v45  ;;  %vm1189_vm1 = vcmp.ge.f32.partialorder %v1065_v46, 0.0  ;;  %v1221_v49 = vmul.f32 0.01, %v1065_v46  ;;  %v1755_v50 = vpop.f32.mrb[4].mxu1  ;;  %v1644_v51 = vpop.f32.mrb[5].mxu0 }
 0x104   : > { %1284 = vst [vmem:[%s2197_s18] sm:$0xff] %v2199_v48  ;;  %v1645_v52 = vadd.f32 %v1644_v51, %v1643_v47  ;;  %v1756_v53 = vpop.f32.mrb[5].mxu1  ;;  %v1646_v54 = vpop.f32.mrb[6].mxu0 }
 0x105   : > { %v2203_v55 = vsel %vm1189_vm1, %v1065_v46, %v1221_v49  ;;  %v1757_v56 = vadd.f32 %v1756_v53, %v1755_v50  ;;  %v1758_v57 = vpop.f32.mrb[6].mxu1  ;;  %v1647_v58 = vpop.f32.mrb[7].mxu0 }
 0x106   : > { %1285 = vst [vmem:[%s2197_s18 + $0x8] sm:$0xff] %v2203_v55  ;;  %v1648_v59 = vadd.f32 %v1647_v58, %v1646_v54  ;;  %v1759_v60 = vpop.f32.mrb[7].mxu1 }
 0x107   : > { %v1070_v61 = vadd.f32 %v1757_v56, %v1645_v52  ;;  %v1760_v62 = vadd.f32 %v1759_v60, %v1758_v57 }
 0x109   : > { %vm1190_vm2 = vcmp.ge.f32.partialorder %v1070_v61, 0.0  ;;  %v1222_v63 = vmul.f32 0.01, %v1070_v61  ;;  %v1073_v0 = vadd.f32 %v1760_v62, %v1648_v59 }
 0x10a   : > { %v1649_v1 = vpop.f32.mrb[8].mxu0 }
 0x10b   : > { %v2207_v2 = vsel %vm1190_vm2, %v1070_v61, %v1222_v63  ;;  %vm1191_vm3 = vcmp.ge.f32.partialorder %v1073_v0, 0.0  ;;  %v1223_v3 = vmul.f32 0.01, %v1073_v0  ;;  %v1761_v4 = vpop.f32.mrb[8].mxu1  ;;  %v1650_v5 = vpop.f32.mrb[9].mxu0 }
 0x10c   : > { %1286 = vst [vmem:[%s2197_s18 + $0x10] sm:$0xff] %v2207_v2  ;;  %v1651_v6 = vadd.f32 %v1650_v5, %v1649_v1  ;;  %v1762_v7 = vpop.f32.mrb[9].mxu1  ;;  %v1652_v8 = vpop.f32.mrb[10].mxu0 }
 0x10d   : > { %v2211_v9 = vsel %vm1191_vm3, %v1073_v0, %v1223_v3  ;;  %v1763_v10 = vadd.f32 %v1762_v7, %v1761_v4  ;;  %v1764_v11 = vpop.f32.mrb[10].mxu1  ;;  %v1653_v12 = vpop.f32.mrb[11].mxu0 }
 0x10e   : > { %1287 = vst [vmem:[%s2197_s18 + $0x18] sm:$0xff] %v2211_v9  ;;  %v1654_v13 = vadd.f32 %v1653_v12, %v1652_v8  ;;  %v1765_v14 = vpop.f32.mrb[11].mxu1 }
 0x10f   : > { %v1078_v15 = vadd.f32 %v1763_v10, %v1651_v6  ;;  %v1766_v16 = vadd.f32 %v1765_v14, %v1764_v11 }
 0x111   : > { %vm1192_vm4 = vcmp.ge.f32.partialorder %v1078_v15, 0.0  ;;  %v1224_v17 = vmul.f32 0.01, %v1078_v15  ;;  %v1081_v18 = vadd.f32 %v1766_v16, %v1654_v13 }
 0x112   : > { %v1655_v19 = vpop.f32.mrb[12].mxu0 }
 0x113   : > { %v1256_v20 = vsel %vm1192_vm4, %v1078_v15, %v1224_v17  ;;  %vm1193_vm5 = vcmp.ge.f32.partialorder %v1081_v18, 0.0  ;;  %v1225_v21 = vmul.f32 0.01, %v1081_v18  ;;  %v1767_v22 = vpop.f32.mrb[12].mxu1  ;;  %v1656_v23 = vpop.f32.mrb[13].mxu0 }
 0x114   : > { %1288 = vst [vmem:[%s2197_s18 + $0x20] sm:$0xff] %v1256_v20  ;;  %v1316_v24 = vmin.f32 %v2199_v48, %v1256_v20  ;;  %v1354_v25 = vmax.f32 %v2199_v48, %v1256_v20  ;;  %v1657_v26 = vadd.f32 %v1656_v23, %v1655_v19  ;;  %v1768_v27 = vpop.f32.mrb[13].mxu1  ;;  %v1658_v28 = vpop.f32.mrb[14].mxu0 }
 0x115   : > { %v1257_v29 = vsel %vm1193_vm5, %v1081_v18, %v1225_v21  ;;  %v1769_v30 = vadd.f32 %v1768_v27, %v1767_v22  ;;  %v1770_v31 = vpop.f32.mrb[14].mxu1  ;;  %v1659_v32 = vpop.f32.mrb[15].mxu0 }
 0x116   : > { %1289 = vst [vmem:[%s2197_s18 + $0x28] sm:$0xff] %v1257_v29  ;;  %v1317_v33 = vmin.f32 %v2203_v55, %v1257_v29  ;;  %v1355_v34 = vmax.f32 %v2203_v55, %v1257_v29  ;;  %v1660_v35 = vadd.f32 %v1659_v32, %v1658_v28  ;;  %v1771_v36 = vpop.f32.mrb[15].mxu1 }
 0x117   : > { %v1086_v37 = vadd.f32 %v1769_v30, %v1657_v26  ;;  %v1772_v38 = vadd.f32 %v1771_v36, %v1770_v31 }
 0x119   : > { %vm1194_vm6 = vcmp.ge.f32.partialorder %v1086_v37, 0.0  ;;  %v1226_v39 = vmul.f32 0.01, %v1086_v37  ;;  %v1089_v40 = vadd.f32 %v1772_v38, %v1660_v35 }
 0x11a   : > { %v1661_v41 = vpop.f32.mrb[16].mxu0 }
 0x11b   : > { %v1258_v42 = vsel %vm1194_vm6, %v1086_v37, %v1226_v39  ;;  %vm1195_vm7 = vcmp.ge.f32.partialorder %v1089_v40, 0.0  ;;  %v1227_v43 = vmul.f32 0.01, %v1089_v40  ;;  %v1773_v44 = vpop.f32.mrb[16].mxu1  ;;  %v1662_v45 = vpop.f32.mrb[17].mxu0 }
 0x11c   : > { %1290 = vst [vmem:[%s2197_s18 + $0x30] sm:$0xff] %v1258_v42  ;;  %v1318_v46 = vmin.f32 %v2207_v2, %v1258_v42  ;;  %v1356_v47 = vmax.f32 %v2207_v2, %v1258_v42  ;;  %v1663_v48 = vadd.f32 %v1662_v45, %v1661_v41  ;;  %v1774_v49 = vpop.f32.mrb[17].mxu1  ;;  %v1664_v50 = vpop.f32.mrb[18].mxu0 }
 0x11d   : > { %v1259_v51 = vsel %vm1195_vm7, %v1089_v40, %v1227_v43  ;;  %v1775_v52 = vadd.f32 %v1774_v49, %v1773_v44  ;;  %v1776_v53 = vpop.f32.mrb[18].mxu1  ;;  %v1665_v54 = vpop.f32.mrb[19].mxu0 }
 0x11e   : > { %1291 = vst [vmem:[%s2197_s18 + $0x38] sm:$0xff] %v1259_v51  ;;  %v1319_v55 = vmin.f32 %v2211_v9, %v1259_v51  ;;  %v1357_v56 = vmax.f32 %v2211_v9, %v1259_v51  ;;  %v1666_v57 = vadd.f32 %v1665_v54, %v1664_v50  ;;  %v1777_v58 = vpop.f32.mrb[19].mxu1 }
 0x11f   : > { %v1094_v59 = vadd.f32 %v1775_v52, %v1663_v48  ;;  %v1778_v60 = vadd.f32 %v1777_v58, %v1776_v53 }
 0x121   : > { %vm1196_vm8 = vcmp.ge.f32.partialorder %v1094_v59, 0.0  ;;  %v1228_v61 = vmul.f32 0.01, %v1094_v59  ;;  %v1097_v62 = vadd.f32 %v1778_v60, %v1666_v57 }
 0x122   : > { %v1667_v63 = vpop.f32.mrb[20].mxu0 }
 0x123   : > { %v1260_v0 = vsel %vm1196_vm8, %v1094_v59, %v1228_v61  ;;  %vm1197_vm9 = vcmp.ge.f32.partialorder %v1097_v62, 0.0  ;;  %v1229_v1 = vmul.f32 0.01, %v1097_v62  ;;  %v1779_v2 = vpop.f32.mrb[20].mxu1  ;;  %v1668_v3 = vpop.f32.mrb[21].mxu0 }
 0x124   : > { %1292 = vst [vmem:[%s2197_s18 + $0x40] sm:$0xff] %v1260_v0  ;;  %v2228_v4 = vmin.f32 %v1316_v24, %v1260_v0  ;;  %v2230_v5 = vmax.f32 %v1354_v25, %v1260_v0  ;;  %v1669_v6 = vadd.f32 %v1668_v3, %v1667_v63  ;;  %v1780_v7 = vpop.f32.mrb[21].mxu1  ;;  %v1670_v8 = vpop.f32.mrb[22].mxu0 }
 0x125   : > { %v1261_v9 = vsel %vm1197_vm9, %v1097_v62, %v1229_v1  ;;  %v1781_v10 = vadd.f32 %v1780_v7, %v1779_v2  ;;  %v1782_v11 = vpop.f32.mrb[22].mxu1  ;;  %v1671_v12 = vpop.f32.mrb[23].mxu0 }
 0x126   : > { %1293 = vst [vmem:[%s2197_s18 + $0x48] sm:$0xff] %v1261_v9  ;;  %v2233_v13 = vmin.f32 %v1317_v33, %v1261_v9  ;;  %v2235_v14 = vmax.f32 %v1355_v34, %v1261_v9  ;;  %v1672_v15 = vadd.f32 %v1671_v12, %v1670_v8  ;;  %v1783_v16 = vpop.f32.mrb[23].mxu1 }
 0x127   : > { %v1102_v17 = vadd.f32 %v1781_v10, %v1669_v6  ;;  %v1784_v18 = vadd.f32 %v1783_v16, %v1782_v11 }
 0x129   : > { %vm1198_vm10 = vcmp.ge.f32.partialorder %v1102_v17, 0.0  ;;  %v1230_v19 = vmul.f32 0.01, %v1102_v17  ;;  %v1105_v20 = vadd.f32 %v1784_v18, %v1672_v15 }
 0x12a   : > { %v1673_v21 = vpop.f32.mrb[24].mxu0 }
 0x12b   : > { %v1262_v22 = vsel %vm1198_vm10, %v1102_v17, %v1230_v19  ;;  %vm1199_vm11 = vcmp.ge.f32.partialorder %v1105_v20, 0.0  ;;  %v1231_v23 = vmul.f32 0.01, %v1105_v20  ;;  %v1785_v24 = vpop.f32.mrb[24].mxu1  ;;  %v1674_v25 = vpop.f32.mrb[25].mxu0 }
 0x12c   : > { %1294 = vst [vmem:[%s2197_s18 + $0x50] sm:$0xff] %v1262_v22  ;;  %v2238_v26 = vmin.f32 %v1318_v46, %v1262_v22  ;;  %v2240_v27 = vmax.f32 %v1356_v47, %v1262_v22  ;;  %v1675_v28 = vadd.f32 %v1674_v25, %v1673_v21  ;;  %v1786_v29 = vpop.f32.mrb[25].mxu1  ;;  %v1676_v30 = vpop.f32.mrb[26].mxu0 }
 0x12d   : > { %v1263_v31 = vsel %vm1199_vm11, %v1105_v20, %v1231_v23  ;;  %v1787_v32 = vadd.f32 %v1786_v29, %v1785_v24  ;;  %v1788_v33 = vpop.f32.mrb[26].mxu1  ;;  %v1677_v34 = vpop.f32.mrb[27].mxu0 }
 0x12e   : > { %1295 = vst [vmem:[%s2197_s18 + $0x58] sm:$0xff] %v1263_v31  ;;  %v2243_v35 = vmin.f32 %v1319_v55, %v1263_v31  ;;  %v2245_v36 = vmax.f32 %v1357_v56, %v1263_v31  ;;  %v1678_v37 = vadd.f32 %v1677_v34, %v1676_v30  ;;  %v1789_v38 = vpop.f32.mrb[27].mxu1 }
 0x12f   : > { %v1110_v39 = vadd.f32 %v1787_v32, %v1675_v28  ;;  %v1790_v40 = vadd.f32 %v1789_v38, %v1788_v33 }
 0x131   : > { %vm1200_vm12 = vcmp.ge.f32.partialorder %v1110_v39, 0.0  ;;  %v1232_v41 = vmul.f32 0.01, %v1110_v39  ;;  %v1113_v42 = vadd.f32 %v1790_v40, %v1678_v37 }
 0x132   : > { %v1679_v43 = vpop.f32.mrb[28].mxu0 }
 0x133   : > { %v1264_v44 = vsel %vm1200_vm12, %v1110_v39, %v1232_v41  ;;  %vm1201_vm13 = vcmp.ge.f32.partialorder %v1113_v42, 0.0  ;;  %v1233_v45 = vmul.f32 0.01, %v1113_v42  ;;  %v1791_v46 = vpop.f32.mrb[28].mxu1  ;;  %v1680_v47 = vpop.f32.mrb[29].mxu0 }
 0x134   : > { %1296 = vst [vmem:[%s2197_s18 + $0x60] sm:$0xff] %v1264_v44  ;;  %v1324_v48 = vmin.f32 %v2228_v4, %v1264_v44  ;;  %v1362_v49 = vmax.f32 %v2230_v5, %v1264_v44  ;;  %v1681_v50 = vadd.f32 %v1680_v47, %v1679_v43  ;;  %v1792_v51 = vpop.f32.mrb[29].mxu1  ;;  %v1682_v52 = vpop.f32.mrb[30].mxu0 }
 0x135   : > { %v1265_v53 = vsel %vm1201_vm13, %v1113_v42, %v1233_v45  ;;  %v1793_v54 = vadd.f32 %v1792_v51, %v1791_v46  ;;  %v1794_v55 = vpop.f32.mrb[30].mxu1  ;;  %v1683_v56 = vpop.f32.mrb[31].mxu0 }
 0x136   : > { %1297 = vst [vmem:[%s2197_s18 + $0x68] sm:$0xff] %v1265_v53  ;;  %v1325_v57 = vmin.f32 %v2233_v13, %v1265_v53  ;;  %v1363_v58 = vmax.f32 %v2235_v14, %v1265_v53  ;;  %v1684_v59 = vadd.f32 %v1683_v56, %v1682_v52  ;;  %v1795_v60 = vpop.f32.mrb[31].mxu1 }
 0x137   : > { %v1118_v61 = vadd.f32 %v1793_v54, %v1681_v50  ;;  %v1796_v62 = vadd.f32 %v1795_v60, %v1794_v55 }
 0x139   : > { %vm1202_vm14 = vcmp.ge.f32.partialorder %v1118_v61, 0.0  ;;  %v1234_v63 = vmul.f32 0.01, %v1118_v61  ;;  %v1121_v0 = vadd.f32 %v1796_v62, %v1684_v59 }
 0x13a   : > { %v1685_v1 = vpop.f32.mrb[32].mxu0 }
 0x13b   : > { %v1266_v2 = vsel %vm1202_vm14, %v1118_v61, %v1234_v63  ;;  %vm1203_vm15 = vcmp.ge.f32.partialorder %v1121_v0, 0.0  ;;  %v1235_v3 = vmul.f32 0.01, %v1121_v0  ;;  %v1797_v4 = vpop.f32.mrb[32].mxu1  ;;  %v1686_v5 = vpop.f32.mrb[33].mxu0 }
 0x13c   : > { %1298 = vst [vmem:[%s2197_s18 + $0x70] sm:$0xff] %v1266_v2  ;;  %v1326_v6 = vmin.f32 %v2238_v26, %v1266_v2  ;;  %v1364_v7 = vmax.f32 %v2240_v27, %v1266_v2  ;;  %v1687_v8 = vadd.f32 %v1686_v5, %v1685_v1  ;;  %v1798_v9 = vpop.f32.mrb[33].mxu1  ;;  %v1688_v10 = vpop.f32.mrb[34].mxu0 }
 0x13d   : > { %v1267_v11 = vsel %vm1203_vm15, %v1121_v0, %v1235_v3  ;;  %v1799_v12 = vadd.f32 %v1798_v9, %v1797_v4  ;;  %v1800_v13 = vpop.f32.mrb[34].mxu1  ;;  %v1689_v14 = vpop.f32.mrb[35].mxu0 }
 0x13e   : > { %1299 = vst [vmem:[%s2197_s18 + $0x78] sm:$0xff] %v1267_v11  ;;  %v1327_v15 = vmin.f32 %v2243_v35, %v1267_v11  ;;  %v1365_v16 = vmax.f32 %v2245_v36, %v1267_v11  ;;  %v1690_v17 = vadd.f32 %v1689_v14, %v1688_v10  ;;  %v1801_v18 = vpop.f32.mrb[35].mxu1 }
 0x13f   : > { %v1126_v19 = vadd.f32 %v1799_v12, %v1687_v8  ;;  %v1802_v20 = vadd.f32 %v1801_v18, %v1800_v13 }
 0x141   : > { %vm1204_vm0 = vcmp.ge.f32.partialorder %v1126_v19, 0.0  ;;  %v1236_v21 = vmul.f32 0.01, %v1126_v19  ;;  %v1129_v22 = vadd.f32 %v1802_v20, %v1690_v17 }
 0x142   : > { %v1691_v23 = vpop.f32.mrb[36].mxu0 }
 0x143   : > { %v1268_v24 = vsel %vm1204_vm0, %v1126_v19, %v1236_v21  ;;  %vm1205_vm1 = vcmp.ge.f32.partialorder %v1129_v22, 0.0  ;;  %v1237_v25 = vmul.f32 0.01, %v1129_v22  ;;  %v1803_v26 = vpop.f32.mrb[36].mxu1  ;;  %v1692_v27 = vpop.f32.mrb[37].mxu0 }
 0x144   : > { %1300 = vst [vmem:[%s2197_s18 + $0x80] sm:$0xff] %v1268_v24  ;;  %v2260_v28 = vmin.f32 %v1324_v48, %v1268_v24  ;;  %v2262_v29 = vmax.f32 %v1362_v49, %v1268_v24  ;;  %v1693_v30 = vadd.f32 %v1692_v27, %v1691_v23  ;;  %v1804_v31 = vpop.f32.mrb[37].mxu1  ;;  %v1694_v32 = vpop.f32.mrb[38].mxu0 }
 0x145   : > { %v1269_v33 = vsel %vm1205_vm1, %v1129_v22, %v1237_v25  ;;  %v1805_v34 = vadd.f32 %v1804_v31, %v1803_v26  ;;  %v1806_v35 = vpop.f32.mrb[38].mxu1  ;;  %v1695_v36 = vpop.f32.mrb[39].mxu0 }
 0x146   : > { %1301 = vst [vmem:[%s2197_s18 + $0x88] sm:$0xff] %v1269_v33  ;;  %v2265_v37 = vmin.f32 %v1325_v57, %v1269_v33  ;;  %v2267_v38 = vmax.f32 %v1363_v58, %v1269_v33  ;;  %v1696_v39 = vadd.f32 %v1695_v36, %v1694_v32  ;;  %v1807_v40 = vpop.f32.mrb[39].mxu1 }
 0x147   : > { %v1134_v41 = vadd.f32 %v1805_v34, %v1693_v30  ;;  %v1808_v42 = vadd.f32 %v1807_v40, %v1806_v35 }
 0x149   : > { %vm1206_vm2 = vcmp.ge.f32.partialorder %v1134_v41, 0.0  ;;  %v1238_v43 = vmul.f32 0.01, %v1134_v41  ;;  %v1137_v44 = vadd.f32 %v1808_v42, %v1696_v39 }
 0x14a   : > { %v1697_v45 = vpop.f32.mrb[40].mxu0 }
 0x14b   : > { %v1270_v46 = vsel %vm1206_vm2, %v1134_v41, %v1238_v43  ;;  %vm1207_vm3 = vcmp.ge.f32.partialorder %v1137_v44, 0.0  ;;  %v1239_v47 = vmul.f32 0.01, %v1137_v44  ;;  %v1809_v48 = vpop.f32.mrb[40].mxu1  ;;  %v1698_v49 = vpop.f32.mrb[41].mxu0 }
 0x14c   : > { %1302 = vst [vmem:[%s2197_s18 + $0x90] sm:$0xff] %v1270_v46  ;;  %v2270_v50 = vmin.f32 %v1326_v6, %v1270_v46  ;;  %v2272_v51 = vmax.f32 %v1364_v7, %v1270_v46  ;;  %v1699_v52 = vadd.f32 %v1698_v49, %v1697_v45  ;;  %v1810_v53 = vpop.f32.mrb[41].mxu1  ;;  %v1700_v54 = vpop.f32.mrb[42].mxu0 }
 0x14d   : > { %v1271_v55 = vsel %vm1207_vm3, %v1137_v44, %v1239_v47  ;;  %v1811_v56 = vadd.f32 %v1810_v53, %v1809_v48  ;;  %v1812_v57 = vpop.f32.mrb[42].mxu1  ;;  %v1701_v58 = vpop.f32.mrb[43].mxu0 }
 0x14e   : > { %1303 = vst [vmem:[%s2197_s18 + $0x98] sm:$0xff] %v1271_v55  ;;  %v2275_v59 = vmin.f32 %v1327_v15, %v1271_v55  ;;  %v2277_v60 = vmax.f32 %v1365_v16, %v1271_v55  ;;  %v1702_v61 = vadd.f32 %v1701_v58, %v1700_v54  ;;  %v1813_v62 = vpop.f32.mrb[43].mxu1 }
 0x14f   : > { %v1142_v63 = vadd.f32 %v1811_v56, %v1699_v52  ;;  %v1814_v0 = vadd.f32 %v1813_v62, %v1812_v57 }
 0x151   : > { %vm1208_vm4 = vcmp.ge.f32.partialorder %v1142_v63, 0.0  ;;  %v1240_v1 = vmul.f32 0.01, %v1142_v63  ;;  %v1145_v2 = vadd.f32 %v1814_v0, %v1702_v61 }
 0x152   : > { %v1703_v3 = vpop.f32.mrb[44].mxu0 }
 0x153   : > { %v1272_v4 = vsel %vm1208_vm4, %v1142_v63, %v1240_v1  ;;  %vm1209_vm5 = vcmp.ge.f32.partialorder %v1145_v2, 0.0  ;;  %v1241_v5 = vmul.f32 0.01, %v1145_v2  ;;  %v1815_v6 = vpop.f32.mrb[44].mxu1  ;;  %v1704_v7 = vpop.f32.mrb[45].mxu0 }
 0x154   : > { %1304 = vst [vmem:[%s2197_s18 + $0xa0] sm:$0xff] %v1272_v4  ;;  %v1332_v8 = vmin.f32 %v2260_v28, %v1272_v4  ;;  %v1370_v9 = vmax.f32 %v2262_v29, %v1272_v4  ;;  %v1705_v10 = vadd.f32 %v1704_v7, %v1703_v3  ;;  %v1816_v11 = vpop.f32.mrb[45].mxu1  ;;  %v1706_v12 = vpop.f32.mrb[46].mxu0 }
 0x155   : > { %v1273_v13 = vsel %vm1209_vm5, %v1145_v2, %v1241_v5  ;;  %v1817_v14 = vadd.f32 %v1816_v11, %v1815_v6  ;;  %v1818_v15 = vpop.f32.mrb[46].mxu1  ;;  %v1707_v16 = vpop.f32.mrb[47].mxu0 }
 0x156   : > { %1305 = vst [vmem:[%s2197_s18 + $0xa8] sm:$0xff] %v1273_v13  ;;  %v1333_v17 = vmin.f32 %v2265_v37, %v1273_v13  ;;  %v1371_v18 = vmax.f32 %v2267_v38, %v1273_v13  ;;  %v1708_v19 = vadd.f32 %v1707_v16, %v1706_v12  ;;  %v1819_v20 = vpop.f32.mrb[47].mxu1 }
 0x157   : > { %v1150_v21 = vadd.f32 %v1817_v14, %v1705_v10  ;;  %v1820_v22 = vadd.f32 %v1819_v20, %v1818_v15 }
 0x159   : > { %vm1210_vm6 = vcmp.ge.f32.partialorder %v1150_v21, 0.0  ;;  %v1242_v23 = vmul.f32 0.01, %v1150_v21  ;;  %v1153_v24 = vadd.f32 %v1820_v22, %v1708_v19 }
 0x15a   : > { %v1709_v25 = vpop.f32.mrb[48].mxu0 }
 0x15b   : > { %v1274_v26 = vsel %vm1210_vm6, %v1150_v21, %v1242_v23  ;;  %vm1211_vm7 = vcmp.ge.f32.partialorder %v1153_v24, 0.0  ;;  %v1243_v27 = vmul.f32 0.01, %v1153_v24  ;;  %v1821_v28 = vpop.f32.mrb[48].mxu1  ;;  %v1710_v29 = vpop.f32.mrb[49].mxu0 }
 0x15c   : > { %1306 = vst [vmem:[%s2197_s18 + $0xb0] sm:$0xff] %v1274_v26  ;;  %v1334_v30 = vmin.f32 %v2270_v50, %v1274_v26  ;;  %v1372_v31 = vmax.f32 %v2272_v51, %v1274_v26  ;;  %v1711_v32 = vadd.f32 %v1710_v29, %v1709_v25  ;;  %v1822_v33 = vpop.f32.mrb[49].mxu1  ;;  %v1712_v34 = vpop.f32.mrb[50].mxu0 }
 0x15d   : > { %v1275_v35 = vsel %vm1211_vm7, %v1153_v24, %v1243_v27  ;;  %v1823_v36 = vadd.f32 %v1822_v33, %v1821_v28  ;;  %v1824_v37 = vpop.f32.mrb[50].mxu1  ;;  %v1713_v38 = vpop.f32.mrb[51].mxu0 }
 0x15e   : > { %1307 = vst [vmem:[%s2197_s18 + $0xb8] sm:$0xff] %v1275_v35  ;;  %v1335_v39 = vmin.f32 %v2275_v59, %v1275_v35  ;;  %v1373_v40 = vmax.f32 %v2277_v60, %v1275_v35  ;;  %v1714_v41 = vadd.f32 %v1713_v38, %v1712_v34  ;;  %v1825_v42 = vpop.f32.mrb[51].mxu1 }
 0x15f   : > { %v1158_v43 = vadd.f32 %v1823_v36, %v1711_v32  ;;  %v1826_v44 = vadd.f32 %v1825_v42, %v1824_v37 }
 0x161   : > { %vm1212_vm8 = vcmp.ge.f32.partialorder %v1158_v43, 0.0  ;;  %v1244_v45 = vmul.f32 0.01, %v1158_v43  ;;  %v1161_v46 = vadd.f32 %v1826_v44, %v1714_v41 }
 0x162   : > { %v1715_v47 = vpop.f32.mrb[52].mxu0 }
 0x163   : > { %v1276_v48 = vsel %vm1212_vm8, %v1158_v43, %v1244_v45  ;;  %vm1213_vm9 = vcmp.ge.f32.partialorder %v1161_v46, 0.0  ;;  %v1245_v49 = vmul.f32 0.01, %v1161_v46  ;;  %v1827_v50 = vpop.f32.mrb[52].mxu1  ;;  %v1716_v51 = vpop.f32.mrb[53].mxu0 }
 0x164   : > { %1308 = vst [vmem:[%s2197_s18 + $0xc0] sm:$0xff] %v1276_v48  ;;  %v2292_v52 = vmin.f32 %v1332_v8, %v1276_v48  ;;  %v2294_v53 = vmax.f32 %v1370_v9, %v1276_v48  ;;  %v1717_v54 = vadd.f32 %v1716_v51, %v1715_v47  ;;  %v1828_v55 = vpop.f32.mrb[53].mxu1  ;;  %v1718_v56 = vpop.f32.mrb[54].mxu0 }
 0x165   : > { %v1277_v57 = vsel %vm1213_vm9, %v1161_v46, %v1245_v49  ;;  %v1829_v58 = vadd.f32 %v1828_v55, %v1827_v50  ;;  %v1830_v59 = vpop.f32.mrb[54].mxu1  ;;  %v1719_v60 = vpop.f32.mrb[55].mxu0 }
 0x166   : > { %1309 = vst [vmem:[%s2197_s18 + $0xc8] sm:$0xff] %v1277_v57  ;;  %v1337_v61 = vmin.f32 %v1333_v17, %v1277_v57  ;;  %v1375_v62 = vmax.f32 %v1371_v18, %v1277_v57  ;;  %v1720_v63 = vadd.f32 %v1719_v60, %v1718_v56  ;;  %v1831_v0 = vpop.f32.mrb[55].mxu1 }
 0x167   : > { %v1166_v1 = vadd.f32 %v1829_v58, %v1717_v54  ;;  %v1832_v2 = vadd.f32 %v1831_v0, %v1830_v59 }
 0x169   : > { %vm1214_vm10 = vcmp.ge.f32.partialorder %v1166_v1, 0.0  ;;  %v1246_v3 = vmul.f32 0.01, %v1166_v1  ;;  %v1169_v4 = vadd.f32 %v1832_v2, %v1720_v63 }
 0x16a   : > { %v1721_v5 = vpop.f32.mrb[56].mxu0 }
 0x16b   : > { %v1278_v6 = vsel %vm1214_vm10, %v1166_v1, %v1246_v3  ;;  %vm1215_vm11 = vcmp.ge.f32.partialorder %v1169_v4, 0.0  ;;  %v1247_v7 = vmul.f32 0.01, %v1169_v4  ;;  %v1833_v8 = vpop.f32.mrb[56].mxu1  ;;  %v1722_v9 = vpop.f32.mrb[57].mxu0 }
 0x16c   : > { %1310 = vst [vmem:[%s2197_s18 + $0xd0] sm:$0xff] %v1278_v6  ;;  %v1338_v10 = vmin.f32 %v1334_v30, %v1278_v6  ;;  %v1376_v11 = vmax.f32 %v1372_v31, %v1278_v6  ;;  %v1723_v12 = vadd.f32 %v1722_v9, %v1721_v5  ;;  %v1834_v13 = vpop.f32.mrb[57].mxu1  ;;  %v1724_v14 = vpop.f32.mrb[58].mxu0 }
 0x16d   : > { %v1279_v15 = vsel %vm1215_vm11, %v1169_v4, %v1247_v7  ;;  %v1835_v16 = vadd.f32 %v1834_v13, %v1833_v8  ;;  %v1836_v17 = vpop.f32.mrb[58].mxu1  ;;  %v1725_v18 = vpop.f32.mrb[59].mxu0 }
 0x16e   : > { %1311 = vst [vmem:[%s2197_s18 + $0xd8] sm:$0xff] %v1279_v15  ;;  %v1339_v19 = vmin.f32 %v1335_v39, %v1279_v15  ;;  %v1377_v20 = vmax.f32 %v1373_v40, %v1279_v15  ;;  %v1726_v21 = vadd.f32 %v1725_v18, %v1724_v14  ;;  %v1837_v22 = vpop.f32.mrb[59].mxu1 }
 0x16f   : > { %v1174_v23 = vadd.f32 %v1835_v16, %v1723_v12  ;;  %v1838_v24 = vadd.f32 %v1837_v22, %v1836_v17 }
 0x171   : > { %vm1216_vm12 = vcmp.ge.f32.partialorder %v1174_v23, 0.0  ;;  %v1248_v25 = vmul.f32 0.01, %v1174_v23  ;;  %v1177_v26 = vadd.f32 %v1838_v24, %v1726_v21 }
 0x172   : > { %v1727_v27 = vpop.f32.mrb[60].mxu0 }
 0x173   : > { %v1280_v28 = vsel %vm1216_vm12, %v1174_v23, %v1248_v25  ;;  %vm1217_vm13 = vcmp.ge.f32.partialorder %v1177_v26, 0.0  ;;  %v1249_v29 = vmul.f32 0.01, %v1177_v26  ;;  %v1839_v30 = vpop.f32.mrb[60].mxu1  ;;  %v1728_v31 = vpop.f32.mrb[61].mxu0 }
 0x174   : > { %1312 = vst [vmem:[%s2197_s18 + $0xe0] sm:$0xff] %v1280_v28  ;;  %v1340_v32 = vmin.f32 %v2292_v52, %v1280_v28  ;;  %v1378_v33 = vmax.f32 %v2294_v53, %v1280_v28  ;;  %v1729_v34 = vadd.f32 %v1728_v31, %v1727_v27  ;;  %v1840_v35 = vpop.f32.mrb[61].mxu1  ;;  %v1730_v36 = vpop.f32.mrb[62].mxu0 }
 0x175   : > { %v1281_v37 = vsel %vm1217_vm13, %v1177_v26, %v1249_v29  ;;  %v1841_v38 = vadd.f32 %v1840_v35, %v1839_v30  ;;  %v1842_v39 = vpop.f32.mrb[62].mxu1  ;;  %v1731_v40 = vpop.f32.mrb[63].mxu0 }
 0x176   : > { %1313 = vst [vmem:[%s2197_s18 + $0xe8] sm:$0xff] %v1281_v37  ;;  %v1341_v41 = vmin.f32 %v1337_v61, %v1281_v37  ;;  %v1379_v42 = vmax.f32 %v1375_v62, %v1281_v37  ;;  %v1732_v43 = vadd.f32 %v1731_v40, %v1730_v36  ;;  %v1843_v44 = vpop.f32.mrb[63].mxu1 }
 0x177   : > { %v1182_v45 = vadd.f32 %v1841_v38, %v1729_v34  ;;  %v1844_v46 = vadd.f32 %v1843_v44, %v1842_v39 }
 0x178   : > { %v1344_v47 = vmin.f32 %v1340_v32, %v1341_v41  ;;  %v1382_v48 = vmax.f32 %v1378_v33, %v1379_v42 }
 0x179   : > { %vm1218_vm14 = vcmp.ge.f32.partialorder %v1182_v45, 0.0  ;;  %v1250_v49 = vmul.f32 0.01, %v1182_v45  ;;  %v1185_v50 = vadd.f32 %v1844_v46, %v1732_v43 }
 0x17b   : > { %v1282_v51 = vsel %vm1218_vm14, %v1182_v45, %v1250_v49  ;;  %vm1219_vm15 = vcmp.ge.f32.partialorder %v1185_v50, 0.0  ;;  %v1251_v52 = vmul.f32 0.01, %v1185_v50 }
 0x17c   : > { %1314 = vst [vmem:[%s2197_s18 + $0xf0] sm:$0xff] %v1282_v51  ;;  %v1342_v53 = vmin.f32 %v1338_v10, %v1282_v51  ;;  %v1380_v54 = vmax.f32 %v1376_v11, %v1282_v51 }
 0x17d   : > { %v1283_v55 = vsel %vm1219_vm15, %v1185_v50, %v1251_v52 }
 0x17e   : > { %1315 = vst [vmem:[%s2197_s18 + $0xf8] sm:$0xff] %v1283_v55  ;;  %v1343_v56 = vmin.f32 %v1339_v19, %v1283_v55  ;;  %v1381_v57 = vmax.f32 %v1377_v20, %v1283_v55 }
 0x180   : > { %v1345_v58 = vmin.f32 %v1342_v53, %v1343_v56  ;;  %v1383_v59 = vmax.f32 %v1380_v54, %v1381_v57 }
 0x182   : > { %v1346_v60 = vmin.f32 %v1344_v47, %v1345_v58  ;;  %v1384_v61 = vmax.f32 %v1382_v48, %v1383_v59 }
 0x184   : > { %v1347_v62 = vrot.slane %v1346_v60, 4  ;;  %v1385_v63 = vrot.slane %v1384_v61, 4 }
 0x186   : > { %v1348_v0 = vmin.f32 %v1346_v60, %v1347_v62  ;;  %v1386_v1 = vmax.f32 %v1384_v61, %v1385_v63 }
 0x188   : > { %v1349_v2 = vrot.slane %v1348_v0, 2  ;;  %v1387_v3 = vrot.slane %v1386_v1, 2 }
 0x18a   : > { %v1350_v4 = vmin.f32 %v1348_v0, %v1349_v2  ;;  %v1388_v5 = vmax.f32 %v1386_v1, %v1387_v3 }
 0x18c   : > { %v1351_v6 = vrot.slane %v1350_v4, 1  ;;  %v1389_v7 = vrot.slane %v1388_v5, 1 }
 0x18e   : > { %v1352_v8 = vmin.f32 %v1350_v4, %v1351_v6  ;;  %v1390_v9 = vmax.f32 %v1388_v5, %v1389_v7 }
 0x190   : > { %1353 = vst [vmem:[%s220_s21] sm:$0xff] %v1352_v8  ;;  %1391 = vst [vmem:[%s224_s24] sm:$0xff] %v1390_v9 }
 0x191 PF: > { %s15_s15 = sadd.s32 1, %s1987_s15  }
 0x192   : > { %p12_p5 = scmp.ge.s32.totalorder %s15_s15, 4  }
 0x194   :  { %14 = sbr.rel (!%p12_p5) target bundleno = 1 (0x1), region = 82 }

// kernel: gae_forward.15
= control target key start
LH: loop header
LB: loop body
LE: loop exit
PB: predicated region body
PF: predicated region fallthrough
CT: control target
= control target key end

     0   :  { %10 = vsyncpa [#allocation3], 0  ;;  %s2837_s0 = inlined_call_operand.vmem [shape: bf16[512,512], index: 0, kind: input, shape index: {}]   ;;  %s2838_s1 = inlined_call_operand.vmem [shape: bf16[512,128], index: 1, kind: input, shape index: {}]   ;;  %s2839_s2 = inlined_call_operand.vmem [shape: f32[512,128], index: 2, kind: output, shape index: {0}]   ;;  %s2840_s3 = inlined_call_operand.hbm [shape: f32[16,128], index: 3, kind: output, shape index: {1}]   ;;  %s2841_s4 = inlined_call_operand.hbm [shape: f32[16,128], index: 4, kind: output, shape index: {2}]  }
   0x1   :  { %12 = vsyncpa [#allocation3 + $0x1], 0 }
   0x2   :  { %13 = vsyncpa [#allocation5], 0 }
   0x3   :  { %15 = vsyncpa [#allocation5 + $0x1], 0  ;;  %s2438_s15 = smov 0   ;;  %s2440_s16 = smov 0  }
   0x4   :  { %s2442_s17 = smov 0   ;;  %s2444_s18 = smov 0  }
   0x5 LB: > { %s2459_s19 = sadd.s32 4294967295, %s2409_s18   ;;  %s1645_s20 = sadd.s32 4294967294, %s2409_s18   ;;  %s2409_s18 = sphi %s2444_s18, %s2847_s18   ;;  %s2405_s17 = sphi %s2442_s17, %s2846_s17   ;;  %s2401_s16 = sphi %s2440_s16, %s2845_s16   ;;  %s2397_s15 = sphi %s2438_s15, %s2844_s15  }
   0x6   : > { %s2463_s21 = sadd.s32 1, %s2409_s18   ;;  %s101_s22 = sadd.s32 1, %s2405_s17 }
   0x7   : > { %s98_s23 = ssub.s32 %s2409_s18, %s2463_s21  ;;  %p111_p0 = scmp.ne.s32.totalorder %s2405_s17, %s2401_s16 }
   0x8   : > { %p99_p1 = scmp.eq.s32.totalorder %s98_s23, 0  ;;  %p112_p2 = scmp.eq.s32.totalorder %s2459_s19, 1 }
   0x9   : > { %p117_p3 = scmp.ne.s32.totalorder %s2401_s16, %s2397_s15  ;;  %p118_p4 = scmp.eq.s32.totalorder %s1645_s20, 1 }
   0xa   : > { %s2474_s24 = scalar_select %p99_p1, %s2405_s17, %s101_s22  }
   0xb   : > { %p2476_p5 = por %p112_p2, %p111_p0  ;;  %p2480_p6 = por %p118_p4, %p117_p3 }
   0xc   : > { %p1648_p7 = scmp.ge.s32.totalorder %s2409_s18, 1  ;;  %p175_p8 = scmp.lt.s32.totalorder %s2409_s18, 3 }
   0xe   : > { %p176_p9 = pnand %p1648_p7, %p175_p8 }
   0xf   : > { %v2059_v0 = vld [vmem:[%s2838_s1 + $0x40] sm:$0xff] (!%p176_p9)   ;;  %v2063_v4 = vld [vmem:[%s2838_s1 + $0x48] sm:$0xff] (!%p176_p9)   ;;  %v2067_v8 = vld [vmem:[%s2838_s1 + $0x50] sm:$0xff] (!%p176_p9)   ;;  %s1651_s22 = sshll.u32 (!%p176_p9), %s2459_s19, 5  ;;  %s1786_s9 = sshll.u32 (!%p176_p9), %s2459_s19, 7 }
  0x10   : > { %179 = sbr.rel (%p176_p9) target bundleno = 475 (0x1db), region = 28  ;;  %v2060_v1 = vld [vmem:[%s2838_s1 + $0xc0] sm:$0xff] (!%p176_p9)   ;;  %1791 = vmatprep.subr.bf16.mxu0 (!%p176_p9), %v2059_v0  ;;  %v2064_v5 = vld [vmem:[%s2838_s1 + $0xc8] sm:$0xff] (!%p176_p9)   ;;  %v2068_v9 = vld [vmem:[%s2838_s1 + $0xd0] sm:$0xff] (!%p176_p9)   ;;  %p213_p10 = scmp.lt.s32.totalorder (!%p176_p9), %s1651_s22, 63 }
  0x11   : > { %v2061_v2 = vld [vmem:[%s2838_s1] sm:$0xff] (!%p176_p9)   ;;  %1903 = vmatprep.subr.bf16.mxu1 (!%p176_p9), %v2060_v1  ;;  %v2065_v6 = vld [vmem:[%s2838_s1 + $0x8] sm:$0xff] (!%p176_p9)   ;;  %v2069_v10 = vld [vmem:[%s2838_s1 + $0x10] sm:$0xff] (!%p176_p9)   ;;  %s2765_s23 = scalar_lea.hbm (!%p176_p9), %s2840_s3, %s1786_s9  ;;  %s2772_s28 = scalar_lea.hbm (!%p176_p9), %s2841_s4, %s1786_s9 }
  0x12   : > { %v2062_v3 = vld [vmem:[%s2838_s1 + $0x80] sm:$0xff] (!%p176_p9)   ;;  %1792 = vmatpush3.bf16.msra.mxu0 (!%p176_p9), %v2061_v2  ;;  %v2066_v7 = vld [vmem:[%s2838_s1 + $0x88] sm:$0xff] (!%p176_p9)   ;;  %v2070_v11 = vld [vmem:[%s2838_s1 + $0x90] sm:$0xff] (!%p176_p9)   ;;  %s2411_s5 = smov (!%p176_p9), [#allocation2]  }
  0x13   : > { %1904 = vmatpush3.bf16.msra.mxu1 (!%p176_p9), %v2062_v3  ;;  %1793 = vmatprep.subr.bf16.mxu0 (!%p176_p9), %v2063_v4  ;;  %v2071_v12 = vld [vmem:[%s2838_s1 + $0x58] sm:$0xff] (!%p176_p9)   ;;  %v2075_v16 = vld [vmem:[%s2838_s1 + $0x60] sm:$0xff] (!%p176_p9)   ;;  %v2079_v20 = vld [vmem:[%s2838_s1 + $0x68] sm:$0xff] (!%p176_p9)  }
  0x14   : > { %1905 = vmatprep.subr.bf16.mxu1 (!%p176_p9), %v2064_v5  ;;  %v2072_v13 = vld [vmem:[%s2838_s1 + $0xd8] sm:$0xff] (!%p176_p9)   ;;  %v2076_v17 = vld [vmem:[%s2838_s1 + $0xe0] sm:$0xff] (!%p176_p9)   ;;  %v2080_v21 = vld [vmem:[%s2838_s1 + $0xe8] sm:$0xff] (!%p176_p9)  }
  0x15   : > { %v2073_v14 = vld [vmem:[%s2838_s1 + $0x18] sm:$0xff] (!%p176_p9)   ;;  %v2077_v18 = vld [vmem:[%s2838_s1 + $0x20] sm:$0xff] (!%p176_p9)   ;;  %v2081_v22 = vld [vmem:[%s2838_s1 + $0x28] sm:$0xff] (!%p176_p9)  }
  0x16   : > { %1794 = vmatpush3.bf16.msra.mxu0 (!%p176_p9), %v2065_v6  ;;  %v2074_v15 = vld [vmem:[%s2838_s1 + $0x98] sm:$0xff] (!%p176_p9)   ;;  %v2078_v19 = vld [vmem:[%s2838_s1 + $0xa0] sm:$0xff] (!%p176_p9)   ;;  %v2082_v23 = vld [vmem:[%s2838_s1 + $0xa8] sm:$0xff] (!%p176_p9)  }
  0x17   : > { %1906 = vmatpush3.bf16.msra.mxu1 %v2066_v7  ;;  %1795 = vmatprep.subr.bf16.mxu0 %v2067_v8  ;;  %s2849_s22 = smov (!%p213_p10, %s1651_s22), 63  ;;  %v2083_v24 = vld [vmem:[%s2838_s1 + $0x70] sm:$0xff]   ;;  %v2087_v28 = vld [vmem:[%s2838_s1 + $0x78] sm:$0xff]  }
  0x18   : > { %1907 = vmatprep.subr.bf16.mxu1 %v2068_v9  ;;  %v2084_v25 = vld [vmem:[%s2838_s1 + $0xf0] sm:$0xff]   ;;  %s1790_s6 = sshll.u32 %s2849_s22, 4  ;;  %v2088_v29 = vld [vmem:[%s2838_s1 + $0xf8] sm:$0xff]   ;;  %s1655_s30 = sshll.u32 %s2849_s22, 3 }
  0x19   : > { %v2085_v26 = vld [vmem:[%s2838_s1 + $0x30] sm:$0xff]   ;;  %s2583_s20 = scalar_lea.vmem %s2837_s0, %s1790_s6  ;;  %v2089_v30 = vld [vmem:[%s2838_s1 + $0x38] sm:$0xff]   ;;  %s2659_s7 = scalar_lea.vmem %s2839_s2, %s1655_s30 }
  0x1a   : > { %1796 = vmatpush3.bf16.msra.mxu0 %v2069_v10  ;;  %v2086_v27 = vld [vmem:[%s2838_s1 + $0xb0] sm:$0xff]   ;;  %v2090_v31 = vld [vmem:[%s2838_s1 + $0xb8] sm:$0xff]   ;;  %s2752_s22 = sand.u32 1, %s2401_s16   ;;  %s2319_s6 = sshll.u32 %s2411_s5, 4  ;;  %s2320_s6 = int_to_ptr.vmem [resolvable:$false] %s2319_s6 }
  0x1b   : > { %1908 = vmatpush3.bf16.msra.mxu1 %v2070_v11  ;;  %1797 = vmatprep.subr.bf16.mxu0 %v2071_v12  ;;  %v2091_v32 = vld [vmem:[%s2583_s20] ss:$16 sps:$4 sm:$0xff]   ;;  %v2093_v33 = vld [vmem:[%s2583_s20 + $0x4] ss:$16 sps:$4 sm:$0xff]   ;;  %v2094_v34 = vld [vmem:[%s2583_s20 + $0x8] ss:$16 sps:$4 sm:$0xff]  }
  0x1c   : > { %1909 = vmatprep.subr.bf16.mxu1 %v2072_v13  ;;  %v2096_v35 = vld [vmem:[%s2583_s20 + $0xc] ss:$16 sps:$4 sm:$0xff]   ;;  %898 = vmatprep.mubr.bf16.mxu0 %v2093_v33  ;;  %v2097_v36 = vld [vmem:[%s2583_s20 + $0x24] ss:$16 sps:$4 sm:$0xff]   ;;  %v2101_v38 = vld [vmem:[%s2583_s20 + $0x20] ss:$16 sps:$4 sm:$0xff]  }
  0x1d   : > { %1059 = vmatprep.mubr.bf16.mxu1 %v2096_v35  ;;  %v2099_v37 = vld [vmem:[%s2583_s20 + $0x2c] ss:$16 sps:$4 sm:$0xff]   ;;  %v2102_v39 = vld [vmem:[%s2583_s20 + $0x28] ss:$16 sps:$4 sm:$0xff]   ;;  %v2103_v40 = vld [vmem:[%s2583_s20 + $0x44] ss:$16 sps:$4 sm:$0xff]  }
  0x1e   : > { %1798 = vmatpush3.bf16.msra.mxu0 %v2073_v14  ;;  %v2105_v41 = vld [vmem:[%s2583_s20 + $0x4c] ss:$16 sps:$4 sm:$0xff]   ;;  %v2107_v42 = vld [vmem:[%s2583_s20 + $0x40] ss:$16 sps:$4 sm:$0xff]   ;;  %v2108_v43 = vld [vmem:[%s2583_s20 + $0x48] ss:$16 sps:$4 sm:$0xff]  }
  0x1f   : > { %1910 = vmatpush3.bf16.msra.mxu1 %v2074_v15  ;;  %1799 = vmatprep.subr.bf16.mxu0 %v2075_v16  ;;  %v2109_v44 = vld [vmem:[%s2583_s20 + $0x64] ss:$16 sps:$4 sm:$0xff]   ;;  %v2111_v45 = vld [vmem:[%s2583_s20 + $0x6c] ss:$16 sps:$4 sm:$0xff]   ;;  %v2113_v46 = vld [vmem:[%s2583_s20 + $0x60] ss:$16 sps:$4 sm:$0xff]  }
  0x20   : > { %1911 = vmatprep.subr.bf16.mxu1 %v2076_v17  ;;  %v2114_v47 = vld [vmem:[%s2583_s20 + $0x68] ss:$16 sps:$4 sm:$0xff]   ;;  %v2115_v48 = vld [vmem:[%s2583_s20 + $0x84] ss:$16 sps:$4 sm:$0xff]   ;;  %v2117_v49 = vld [vmem:[%s2583_s20 + $0x8c] ss:$16 sps:$4 sm:$0xff]  }
  0x21   : > { %v2119_v50 = vld [vmem:[%s2583_s20 + $0x80] ss:$16 sps:$4 sm:$0xff]   ;;  %v2120_v51 = vld [vmem:[%s2583_s20 + $0x88] ss:$16 sps:$4 sm:$0xff]   ;;  %v2121_v52 = vld [vmem:[%s2583_s20 + $0xa4] ss:$16 sps:$4 sm:$0xff]  }
  0x22   : > { %1800 = vmatpush3.bf16.msra.mxu0 %v2077_v18  ;;  %v2123_v53 = vld [vmem:[%s2583_s20 + $0xac] ss:$16 sps:$4 sm:$0xff]   ;;  %v2125_v54 = vld [vmem:[%s2583_s20 + $0xa0] ss:$16 sps:$4 sm:$0xff]   ;;  %v2126_v55 = vld [vmem:[%s2583_s20 + $0xa8] ss:$16 sps:$4 sm:$0xff]  }
  0x23   : > { %1912 = vmatpush3.bf16.msra.mxu1 %v2078_v19  ;;  %1801 = vmatprep.subr.bf16.mxu0 %v2079_v20  ;;  %v2127_v56 = vld [vmem:[%s2583_s20 + $0xc4] ss:$16 sps:$4 sm:$0xff]   ;;  %v2129_v57 = vld [vmem:[%s2583_s20 + $0xcc] ss:$16 sps:$4 sm:$0xff]   ;;  %v2131_v58 = vld [vmem:[%s2583_s20 + $0xc0] ss:$16 sps:$4 sm:$0xff]  }
  0x24   : > { %1913 = vmatprep.subr.bf16.mxu1 %v2080_v21  ;;  %v2132_v59 = vld [vmem:[%s2583_s20 + $0xc8] ss:$16 sps:$4 sm:$0xff]   ;;  %v2133_v60 = vld [vmem:[%s2583_s20 + $0xe4] ss:$16 sps:$4 sm:$0xff]   ;;  %v2135_v61 = vld [vmem:[%s2583_s20 + $0xec] ss:$16 sps:$4 sm:$0xff]  }
  0x25   : > { %v2137_v62 = vld [vmem:[%s2583_s20 + $0xe0] ss:$16 sps:$4 sm:$0xff]   ;;  %v2138_v63 = vld [vmem:[%s2583_s20 + $0xe8] ss:$16 sps:$4 sm:$0xff]   ;;  %v2139_v0 = vld [vmem:[%s2583_s20 + $0x104] ss:$16 sps:$4 sm:$0xff]  }
  0x26   : > { %1802 = vmatpush3.bf16.msra.mxu0 %v2081_v22  ;;  %v2141_v1 = vld [vmem:[%s2583_s20 + $0x10c] ss:$16 sps:$4 sm:$0xff]   ;;  %v2143_v2 = vld [vmem:[%s2583_s20 + $0x100] ss:$16 sps:$4 sm:$0xff]   ;;  %v2144_v3 = vld [vmem:[%s2583_s20 + $0x108] ss:$16 sps:$4 sm:$0xff]  }
  0x27   : > { %1914 = vmatpush3.bf16.msra.mxu1 %v2082_v23  ;;  %1803 = vmatprep.subr.bf16.mxu0 %v2083_v24  ;;  %v2145_v4 = vld [vmem:[%s2583_s20 + $0x124] ss:$16 sps:$4 sm:$0xff]   ;;  %v2147_v5 = vld [vmem:[%s2583_s20 + $0x12c] ss:$16 sps:$4 sm:$0xff]   ;;  %v2149_v6 = vld [vmem:[%s2583_s20 + $0x120] ss:$16 sps:$4 sm:$0xff]  }
  0x28   : > { %1915 = vmatprep.subr.bf16.mxu1 %v2084_v25  ;;  %v2150_v7 = vld [vmem:[%s2583_s20 + $0x128] ss:$16 sps:$4 sm:$0xff]   ;;  %v2151_v8 = vld [vmem:[%s2583_s20 + $0x144] ss:$16 sps:$4 sm:$0xff]   ;;  %v2153_v9 = vld [vmem:[%s2583_s20 + $0x14c] ss:$16 sps:$4 sm:$0xff]  }
  0x29   : > { %v2155_v10 = vld [vmem:[%s2583_s20 + $0x140] ss:$16 sps:$4 sm:$0xff]   ;;  %v2156_v11 = vld [vmem:[%s2583_s20 + $0x148] ss:$16 sps:$4 sm:$0xff]   ;;  %v2157_v12 = vld [vmem:[%s2583_s20 + $0x164] ss:$16 sps:$4 sm:$0xff]  }
  0x2a   : > { %1804 = vmatpush3.bf16.msra.mxu0 %v2085_v26  ;;  %v2159_v13 = vld [vmem:[%s2583_s20 + $0x16c] ss:$16 sps:$4 sm:$0xff]   ;;  %v2161_v14 = vld [vmem:[%s2583_s20 + $0x160] ss:$16 sps:$4 sm:$0xff]   ;;  %v2162_v15 = vld [vmem:[%s2583_s20 + $0x168] ss:$16 sps:$4 sm:$0xff]  }
  0x2b   : > { %1916 = vmatpush3.bf16.msra.mxu1 %v2086_v27  ;;  %1805 = vmatprep.subr.bf16.mxu0 %v2087_v28  ;;  %v2163_v16 = vld [vmem:[%s2583_s20 + $0x184] ss:$16 sps:$4 sm:$0xff]   ;;  %v2165_v17 = vld [vmem:[%s2583_s20 + $0x18c] ss:$16 sps:$4 sm:$0xff]   ;;  %v2167_v18 = vld [vmem:[%s2583_s20 + $0x180] ss:$16 sps:$4 sm:$0xff]  }
  0x2c   : > { %1917 = vmatprep.subr.bf16.mxu1 %v2088_v29  ;;  %v2168_v19 = vld [vmem:[%s2583_s20 + $0x188] ss:$16 sps:$4 sm:$0xff]   ;;  %v2169_v20 = vld [vmem:[%s2583_s20 + $0x1a4] ss:$16 sps:$4 sm:$0xff]   ;;  %v2171_v21 = vld [vmem:[%s2583_s20 + $0x1ac] ss:$16 sps:$4 sm:$0xff]  }
  0x2d   : > { %v2173_v22 = vld [vmem:[%s2583_s20 + $0x1a0] ss:$16 sps:$4 sm:$0xff]   ;;  %v2174_v23 = vld [vmem:[%s2583_s20 + $0x1a8] ss:$16 sps:$4 sm:$0xff]   ;;  %v2175_v24 = vld [vmem:[%s2583_s20 + $0x1c4] ss:$16 sps:$4 sm:$0xff]  }
  0x2e   : > { %1806 = vmatpush3.bf16.msra.mxu0 %v2089_v30  ;;  %v2177_v25 = vld [vmem:[%s2583_s20 + $0x1cc] ss:$16 sps:$4 sm:$0xff]   ;;  %v2179_v26 = vld [vmem:[%s2583_s20 + $0x1c0] ss:$16 sps:$4 sm:$0xff]   ;;  %v2180_v27 = vld [vmem:[%s2583_s20 + $0x1c8] ss:$16 sps:$4 sm:$0xff]  }
  0x2f   : > { %1918 = vmatpush3.bf16.msra.mxu1 %v2090_v31  ;;  %v2181_v28 = vld [vmem:[%s2583_s20 + $0x1e4] ss:$16 sps:$4 sm:$0xff]   ;;  %v2183_v29 = vld [vmem:[%s2583_s20 + $0x1ec] ss:$16 sps:$4 sm:$0xff]   ;;  %v2185_v30 = vld [vmem:[%s2583_s20 + $0x1e0] ss:$16 sps:$4 sm:$0xff]  }
  0x30   : > { %v2186_v31 = vld [vmem:[%s2583_s20 + $0x1e8] ss:$16 sps:$4 sm:$0xff]   ;;  %s1649_s8 = sshll.u32 %s2752_s22, 3  ;;  %s1494_s29 = scalar_lea.sflag [#allocation3], %s2752_s22 }
  0x31   : > { %899 = vmatmul.mubr.bf16.vlgmr.msra.gmra.mrb[0].mxu0 %v2091_v32  ;;  %s204_s10 = scalar_lea.vmem [#allocation2], %s1649_s8  ;;  %s211_s12 = scalar_lea.vmem [#allocation4], %s1649_s8 }
  0x32   : > { %1060 = vmatmul.mubr.bf16.vlgmr.msra.gmra.mrb[0].mxu1 %v2094_v34  ;;  %906 = vmatprep.mubr.bf16.mxu0 %v2097_v36  ;;  %s1516_s11 = sshll.u32 %s204_s10, 4  ;;  %s1529_s13 = sshll.u32 %s211_s12, 4  ;;  %s2767_s11 = int_to_ptr.vmem [resolvable:$true] %s1516_s11  ;;  %s2774_s13 = int_to_ptr.vmem [resolvable:$true] %s1529_s13 }
  0x33   : > { %1067 = vmatprep.mubr.bf16.mxu1 %v2099_v37  ;;  %s2315_s30 = scalar_lea.vmem %s2767_s11, 128  ;;  %p2322_p0 = scmp.lt.s32.totalorder %s2767_s11, %s2320_s6 }
  0x34   : > { %p2316_p11 = scmp.ne.s32.totalorder %s2767_s11, %s2315_s30 }
  0x36   : > { %p2317_p12 = pnand %p2316_p11, %p2476_p5 }
  0x38   : > { %p2318_p13 = pneg %p2317_p12 }
  0x39   : > { %907 = vmatmul.mubr.bf16.gmra.mrb[4].mxu0 %v2101_v38 }
  0x3a   : > { %1068 = vmatmul.mubr.bf16.gmra.mrb[4].mxu1 %v2102_v39  ;;  %914 = vmatprep.mubr.bf16.mxu0 %v2103_v40 }
  0x3b   : > { %1075 = vmatprep.mubr.bf16.mxu1 %v2105_v41 }
  0x41   : > { %915 = vmatmul.mubr.bf16.gmra.mrb[8].mxu0 %v2107_v42 }
  0x42   : > { %1076 = vmatmul.mubr.bf16.gmra.mrb[8].mxu1 %v2108_v43  ;;  %922 = vmatprep.mubr.bf16.mxu0 %v2109_v44 }
  0x43   : > { %1083 = vmatprep.mubr.bf16.mxu1 %v2111_v45 }
  0x49   : > { %923 = vmatmul.mubr.bf16.gmra.mrb[12].mxu0 %v2113_v46 }
  0x4a   : > { %1084 = vmatmul.mubr.bf16.gmra.mrb[12].mxu1 %v2114_v47  ;;  %930 = vmatprep.mubr.bf16.mxu0 %v2115_v48 }
  0x4b   : > { %1091 = vmatprep.mubr.bf16.mxu1 %v2117_v49 }
  0x51   : > { %931 = vmatmul.mubr.bf16.gmra.mrb[16].mxu0 %v2119_v50 }
  0x52   : > { %1092 = vmatmul.mubr.bf16.gmra.mrb[16].mxu1 %v2120_v51  ;;  %938 = vmatprep.mubr.bf16.mxu0 %v2121_v52 }
  0x53   : > { %1099 = vmatprep.mubr.bf16.mxu1 %v2123_v53 }
  0x59   : > { %939 = vmatmul.mubr.bf16.gmra.mrb[20].mxu0 %v2125_v54 }
  0x5a   : > { %1100 = vmatmul.mubr.bf16.gmra.mrb[20].mxu1 %v2126_v55  ;;  %946 = vmatprep.mubr.bf16.mxu0 %v2127_v56 }
  0x5b   : > { %1107 = vmatprep.mubr.bf16.mxu1 %v2129_v57 }
  0x61   : > { %947 = vmatmul.mubr.bf16.gmra.mrb[24].mxu0 %v2131_v58 }
  0x62   : > { %1108 = vmatmul.mubr.bf16.gmra.mrb[24].mxu1 %v2132_v59  ;;  %954 = vmatprep.mubr.bf16.mxu0 %v2133_v60 }
  0x63   : > { %1115 = vmatprep.mubr.bf16.mxu1 %v2135_v61 }
  0x69   : > { %955 = vmatmul.mubr.bf16.gmra.mrb[28].mxu0 %v2137_v62 }
  0x6a   : > { %1116 = vmatmul.mubr.bf16.gmra.mrb[28].mxu1 %v2138_v63  ;;  %962 = vmatprep.mubr.bf16.mxu0 %v2139_v0 }
  0x6b   : > { %1123 = vmatprep.mubr.bf16.mxu1 %v2141_v1 }
  0x71   : > { %963 = vmatmul.mubr.bf16.gmra.mrb[32].mxu0 %v2143_v2 }
  0x72   : > { %1124 = vmatmul.mubr.bf16.gmra.mrb[32].mxu1 %v2144_v3  ;;  %970 = vmatprep.mubr.bf16.mxu0 %v2145_v4 }
  0x73   : > { %1131 = vmatprep.mubr.bf16.mxu1 %v2147_v5 }
  0x79   : > { %971 = vmatmul.mubr.bf16.gmra.mrb[36].mxu0 %v2149_v6 }
  0x7a   : > { %1132 = vmatmul.mubr.bf16.gmra.mrb[36].mxu1 %v2150_v7  ;;  %978 = vmatprep.mubr.bf16.mxu0 %v2151_v8 }
  0x7b   : > { %1139 = vmatprep.mubr.bf16.mxu1 %v2153_v9 }
  0x81   : > { %979 = vmatmul.mubr.bf16.gmra.mrb[40].mxu0 %v2155_v10 }
  0x82   : > { %1140 = vmatmul.mubr.bf16.gmra.mrb[40].mxu1 %v2156_v11  ;;  %986 = vmatprep.mubr.bf16.mxu0 %v2157_v12 }
  0x83   : > { %1147 = vmatprep.mubr.bf16.mxu1 %v2159_v13 }
  0x89   : > { %987 = vmatmul.mubr.bf16.gmra.mrb[44].mxu0 %v2161_v14 }
  0x8a   : > { %1148 = vmatmul.mubr.bf16.gmra.mrb[44].mxu1 %v2162_v15  ;;  %994 = vmatprep.mubr.bf16.mxu0 %v2163_v16 }
  0x8b   : > { %1155 = vmatprep.mubr.bf16.mxu1 %v2165_v17 }
  0x91   : > { %995 = vmatmul.mubr.bf16.gmra.mrb[48].mxu0 %v2167_v18 }
  0x92   : > { %1156 = vmatmul.mubr.bf16.gmra.mrb[48].mxu1 %v2168_v19  ;;  %1002 = vmatprep.mubr.bf16.mxu0 %v2169_v20 }
  0x93   : > { %1163 = vmatprep.mubr.bf16.mxu1 %v2171_v21 }
  0x99   : > { %1003 = vmatmul.mubr.bf16.gmra.mrb[52].mxu0 %v2173_v22 }
  0x9a   : > { %1164 = vmatmul.mubr.bf16.gmra.mrb[52].mxu1 %v2174_v23  ;;  %1010 = vmatprep.mubr.bf16.mxu0 %v2175_v24 }
  0x9b   : > { %1171 = vmatprep.mubr.bf16.mxu1 %v2177_v25 }
  0xa1   : > { %1011 = vmatmul.mubr.bf16.gmra.mrb[56].mxu0 %v2179_v26 }
  0xa2   : > { %1172 = vmatmul.mubr.bf16.gmra.mrb[56].mxu1 %v2180_v27  ;;  %1018 = vmatprep.mubr.bf16.mxu0 %v2181_v28 }
  0xa3   : > { %1179 = vmatprep.mubr.bf16.mxu1 %v2183_v29 }
  0xa9   : > { %1019 = vmatmul.mubr.bf16.gmra.mrb[60].mxu0 %v2185_v30 }
  0xaa   : > { %1180 = vmatmul.mubr.bf16.gmra.mrb[60].mxu1 %v2186_v31 }
 0x104   : > { %v1807_v32 = vpop.f32.mrb[0].mxu0 }
 0x105   : > { %v1919_v33 = vpop.f32.mrb[0].mxu1  ;;  %v1808_v34 = vpop.f32.mrb[1].mxu0 }
 0x106   : > { %v1809_v35 = vadd.f32 %v1808_v34, %v1807_v32  ;;  %v1920_v36 = vpop.f32.mrb[1].mxu1  ;;  %v1810_v37 = vpop.f32.mrb[2].mxu0 }
 0x107   : > { %v1921_v38 = vadd.f32 %v1920_v36, %v1919_v33  ;;  %v1922_v39 = vpop.f32.mrb[2].mxu1  ;;  %v1811_v40 = vpop.f32.mrb[3].mxu0 }
 0x108   : > { %v1812_v41 = vadd.f32 %v1811_v40, %v1810_v37  ;;  %v1923_v42 = vpop.f32.mrb[3].mxu1 }
 0x109   : > { %v1062_v43 = vadd.f32 %v1921_v38, %v1809_v35  ;;  %v1924_v44 = vadd.f32 %v1923_v42, %v1922_v39 }
 0x10b   : > { %v1752_v45 = vmul.f32 -1.442695, %v1062_v43  ;;  %v1065_v46 = vadd.f32 %v1924_v44, %v1812_v41 }
 0x10c   : > { %v1813_v47 = vpop.f32.mrb[4].mxu0 }
 0x10d   : > { %2187 = vpow2.f32 %v1752_v45  ;;  %v1753_v48 = vmul.f32 -1.442695, %v1065_v46  ;;  %v1925_v49 = vpop.f32.mrb[4].mxu1  ;;  %v1814_v50 = vpop.f32.mrb[5].mxu0 }
 0x10e   : > { %v1815_v51 = vadd.f32 %v1814_v50, %v1813_v47  ;;  %v1926_v52 = vpop.f32.mrb[5].mxu1  ;;  %v1816_v53 = vpop.f32.mrb[6].mxu0 }
 0x10f   : > { %2189 = vpow2.f32 %v1753_v48  ;;  %v1927_v54 = vadd.f32 %v1926_v52, %v1925_v49  ;;  %v1928_v55 = vpop.f32.mrb[6].mxu1  ;;  %v1817_v56 = vpop.f32.mrb[7].mxu0 }
 0x110   : > { %v1818_v57 = vadd.f32 %v1817_v56, %v1816_v53  ;;  %v1929_v58 = vpop.f32.mrb[7].mxu1 }
 0x111   : > { %v1070_v59 = vadd.f32 %v1927_v54, %v1815_v51  ;;  %v1930_v60 = vadd.f32 %v1929_v58, %v1928_v55 }
 0x113   : > { %v1754_v61 = vmul.f32 -1.442695, %v1070_v59  ;;  %v1073_v62 = vadd.f32 %v1930_v60, %v1818_v57 }
 0x114   : > { %v1819_v63 = vpop.f32.mrb[8].mxu0 }
 0x115   : > { %2191 = vpow2.f32 %v1754_v61  ;;  %v1755_v0 = vmul.f32 -1.442695, %v1073_v62  ;;  %v1931_v1 = vpop.f32.mrb[8].mxu1  ;;  %v1820_v2 = vpop.f32.mrb[9].mxu0 }
 0x116   : > { %v1821_v3 = vadd.f32 %v1820_v2, %v1819_v63  ;;  %v1932_v4 = vpop.f32.mrb[9].mxu1  ;;  %v1822_v5 = vpop.f32.mrb[10].mxu0 }
 0x117   : > { %v2188_v6 = vpop.eup %2187  ;;  %2193 = vpow2.f32 %v1755_v0  ;;  %v1933_v7 = vadd.f32 %v1932_v4, %v1931_v1  ;;  %v1934_v8 = vpop.f32.mrb[10].mxu1 }
 0x118   : > { %v1823_v9 = vpop.f32.mrb[11].mxu0  ;;  %v1284_v10 = vadd.f32 1.0, %v2188_v6  ;;  %v1935_v12 = vpop.f32.mrb[11].mxu1 }
 0x119   : > { %v1824_v11 = vadd.f32 %v1823_v9, %v1822_v5  ;;  %v2190_v13 = vpop.eup %2189  ;;  %v1078_v14 = vadd.f32 %v1933_v7, %v1821_v3  ;;  %v1936_v15 = vadd.f32 %v1935_v12, %v1934_v8 }
 0x11a   : > { %2195 = vrcp.f32 %v1284_v10  ;;  %v1285_v16 = vadd.f32 1.0, %v2190_v13 }
 0x11b   : > { %v1756_v17 = vmul.f32 -1.442695, %v1078_v14  ;;  %v1081_v18 = vadd.f32 %v1936_v15, %v1824_v11 }
 0x11c   : > { %2197 = vrcp.f32 %v1285_v16  ;;  %v1825_v19 = vpop.f32.mrb[12].mxu0 }
 0x11d   : > { %2199 = vpow2.f32 %v1756_v17  ;;  %v1757_v20 = vmul.f32 -1.442695, %v1081_v18  ;;  %v1937_v21 = vpop.f32.mrb[12].mxu1  ;;  %v1826_v22 = vpop.f32.mrb[13].mxu0 }
 0x11e   : > { %v1827_v23 = vadd.f32 %v1826_v22, %v1825_v19  ;;  %v1938_v24 = vpop.f32.mrb[13].mxu1  ;;  %v1828_v25 = vpop.f32.mrb[14].mxu0 }
 0x11f   : > { %v2192_v26 = vpop.eup %2191  ;;  %2201 = vpow2.f32 %v1757_v20  ;;  %v1939_v27 = vadd.f32 %v1938_v24, %v1937_v21  ;;  %v1940_v28 = vpop.f32.mrb[14].mxu1 }
 0x120   : > { %v1829_v29 = vpop.f32.mrb[15].mxu0  ;;  %v1286_v30 = vadd.f32 1.0, %v2192_v26  ;;  %v1941_v32 = vpop.f32.mrb[15].mxu1 }
 0x121   : > { %v1830_v31 = vadd.f32 %v1829_v29, %v1828_v25  ;;  %v2194_v33 = vpop.eup %2193  ;;  %v1086_v34 = vadd.f32 %v1939_v27, %v1827_v23  ;;  %v1942_v35 = vadd.f32 %v1941_v32, %v1940_v28 }
 0x122   : > { %2203 = vrcp.f32 %v1286_v30  ;;  %v1287_v36 = vadd.f32 1.0, %v2194_v33 }
 0x123   : > { %v1758_v37 = vmul.f32 -1.442695, %v1086_v34  ;;  %v1089_v38 = vadd.f32 %v1942_v35, %v1830_v31 }
 0x124   : > { %v2661_v39 = vpop.eup %2195  ;;  %2205 = vrcp.f32 %v1287_v36  ;;  %v1831_v40 = vpop.f32.mrb[16].mxu0 }
 0x125   : > { %1380 = vst [vmem:[%s2659_s7] sm:$0xff] %v2661_v39  ;;  %2207 = vpow2.f32 %v1758_v37  ;;  %v1759_v41 = vmul.f32 -1.442695, %v1089_v38  ;;  %v1943_v42 = vpop.f32.mrb[16].mxu1  ;;  %v1832_v43 = vpop.f32.mrb[17].mxu0 }
 0x126   : > { %v2665_v44 = vpop.eup %2197  ;;  %v1833_v45 = vadd.f32 %v1832_v43, %v1831_v40  ;;  %v1944_v46 = vpop.f32.mrb[17].mxu1 }
 0x127   : > { %v1834_v47 = vpop.f32.mrb[18].mxu0  ;;  %v2200_v48 = vpop.eup %2199  ;;  %1381 = vst [vmem:[%s2659_s7 + $0x8] sm:$0xff] %v2665_v44  ;;  %2209 = vpow2.f32 %v1759_v41  ;;  %v1945_v49 = vadd.f32 %v1944_v46, %v1943_v42 }
 0x128   : > { %v1946_v50 = vpop.f32.mrb[18].mxu1  ;;  %v1835_v51 = vpop.f32.mrb[19].mxu0  ;;  %v1288_v52 = vadd.f32 1.0, %v2200_v48 }
 0x129   : > { %v1836_v53 = vadd.f32 %v1835_v51, %v1834_v47  ;;  %v1947_v54 = vpop.f32.mrb[19].mxu1  ;;  %v2202_v55 = vpop.eup %2201  ;;  %v1094_v56 = vadd.f32 %v1945_v49, %v1833_v45 }
 0x12a   : > { %v1948_v57 = vadd.f32 %v1947_v54, %v1946_v50  ;;  %2211 = vrcp.f32 %v1288_v52  ;;  %v1289_v58 = vadd.f32 1.0, %v2202_v55 }
 0x12b   : > { %v1760_v59 = vmul.f32 -1.442695, %v1094_v56 }
 0x12c   : > { %v1097_v60 = vadd.f32 %v1948_v57, %v1836_v53  ;;  %v2669_v61 = vpop.eup %2203  ;;  %2213 = vrcp.f32 %v1289_v58  ;;  %v1837_v62 = vpop.f32.mrb[20].mxu0 }
 0x12d   : > { %1382 = vst [vmem:[%s2659_s7 + $0x10] sm:$0xff] %v2669_v61  ;;  %2215 = vpow2.f32 %v1760_v59  ;;  %v1949_v0 = vpop.f32.mrb[20].mxu1  ;;  %v1838_v1 = vpop.f32.mrb[21].mxu0 }
 0x12e   : > { %v1761_v63 = vmul.f32 -1.442695, %v1097_v60  ;;  %v2673_v2 = vpop.eup %2205  ;;  %v1839_v3 = vadd.f32 %v1838_v1, %v1837_v62  ;;  %v1950_v4 = vpop.f32.mrb[21].mxu1 }
 0x12f   : > { %v1840_v5 = vpop.f32.mrb[22].mxu0  ;;  %v2208_v6 = vpop.eup %2207  ;;  %1383 = vst [vmem:[%s2659_s7 + $0x18] sm:$0xff] %v2673_v2  ;;  %v1951_v7 = vadd.f32 %v1950_v4, %v1949_v0 }
 0x130   : > { %2217 = vpow2.f32 %v1761_v63  ;;  %v1952_v8 = vpop.f32.mrb[22].mxu1  ;;  %v1841_v9 = vpop.f32.mrb[23].mxu0  ;;  %v1290_v10 = vadd.f32 1.0, %v2208_v6 }
 0x131   : > { %v1842_v11 = vadd.f32 %v1841_v9, %v1840_v5  ;;  %v1953_v12 = vpop.f32.mrb[23].mxu1  ;;  %v2210_v13 = vpop.eup %2209  ;;  %v1102_v14 = vadd.f32 %v1951_v7, %v1839_v3 }
 0x132   : > { %v1954_v15 = vadd.f32 %v1953_v12, %v1952_v8  ;;  %2219 = vrcp.f32 %v1290_v10  ;;  %v1291_v16 = vadd.f32 1.0, %v2210_v13 }
 0x133   : > { %v1762_v17 = vmul.f32 -1.442695, %v1102_v14 }
 0x134   : > { %v1105_v18 = vadd.f32 %v1954_v15, %v1842_v11  ;;  %v2677_v19 = vpop.eup %2211  ;;  %2221 = vrcp.f32 %v1291_v16  ;;  %v1843_v20 = vpop.f32.mrb[24].mxu0 }
 0x135   : > { %1384 = vst [vmem:[%s2659_s7 + $0x20] sm:$0xff] %v2677_v19  ;;  %2223 = vpow2.f32 %v1762_v17  ;;  %v1955_v22 = vpop.f32.mrb[24].mxu1  ;;  %v1844_v23 = vpop.f32.mrb[25].mxu0  ;;  %v1412_v24 = vmin.f32 %v2661_v39, %v2677_v19  ;;  %v1450_v25 = vmax.f32 %v2661_v39, %v2677_v19 }
 0x136   : > { %v1763_v21 = vmul.f32 -1.442695, %v1105_v18  ;;  %v2685_v26 = vpop.eup %2213  ;;  %v1845_v27 = vadd.f32 %v1844_v23, %v1843_v20  ;;  %v1956_v28 = vpop.f32.mrb[25].mxu1 }
 0x137   : > { %v1846_v29 = vpop.f32.mrb[26].mxu0  ;;  %v2216_v30 = vpop.eup %2215  ;;  %1385 = vst [vmem:[%s2659_s7 + $0x28] sm:$0xff] %v2685_v26  ;;  %v1957_v31 = vadd.f32 %v1956_v28, %v1955_v22  ;;  %v1413_v34 = vmin.f32 %v2665_v44, %v2685_v26  ;;  %v1451_v35 = vmax.f32 %v2665_v44, %v2685_v26 }
 0x138   : > { %2225 = vpow2.f32 %v1763_v21  ;;  %v1958_v32 = vpop.f32.mrb[26].mxu1  ;;  %v1847_v33 = vpop.f32.mrb[27].mxu0  ;;  %v1292_v36 = vadd.f32 1.0, %v2216_v30 }
 0x139   : > { %v1848_v37 = vadd.f32 %v1847_v33, %v1846_v29  ;;  %v1959_v38 = vpop.f32.mrb[27].mxu1  ;;  %v1110_v41 = vadd.f32 %v1957_v31, %v1845_v27 }
 0x13a   : > { %v2218_v40 = vpop.eup %2217  ;;  %v1960_v42 = vadd.f32 %v1959_v38, %v1958_v32  ;;  %2227 = vrcp.f32 %v1292_v36 }
 0x13b   : > { %v1293_v43 = vadd.f32 1.0, %v2218_v40  ;;  %v1764_v45 = vmul.f32 -1.442695, %v1110_v41 }
 0x13c   : > { %v1113_v46 = vadd.f32 %v1960_v42, %v1848_v37  ;;  %v2693_v47 = vpop.eup %2219  ;;  %v1849_v48 = vpop.f32.mrb[28].mxu0 }
 0x13d   : > { %2229 = vrcp.f32 %v1293_v43  ;;  %1386 = vst [vmem:[%s2659_s7 + $0x30] sm:$0xff] %v2693_v47  ;;  %v1961_v50 = vpop.f32.mrb[28].mxu1  ;;  %v1850_v51 = vpop.f32.mrb[29].mxu0  ;;  %v1414_v52 = vmin.f32 %v2669_v61, %v2693_v47  ;;  %v1452_v53 = vmax.f32 %v2669_v61, %v2693_v47 }
 0x13e   : > { %2231 = vpow2.f32 %v1764_v45  ;;  %v1765_v49 = vmul.f32 -1.442695, %v1113_v46  ;;  %v2701_v54 = vpop.eup %2221  ;;  %v1851_v55 = vadd.f32 %v1850_v51, %v1849_v48  ;;  %v1962_v56 = vpop.f32.mrb[29].mxu1 }
 0x13f   : > { %v1852_v57 = vpop.f32.mrb[30].mxu0  ;;  %v2224_v58 = vpop.eup %2223  ;;  %1387 = vst [vmem:[%s2659_s7 + $0x38] sm:$0xff] %v2701_v54  ;;  %v1963_v59 = vadd.f32 %v1962_v56, %v1961_v50  ;;  %v1415_v63 = vmin.f32 %v2673_v2, %v2701_v54  ;;  %v1453_v0 = vmax.f32 %v2673_v2, %v2701_v54 }
 0x140   : > { %2233 = vpow2.f32 %v1765_v49  ;;  %v1964_v60 = vpop.f32.mrb[30].mxu1  ;;  %v1853_v62 = vpop.f32.mrb[31].mxu0  ;;  %v1294_v1 = vadd.f32 1.0, %v2224_v58 }
 0x141   : > { %v1854_v3 = vadd.f32 %v1853_v62, %v1852_v57  ;;  %v1965_v4 = vpop.f32.mrb[31].mxu1  ;;  %v1118_v6 = vadd.f32 %v1963_v59, %v1851_v55 }
 0x142   : > { %v2226_v5 = vpop.eup %2225  ;;  %v1966_v7 = vadd.f32 %v1965_v4, %v1964_v60  ;;  %2235 = vrcp.f32 %v1294_v1 }
 0x143   : > { %v1295_v8 = vadd.f32 1.0, %v2226_v5  ;;  %v1766_v9 = vmul.f32 -1.442695, %v1118_v6 }
 0x144   : > { %v1121_v10 = vadd.f32 %v1966_v7, %v1854_v3  ;;  %v2228_v11 = vpop.eup %2227  ;;  %v1855_v12 = vpop.f32.mrb[32].mxu0 }
 0x145   : > { %2237 = vrcp.f32 %v1295_v8  ;;  %1388 = vst [vmem:[%s2659_s7 + $0x40] sm:$0xff] %v2228_v11  ;;  %v1967_v14 = vpop.f32.mrb[32].mxu1  ;;  %v1856_v15 = vpop.f32.mrb[33].mxu0 }
 0x146   : > { %2239 = vpow2.f32 %v1766_v9  ;;  %v1767_v13 = vmul.f32 -1.442695, %v1121_v10  ;;  %v1857_v17 = vadd.f32 %v1856_v15, %v1855_v12  ;;  %v1968_v18 = vpop.f32.mrb[33].mxu1  ;;  %v1858_v20 = vpop.f32.mrb[34].mxu0 }
 0x147   : > { %v2230_v16 = vpop.eup %2229  ;;  %v1969_v27 = vadd.f32 %v1968_v18, %v1967_v14  ;;  %v1970_v28 = vpop.f32.mrb[34].mxu1 }
 0x148   : > { %v2232_v21 = vpop.eup %2231  ;;  %v1454_v22 = vmax.f32 %v2230_v16, %v2228_v11  ;;  %v1416_v23 = vmin.f32 %v2230_v16, %v2228_v11  ;;  %1389 = vst [vmem:[%s2659_s7 + $0x48] sm:$0xff] %v2230_v16  ;;  %2241 = vpow2.f32 %v1767_v13  ;;  %v1859_v29 = vpop.f32.mrb[35].mxu0 }
 0x149   : > { %v1296_v30 = vadd.f32 1.0, %v2232_v21  ;;  %v1860_v31 = vadd.f32 %v1859_v29, %v1858_v20  ;;  %v1971_v32 = vpop.f32.mrb[35].mxu1  ;;  %v1126_v36 = vadd.f32 %v1969_v27, %v1857_v17 }
 0x14a   : > { %v2234_v33 = vpop.eup %2233  ;;  %v1972_v37 = vadd.f32 %v1971_v32, %v1970_v28 }
 0x14b   : > { %2243 = vrcp.f32 %v1296_v30  ;;  %v1297_v38 = vadd.f32 1.0, %v2234_v33  ;;  %v1768_v40 = vmul.f32 -1.442695, %v1126_v36 }
 0x14c   : > { %v1129_v41 = vadd.f32 %v1972_v37, %v1860_v31  ;;  %v2236_v42 = vpop.eup %2235  ;;  %v1861_v43 = vpop.f32.mrb[36].mxu0 }
 0x14d   : > { %2245 = vrcp.f32 %v1297_v38  ;;  %v1455_v45 = vmax.f32 %v2236_v42, %v1454_v22  ;;  %v1417_v46 = vmin.f32 %v2236_v42, %v1416_v23  ;;  %1390 = vst [vmem:[%s2659_s7 + $0x50] sm:$0xff] %v2236_v42  ;;  %v1973_v49 = vpop.f32.mrb[36].mxu1  ;;  %v1862_v50 = vpop.f32.mrb[37].mxu0 }
 0x14e   : > { %2247 = vpow2.f32 %v1768_v40  ;;  %v1769_v48 = vmul.f32 -1.442695, %v1129_v41  ;;  %v1863_v55 = vadd.f32 %v1862_v50, %v1861_v43  ;;  %v1974_v56 = vpop.f32.mrb[37].mxu1  ;;  %v1864_v57 = vpop.f32.mrb[38].mxu0 }
 0x14f   : > { %v2238_v51 = vpop.eup %2237  ;;  %v1975_v62 = vadd.f32 %v1974_v56, %v1973_v49  ;;  %v1976_v1 = vpop.f32.mrb[38].mxu1 }
 0x150   : > { %v2240_v58 = vpop.eup %2239  ;;  %v1456_v59 = vmax.f32 %v2238_v51, %v1455_v45  ;;  %v1418_v60 = vmin.f32 %v2238_v51, %v1417_v46  ;;  %1391 = vst [vmem:[%s2659_s7 + $0x58] sm:$0xff] %v2238_v51  ;;  %2249 = vpow2.f32 %v1769_v48  ;;  %v1865_v3 = vpop.f32.mrb[39].mxu0 }
 0x151   : > { %v1298_v4 = vadd.f32 1.0, %v2240_v58  ;;  %v1866_v5 = vadd.f32 %v1865_v3, %v1864_v57  ;;  %v1977_v6 = vpop.f32.mrb[39].mxu1  ;;  %v1134_v8 = vadd.f32 %v1975_v62, %v1863_v55 }
 0x152   : > { %v2242_v7 = vpop.eup %2241  ;;  %v1978_v9 = vadd.f32 %v1977_v6, %v1976_v1 }
 0x153   : > { %2251 = vrcp.f32 %v1298_v4  ;;  %v1299_v10 = vadd.f32 1.0, %v2242_v7  ;;  %v1770_v11 = vmul.f32 -1.442695, %v1134_v8 }
 0x154   : > { %v1137_v12 = vadd.f32 %v1978_v9, %v1866_v5  ;;  %v1867_v14 = vpop.f32.mrb[40].mxu0 }
 0x155   : > { %v2244_v13 = vpop.eup %2243  ;;  %2253 = vrcp.f32 %v1299_v10  ;;  %v1979_v18 = vpop.f32.mrb[40].mxu1 }
 0x156   : > { %v1457_v15 = vmax.f32 %v2244_v13, %v1456_v59  ;;  %v1419_v16 = vmin.f32 %v2244_v13, %v1418_v60  ;;  %1392 = vst [vmem:[%s2659_s7 + $0x60] sm:$0xff] %v2244_v13  ;;  %2255 = vpow2.f32 %v1770_v11  ;;  %v1771_v17 = vmul.f32 -1.442695, %v1137_v12  ;;  %v1868_v20 = vpop.f32.mrb[41].mxu0  ;;  %v1980_v23 = vpop.f32.mrb[41].mxu1 }
 0x157   : > { %v2246_v21 = vpop.eup %2245  ;;  %v1869_v22 = vadd.f32 %v1868_v20, %v1867_v14  ;;  %v1870_v27 = vpop.f32.mrb[42].mxu0  ;;  %v1981_v31 = vadd.f32 %v1980_v23, %v1979_v18 }
 0x158   : > { %v2248_v28 = vpop.eup %2247  ;;  %v1458_v29 = vmax.f32 %v2246_v21, %v1457_v15  ;;  %v1420_v30 = vmin.f32 %v2246_v21, %v1419_v16  ;;  %1393 = vst [vmem:[%s2659_s7 + $0x68] sm:$0xff] %v2246_v21  ;;  %2257 = vpow2.f32 %v1771_v17  ;;  %v1982_v32 = vpop.f32.mrb[42].mxu1 }
 0x159   : > { %v1871_v33 = vpop.f32.mrb[43].mxu0  ;;  %v1300_v36 = vadd.f32 1.0, %v2248_v28  ;;  %v1983_v38 = vpop.f32.mrb[43].mxu1  ;;  %v1142_v41 = vadd.f32 %v1981_v31, %v1869_v22 }
 0x15a   : > { %v1872_v37 = vadd.f32 %v1871_v33, %v1870_v27  ;;  %v2250_v40 = vpop.eup %2249  ;;  %v1984_v42 = vadd.f32 %v1983_v38, %v1982_v32 }
 0x15b   : > { %2259 = vrcp.f32 %v1300_v36  ;;  %v1301_v43 = vadd.f32 1.0, %v2250_v40  ;;  %v1772_v45 = vmul.f32 -1.442695, %v1142_v41 }
 0x15c   : > { %v1145_v46 = vadd.f32 %v1984_v42, %v1872_v37  ;;  %v1873_v49 = vpop.f32.mrb[44].mxu0 }
 0x15d   : > { %v2252_v48 = vpop.eup %2251  ;;  %2261 = vrcp.f32 %v1301_v43  ;;  %v1985_v56 = vpop.f32.mrb[44].mxu1 }
 0x15e   : > { %v1459_v50 = vmax.f32 %v2252_v48, %v1458_v29  ;;  %v1421_v51 = vmin.f32 %v2252_v48, %v1420_v30  ;;  %1394 = vst [vmem:[%s2659_s7 + $0x70] sm:$0xff] %v2252_v48  ;;  %2263 = vpow2.f32 %v1772_v45  ;;  %v1773_v55 = vmul.f32 -1.442695, %v1145_v46  ;;  %v1874_v57 = vpop.f32.mrb[45].mxu0  ;;  %v1986_v60 = vpop.f32.mrb[45].mxu1 }
 0x15f   : > { %v2254_v58 = vpop.eup %2253  ;;  %v1875_v59 = vadd.f32 %v1874_v57, %v1873_v49  ;;  %v1876_v62 = vpop.f32.mrb[46].mxu0  ;;  %v1987_v5 = vadd.f32 %v1986_v60, %v1985_v56 }
 0x160   : > { %v2256_v1 = vpop.eup %2255  ;;  %v1460_v3 = vmax.f32 %v2254_v58, %v1459_v50  ;;  %v1422_v4 = vmin.f32 %v2254_v58, %v1421_v51  ;;  %1395 = vst [vmem:[%s2659_s7 + $0x78] sm:$0xff] %v2254_v58  ;;  %2265 = vpow2.f32 %v1773_v55  ;;  %v1988_v6 = vpop.f32.mrb[46].mxu1 }
 0x161   : > { %v1877_v7 = vpop.f32.mrb[47].mxu0  ;;  %v1302_v8 = vadd.f32 1.0, %v2256_v1  ;;  %v1989_v10 = vpop.f32.mrb[47].mxu1  ;;  %v1150_v12 = vadd.f32 %v1987_v5, %v1875_v59 }
 0x162   : > { %v1878_v9 = vadd.f32 %v1877_v7, %v1876_v62  ;;  %v2258_v11 = vpop.eup %2257  ;;  %v1990_v13 = vadd.f32 %v1989_v10, %v1988_v6 }
 0x163   : > { %2267 = vrcp.f32 %v1302_v8  ;;  %v1303_v14 = vadd.f32 1.0, %v2258_v11  ;;  %v1774_v15 = vmul.f32 -1.442695, %v1150_v12 }
 0x164   : > { %v1153_v16 = vadd.f32 %v1990_v13, %v1878_v9  ;;  %v1879_v18 = vpop.f32.mrb[48].mxu0 }
 0x165   : > { %v2260_v17 = vpop.eup %2259  ;;  %2269 = vrcp.f32 %v1303_v14  ;;  %v1991_v23 = vpop.f32.mrb[48].mxu1 }
 0x166   : > { %v1461_v20 = vmax.f32 %v2260_v17, %v1460_v3  ;;  %v1423_v21 = vmin.f32 %v2260_v17, %v1422_v4  ;;  %1396 = vst [vmem:[%s2659_s7 + $0x80] sm:$0xff] %v2260_v17  ;;  %2271 = vpow2.f32 %v1774_v15  ;;  %v1775_v22 = vmul.f32 -1.442695, %v1153_v16  ;;  %v1880_v27 = vpop.f32.mrb[49].mxu0  ;;  %v1992_v30 = vpop.f32.mrb[49].mxu1 }
 0x167   : > { %v2262_v28 = vpop.eup %2261  ;;  %v1881_v29 = vadd.f32 %v1880_v27, %v1879_v18  ;;  %v1882_v31 = vpop.f32.mrb[50].mxu0  ;;  %v1993_v37 = vadd.f32 %v1992_v30, %v1991_v23 }
 0x168   : > { %v2264_v32 = vpop.eup %2263  ;;  %v1462_v33 = vmax.f32 %v2262_v28, %v1461_v20  ;;  %v1424_v36 = vmin.f32 %v2262_v28, %v1423_v21  ;;  %1397 = vst [vmem:[%s2659_s7 + $0x88] sm:$0xff] %v2262_v28  ;;  %2273 = vpow2.f32 %v1775_v22  ;;  %v1994_v38 = vpop.f32.mrb[50].mxu1 }
 0x169   : > { %v1883_v40 = vpop.f32.mrb[51].mxu0  ;;  %v1304_v41 = vadd.f32 1.0, %v2264_v32  ;;  %v1995_v43 = vpop.f32.mrb[51].mxu1  ;;  %v1158_v46 = vadd.f32 %v1993_v37, %v1881_v29 }
 0x16a   : > { %v1884_v42 = vadd.f32 %v1883_v40, %v1882_v31  ;;  %v2266_v45 = vpop.eup %2265  ;;  %v1996_v48 = vadd.f32 %v1995_v43, %v1994_v38 }
 0x16b   : > { %2275 = vrcp.f32 %v1304_v41  ;;  %v1305_v49 = vadd.f32 1.0, %v2266_v45  ;;  %v1776_v50 = vmul.f32 -1.442695, %v1158_v46 }
 0x16c   : > { %v1161_v51 = vadd.f32 %v1996_v48, %v1884_v42  ;;  %v1885_v56 = vpop.f32.mrb[52].mxu0 }
 0x16d   : > { %v2268_v55 = vpop.eup %2267  ;;  %2277 = vrcp.f32 %v1305_v49  ;;  %v1997_v60 = vpop.f32.mrb[52].mxu1 }
 0x16e   : > { %v1463_v57 = vmax.f32 %v2268_v55, %v1462_v33  ;;  %v1425_v58 = vmin.f32 %v2268_v55, %v1424_v36  ;;  %1398 = vst [vmem:[%s2659_s7 + $0x90] sm:$0xff] %v2268_v55  ;;  %2279 = vpow2.f32 %v1776_v50  ;;  %v1777_v59 = vmul.f32 -1.442695, %v1161_v51  ;;  %v1886_v62 = vpop.f32.mrb[53].mxu0  ;;  %v1998_v4 = vpop.f32.mrb[53].mxu1 }
 0x16f   : > { %v2270_v1 = vpop.eup %2269  ;;  %v1887_v3 = vadd.f32 %v1886_v62, %v1885_v56  ;;  %v1888_v5 = vpop.f32.mrb[54].mxu0  ;;  %v1999_v9 = vadd.f32 %v1998_v4, %v1997_v60 }
 0x170   : > { %v2272_v6 = vpop.eup %2271  ;;  %v1464_v7 = vmax.f32 %v2270_v1, %v1463_v57  ;;  %v1426_v8 = vmin.f32 %v2270_v1, %v1425_v58  ;;  %1399 = vst [vmem:[%s2659_s7 + $0x98] sm:$0xff] %v2270_v1  ;;  %2281 = vpow2.f32 %v1777_v59  ;;  %v2000_v10 = vpop.f32.mrb[54].mxu1 }
 0x171   : > { %v1889_v11 = vpop.f32.mrb[55].mxu0  ;;  %v1306_v12 = vadd.f32 1.0, %v2272_v6  ;;  %v2001_v14 = vpop.f32.mrb[55].mxu1  ;;  %v1166_v16 = vadd.f32 %v1999_v9, %v1887_v3 }
 0x172   : > { %v1890_v13 = vadd.f32 %v1889_v11, %v1888_v5  ;;  %v2274_v15 = vpop.eup %2273  ;;  %v2002_v17 = vadd.f32 %v2001_v14, %v2000_v10 }
 0x173   : > { %2283 = vrcp.f32 %v1306_v12  ;;  %v1307_v18 = vadd.f32 1.0, %v2274_v15  ;;  %v1778_v20 = vmul.f32 -1.442695, %v1166_v16 }
 0x174   : > { %v1169_v21 = vadd.f32 %v2002_v17, %v1890_v13  ;;  %v1891_v23 = vpop.f32.mrb[56].mxu0 }
 0x175   : > { %v2276_v22 = vpop.eup %2275  ;;  %2285 = vrcp.f32 %v1307_v18  ;;  %v2003_v30 = vpop.f32.mrb[56].mxu1 }
 0x176   : > { %v1465_v27 = vmax.f32 %v2276_v22, %v1464_v7  ;;  %v1427_v28 = vmin.f32 %v2276_v22, %v1426_v8  ;;  %1400 = vst [vmem:[%s2659_s7 + $0xa0] sm:$0xff] %v2276_v22  ;;  %2287 = vpow2.f32 %v1778_v20  ;;  %v1779_v29 = vmul.f32 -1.442695, %v1169_v21  ;;  %v1892_v31 = vpop.f32.mrb[57].mxu0  ;;  %v2004_v36 = vpop.f32.mrb[57].mxu1 }
 0x177   : > { %v2278_v32 = vpop.eup %2277  ;;  %v1893_v33 = vadd.f32 %v1892_v31, %v1891_v23  ;;  %v1894_v37 = vpop.f32.mrb[58].mxu0  ;;  %v2005_v42 = vadd.f32 %v2004_v36, %v2003_v30 }
 0x178   : > { %v2280_v38 = vpop.eup %2279  ;;  %v1466_v40 = vmax.f32 %v2278_v32, %v1465_v27  ;;  %v1428_v41 = vmin.f32 %v2278_v32, %v1427_v28  ;;  %1401 = vst [vmem:[%s2659_s7 + $0xa8] sm:$0xff] %v2278_v32  ;;  %2289 = vpow2.f32 %v1779_v29  ;;  %v2006_v43 = vpop.f32.mrb[58].mxu1 }
 0x179   : > { %v1895_v45 = vpop.f32.mrb[59].mxu0  ;;  %v1308_v46 = vadd.f32 1.0, %v2280_v38  ;;  %v2007_v49 = vpop.f32.mrb[59].mxu1  ;;  %v1174_v51 = vadd.f32 %v2005_v42, %v1893_v33 }
 0x17a   : > { %v1896_v48 = vadd.f32 %v1895_v45, %v1894_v37  ;;  %v2282_v50 = vpop.eup %2281  ;;  %v2008_v55 = vadd.f32 %v2007_v49, %v2006_v43 }
 0x17b   : > { %2291 = vrcp.f32 %v1308_v46  ;;  %v1309_v56 = vadd.f32 1.0, %v2282_v50  ;;  %v1780_v57 = vmul.f32 -1.442695, %v1174_v51 }
 0x17c   : > { %v1177_v58 = vadd.f32 %v2008_v55, %v1896_v48  ;;  %v1897_v60 = vpop.f32.mrb[60].mxu0 }
 0x17d   : > { %v2284_v59 = vpop.eup %2283  ;;  %2293 = vrcp.f32 %v1309_v56  ;;  %v2009_v4 = vpop.f32.mrb[60].mxu1 }
 0x17e   : > { %v1467_v62 = vmax.f32 %v2284_v59, %v1466_v40  ;;  %v1429_v1 = vmin.f32 %v2284_v59, %v1428_v41  ;;  %1402 = vst [vmem:[%s2659_s7 + $0xb0] sm:$0xff] %v2284_v59  ;;  %2295 = vpow2.f32 %v1780_v57  ;;  %v1781_v3 = vmul.f32 -1.442695, %v1177_v58  ;;  %v1898_v5 = vpop.f32.mrb[61].mxu0  ;;  %v2010_v8 = vpop.f32.mrb[61].mxu1 }
 0x17f   : > { %v2286_v6 = vpop.eup %2285  ;;  %v1899_v7 = vadd.f32 %v1898_v5, %v1897_v60  ;;  %v1900_v9 = vpop.f32.mrb[62].mxu0  ;;  %v2011_v13 = vadd.f32 %v2010_v8, %v2009_v4 }
 0x180   : > { %v2288_v10 = vpop.eup %2287  ;;  %v1468_v11 = vmax.f32 %v2286_v6, %v1467_v62  ;;  %v1430_v12 = vmin.f32 %v2286_v6, %v1429_v1  ;;  %1403 = vst [vmem:[%s2659_s7 + $0xb8] sm:$0xff] %v2286_v6  ;;  %2297 = vpow2.f32 %v1781_v3  ;;  %v2012_v14 = vpop.f32.mrb[62].mxu1 }
 0x181   : > { %v1901_v15 = vpop.f32.mrb[63].mxu0  ;;  %v1310_v16 = vadd.f32 1.0, %v2288_v10  ;;  %v2013_v18 = vpop.f32.mrb[63].mxu1  ;;  %v1182_v21 = vadd.f32 %v2011_v13, %v1899_v7 }
 0x182   : > { %v1902_v17 = vadd.f32 %v1901_v15, %v1900_v9  ;;  %v2290_v20 = vpop.eup %2289  ;;  %v2014_v22 = vadd.f32 %v2013_v18, %v2012_v14 }
 0x183   : > { %2299 = vrcp.f32 %v1310_v16  ;;  %v1311_v23 = vadd.f32 1.0, %v2290_v20  ;;  %v1782_v27 = vmul.f32 -1.442695, %v1182_v21 }
 0x184   : > { %v1185_v28 = vadd.f32 %v2014_v22, %v1902_v17 }
 0x185   : > { %v2292_v29 = vpop.eup %2291  ;;  %2301 = vrcp.f32 %v1311_v23 }
 0x186   : > { %v1469_v30 = vmax.f32 %v2292_v29, %v1468_v11  ;;  %v1431_v31 = vmin.f32 %v2292_v29, %v1430_v12  ;;  %1404 = vst [vmem:[%s2659_s7 + $0xc0] sm:$0xff] %v2292_v29  ;;  %2303 = vpow2.f32 %v1782_v27  ;;  %v1783_v32 = vmul.f32 -1.442695, %v1185_v28 }
 0x187   : > { %v2294_v33 = vpop.eup %2293 }
 0x188   : > { %v2296_v36 = vpop.eup %2295  ;;  %v1470_v37 = vmax.f32 %v2294_v33, %v1469_v30  ;;  %v1432_v38 = vmin.f32 %v2294_v33, %v1431_v31  ;;  %1405 = vst [vmem:[%s2659_s7 + $0xc8] sm:$0xff] %v2294_v33  ;;  %2305 = vpow2.f32 %v1783_v32 }
 0x189   : > { %v1312_v40 = vadd.f32 1.0, %v2296_v36 }
 0x18a   : > { %v2298_v41 = vpop.eup %2297 }
 0x18b   : > { %2307 = vrcp.f32 %v1312_v40  ;;  %v1313_v42 = vadd.f32 1.0, %v2298_v41 }
 0x18d   : > { %v2300_v43 = vpop.eup %2299  ;;  %2309 = vrcp.f32 %v1313_v42 }
 0x18e   : > { %v1471_v45 = vmax.f32 %v2300_v43, %v1470_v37  ;;  %v1433_v46 = vmin.f32 %v2300_v43, %v1432_v38  ;;  %1406 = vst [vmem:[%s2659_s7 + $0xd0] sm:$0xff] %v2300_v43 }
 0x18f   : > { %v2302_v48 = vpop.eup %2301 }
 0x190   : > { %v2304_v49 = vpop.eup %2303  ;;  %v1472_v50 = vmax.f32 %v2302_v48, %v1471_v45  ;;  %v1434_v51 = vmin.f32 %v2302_v48, %v1433_v46  ;;  %1407 = vst [vmem:[%s2659_s7 + $0xd8] sm:$0xff] %v2302_v48 }
 0x191   : > { %v1314_v55 = vadd.f32 1.0, %v2304_v49 }
 0x192   : > { %v2306_v56 = vpop.eup %2305 }
 0x193   : > { %2311 = vrcp.f32 %v1314_v55  ;;  %v1315_v57 = vadd.f32 1.0, %v2306_v56 }
 0x195   : > { %v2308_v58 = vpop.eup %2307  ;;  %2313 = vrcp.f32 %v1315_v57 }
 0x196   : > { %v1473_v59 = vmax.f32 %v2308_v58, %v1472_v50  ;;  %v1435_v60 = vmin.f32 %v2308_v58, %v1434_v51  ;;  %1408 = vst [vmem:[%s2659_s7 + $0xe0] sm:$0xff] %v2308_v58 }
 0x197   : > { %v2310_v62 = vpop.eup %2309 }
 0x198   : > { %v1474_v1 = vmax.f32 %v2310_v62, %v1473_v59  ;;  %v1436_v3 = vmin.f32 %v2310_v62, %v1435_v60  ;;  %1409 = vst [vmem:[%s2659_s7 + $0xe8] sm:$0xff] %v2310_v62 }
 0x19d   : > { %v2312_v4 = vpop.eup %2311 }
 0x19e   : > { %v1475_v5 = vmax.f32 %v2312_v4, %v1474_v1  ;;  %v1437_v6 = vmin.f32 %v2312_v4, %v1436_v3  ;;  %1410 = vst [vmem:[%s2659_s7 + $0xf0] sm:$0xff] %v2312_v4 }
 0x19f   : > { %v2314_v7 = vpop.eup %2313 }
 0x1a0   : > { %v1476_v8 = vmax.f32 %v2314_v7, %v1475_v5  ;;  %v1438_v9 = vmin.f32 %v2314_v7, %v1437_v6  ;;  %1411 = vst [vmem:[%s2659_s7 + $0xf8] sm:$0xff] %v2314_v7  ;;  %s2321_s7 = scalar_lea.vmem %s2320_s6, 256 }
 0x1a1   : > { %p2323_p1 = scmp.lt.s32.totalorder %s2321_s7, %s2315_s30 }
 0x1a2   : > { %v1439_v10 = vmin.f32 %v1412_v24, %v1438_v9  ;;  %v1477_v11 = vmax.f32 %v1450_v25, %v1476_v8 }
 0x1a3   : > { %p2324_p2 = por %p2323_p1, %p2322_p0 }
 0x1a4   : > { %v1440_v12 = vmin.f32 %v1413_v34, %v1439_v10  ;;  %v1478_v13 = vmax.f32 %v1451_v35, %v1477_v11 }
 0x1a5   : > { %p2325_p3 = pnand %p2324_p2, %p2318_p13 }
 0x1a6   : > { %v1441_v14 = vmin.f32 %v1414_v52, %v1440_v12  ;;  %v1479_v24 = vmax.f32 %v1452_v53, %v1478_v13 }
 0x1a8   : > { %v1442_v39 = vmin.f32 %v1415_v63, %v1441_v14  ;;  %v1480_v44 = vmax.f32 %v1453_v0, %v1479_v24 }
 0x1aa   : > { %v1443_v19 = vrot.slane %v1442_v39, 4  ;;  %v1481_v25 = vrot.slane %v1480_v44, 4 }
 0x1ac   : > { %v1444_v26 = vmin.f32 %v1442_v39, %v1443_v19  ;;  %v1482_v34 = vmax.f32 %v1480_v44, %v1481_v25 }
 0x1ae   : > { %v1445_v35 = vrot.slane %v1444_v26, 2  ;;  %v1483_v52 = vrot.slane %v1482_v34, 2 }
 0x1b0   : > { %v1446_v61 = vmin.f32 %v1444_v26, %v1445_v35  ;;  %v1484_v47 = vmax.f32 %v1482_v34, %v1483_v52 }
 0x1b2   : > { %v1447_v53 = vrot.slane %v1446_v61, 1  ;;  %v1485_v63 = vrot.slane %v1484_v47, 1 }
 0x1b4   : > { %v1448_v2 = vmin.f32 %v1446_v61, %v1447_v53  ;;  %v1486_v54 = vmax.f32 %v1484_v47, %v1485_v63 }
 0x1b6   : > { %1449 = vst [vmem:[%s204_s10] sm:$0xff] %v1448_v2  ;;  %1487 = vst [vmem:[%s211_s12] sm:$0xff] %v1486_v54 }
 0x1b7   : > { %2328 = shalt.err (!%p2325_p3)
}
 0x1b8   : > { %s2329_s8 = scalar_lea.hbm %s2765_s23, 128  ;;  %s2333_s12 = scalar_lea.hbm %s2840_s3, 256 }
 0x1b9   : > { %p2330_p4 = scmp.ne.s32.totalorder %s2765_s23, %s2329_s8  ;;  %p2334_p9 = scmp.lt.u32.totalorder %s2765_s23, %s2840_s3 }
 0x1ba   : > { %p2335_p10 = scmp.lt.u32.totalorder %s2333_s12, %s2329_s8  ;;  %p2337_p12 = scmp.lt.u32.totalorder %s2329_s8, %s2765_s23 }
 0x1bb   : > { %p2331_p7 = pnand %p2330_p4, %p2476_p5 }
 0x1bc   : > { %p2336_p11 = por %p2335_p10, %p2334_p9 }
 0x1bd   : > { %p2332_p8 = pneg %p2331_p7 }
 0x1be   : > { %p2338_p13 = por %p2337_p12, %p2336_p11 }
 0x1c0   : > { %p2339_p0 = pnand %p2338_p13, %p2332_p8 }
 0x1c2   : > { %2342 = shalt.err (!%p2339_p0)
}
 0x1c3   : > { %2015 = dma.vmem_to_hbm [thread:$0]  (%p2476_p5), %s2767_s11, 128, %s2765_s23, %s1494_s29  }
 0x1c4   : > { %s1499_s19 = scalar_lea.sflag [#allocation5], %s2752_s22  ;;  %s2343_s27 = scalar_lea.vmem %s2774_s13, 128 }
 0x1c5   : > { %p2344_p1 = scmp.ne.s32.totalorder %s2774_s13, %s2343_s27  ;;  %s2412_s30 = smov [#allocation4]  }
 0x1c6   : > { %s2347_s5 = sshll.u32 %s2412_s30, 4  ;;  %s2348_s5 = int_to_ptr.vmem [resolvable:$false] %s2347_s5 }
 0x1c7   : > { %p2345_p2 = pnand %p2344_p1, %p2476_p5  ;;  %s2349_s6 = scalar_lea.vmem %s2348_s5, 256 }
 0x1c8   : > { %p2350_p4 = scmp.lt.s32.totalorder %s2774_s13, %s2348_s5  ;;  %p2351_p7 = scmp.lt.s32.totalorder %s2349_s6, %s2343_s27 }
 0x1c9   : > { %p2346_p3 = pneg %p2345_p2 }
 0x1ca   : > { %p2352_p8 = por %p2351_p7, %p2350_p4 }
 0x1cc   : > { %p2353_p9 = pnand %p2352_p8, %p2346_p3 }
 0x1ce   : > { %2356 = shalt.err (!%p2353_p9)
}
 0x1cf   : > { %s2357_s22 = scalar_lea.hbm %s2772_s28, 128  ;;  %s2361_s29 = scalar_lea.hbm %s2841_s4, 256 }
 0x1d0   : > { %p2358_p10 = scmp.ne.s32.totalorder %s2772_s28, %s2357_s22  ;;  %p2362_p13 = scmp.lt.u32.totalorder %s2772_s28, %s2841_s4 }
 0x1d1   : > { %p2363_p0 = scmp.lt.u32.totalorder %s2361_s29, %s2357_s22  ;;  %p2365_p2 = scmp.lt.u32.totalorder %s2357_s22, %s2772_s28 }
 0x1d2   : > { %p2359_p11 = pnand %p2358_p10, %p2476_p5 }
 0x1d3   : > { %p2364_p1 = por %p2363_p0, %p2362_p13 }
 0x1d4   : > { %p2360_p12 = pneg %p2359_p11 }
 0x1d5   : > { %p2366_p3 = por %p2365_p2, %p2364_p1 }
 0x1d7   : > { %p2367_p4 = pnand %p2366_p3, %p2360_p12 }
 0x1d9   : > { %2370 = shalt.err (!%p2367_p4)
}
 0x1da   : > { %2016 = dma.vmem_to_hbm [thread:$0]  (%p2476_p5), %s2774_s13, 128, %s2772_s28, %s1499_s19  }
 0x1db PF: > { %p2026_p7 = scmp.ge.s32.totalorder %s2409_s18, 2  ;;  %s1549_s9 = sand.u32 1, %s2397_s15  }
 0x1dc   : > { %s1550_s10 = scalar_lea.sflag [#allocation3], %s1549_s9 }
 0x1dd   : > { %p2020_p8 = pnand %p2026_p7, %p2480_p6 }
 0x1df   : > { %2388 = dma.done.wait (!%p2020_p8), %s1550_s10, 128  }
 0x1e0   : > { %2390 = vsyncadd (!%p2020_p8), %s1550_s10, 4294967168  ;;  %s1559_s12 = scalar_lea.sflag [#allocation5], %s1549_s9 }
 0x1e1   : > { %2392 = dma.done.wait (!%p2020_p8), %s1559_s12, 128  }
 0x1e2   : > { %2394 = vsyncadd (!%p2020_p8), %s1559_s12, 4294967168  ;;  %p18_p5 = scmp.ge.s32.totalorder %s2463_s21, 4   ;;  %s2844_s15 = smov %s2401_s16 }
 0x1e3   : > { %s2845_s16 = smov %s2405_s17  ;;  %s2846_s17 = smov %s2474_s24 }
 0x1e4   : > { %s2847_s18 = smov %s2463_s21  ;;  %20 = sbr.rel (!%p18_p5) target bundleno = 5 (0x5), region = 92 }
 0x1eb   :  { %1564 = vsyncpa [#allocation3], 1 }
 0x1ec   :  { %1566 = vsyncpa [#allocation3 + $0x1], 1 }
 0x1ed   :  { %1567 = vsyncpa [#allocation5], 1 }
 0x1ee   :  { %1569 = vsyncpa [#allocation5 + $0x1], 1 }

</bundles_post_ra>
